<compile_context>
chip_gen: v6e
topology: v6e:2x2x1
jax: 0.10.0
libtpu: 0.0.40
codegen_flags: <defaults>
</compile_context>

<pallas_src>
import functools

import jax
import jax.numpy as jnp
import numpy as np
from jax import lax
from jax.experimental import pallas as pl
from jax.experimental.pallas import tpu as pltpu


# ------------------------------ fused kernel -------------------------------
def _make_kernel(bb):
    f32 = jnp.float32

    def kernel(x_ref,    # (28, bb, 28)   input, transposed (row, batch, col)
               m1_ref,   # (5, 28, 256)   conv1 taps  (out lanes = ow*6 + c)
               b1_ref,   # (1, 256)       conv1 bias on that lane grid
               n2_ref,   # (5, 256, 128)  conv2 taps  (K = uncompacted 12q+c)
               b2_ref,   # (1, 128)       conv2 bias  (lane = x*16 + c2)
               wf1_ref,  # (4, 128, 128)  fc1 per pooled row (rows at 32u+c2)
               bf1_ref, wf2_ref, bf2_ref, wf3_ref, bf3_ref,
               out_ref,  # (bb, 128)
               c1_ref,   # scratch (24*bb, 256) conv1 pre-activation
               p1_ref,   # scratch (12*bb, 256) pool1 output (uncompacted)
               c2_ref):  # scratch (8*bb, 128)  conv2 pre-activation

        # ---- conv1: 5 row-shifted GEMMs accumulated in VMEM scratch --------
        # Tap i's LHS = image rows i..i+23 for every batch row: a contiguous,
        # aligned leading-dim slice; the reshape only merges leading dims.
        for i in range(5):
            tap = jnp.dot(x_ref[i:i + 24].reshape(24 * bb, 28), m1_ref[i],
                          preferred_element_type=f32)
            if i == 0:
                c1_ref[...] = tap
            else:
                c1_ref[...] += tap

        # ---- pool1: vertical max of adjacent rows + cyclic lane roll for the
        # horizontal max (lane l receives lane l+6, i.e. roll by -6 == +250).
        # The pooled value for col q, chan c stays at lane 12q + c
        # (uncompacted); bias + ReLU commute with max so they come after.
        b1b = jnp.broadcast_to(b1_ref[...], (bb, 256))      # hoisted broadcast
        for p in range(12):
            vm = jnp.maximum(c1_ref[(2 * p) * bb:(2 * p + 1) * bb, :],
                             c1_ref[(2 * p + 1) * bb:(2 * p + 2) * bb, :])
            hz = jnp.maximum(vm, pltpu.roll(vm, shift=256 - 6, axis=1))
            p1_ref[p * bb:(p + 1) * bb, :] = jnp.maximum(hz + b1b, 0.0)

        # ---- conv2: 5 row-shifted GEMMs on the uncompacted pool1 lanes -----
        for i in range(5):
            tap = jnp.dot(p1_ref[i * bb:(i + 8) * bb, :], n2_ref[i],
                          preferred_element_type=f32)
            if i == 0:
                c2_ref[...] = tap
            else:
                c2_ref[...] += tap

        # ---- pool2 + bias + ReLU, fused straight into the fc1 accumulation -
        b2b = jnp.broadcast_to(b2_ref[...], (bb, 128))      # hoisted broadcast
        acc = jnp.broadcast_to(bf1_ref[...], (bb, 128))     # start at fc1 bias
        for t in range(4):
            vm = jnp.maximum(c2_ref[(2 * t) * bb:(2 * t + 1) * bb, :],
                             c2_ref[(2 * t + 1) * bb:(2 * t + 2) * bb, :])
            hz = jnp.maximum(vm, pltpu.roll(vm, shift=128 - 16, axis=1))
            p2 = jnp.maximum(hz + b2b, 0.0)        # valid lanes = 32u + c2
            acc = acc + jnp.dot(p2, wf1_ref[t], preferred_element_type=f32)

        # ---- fc1 ReLU -> fc2 ReLU -> fc3 -> masked softmax ------------------
        h1 = jnp.maximum(acc, 0.0)
        h2 = jnp.maximum(jnp.dot(h1, wf2_ref[...], preferred_element_type=f32)
                         + bf2_ref[...], 0.0)
        logits = (jnp.dot(h2, wf3_ref[...], preferred_element_type=f32)
                  + bf3_ref[...])

        lane = lax.broadcasted_iota(jnp.int32, (bb, 128), 1)
        z = jnp.where(lane < 10, logits, -1e30)    # only the 10 real classes
        z = z - jnp.max(z, axis=1, keepdims=True)
        e = jnp.exp(z)
        out_ref[...] = e * pl.reciprocal(jnp.sum(e, axis=1, keepdims=True),
                                         approx=True)

    return kernel


# ------------------------- one-time weight packing --------------------------
def preprocess_params(params):
    """Pack / pad / permute all weights once (host side), out of the call path."""
    w1 = np.asarray(params["conv1_w"], np.float32)   # (6, 1, 5, 5)
    b1 = np.asarray(params["conv1_b"], np.float32)
    w2 = np.asarray(params["conv2_w"], np.float32)   # (16, 6, 5, 5)
    b2 = np.asarray(params["conv2_b"], np.float32)
    f1 = np.asarray(params["fc1_w"], np.float32)     # (120, 256)
    g1 = np.asarray(params["fc1_b"], np.float32)
    f2 = np.asarray(params["fc2_w"], np.float32)     # (84, 120)
    g2 = np.asarray(params["fc2_b"], np.float32)
    f3 = np.asarray(params["fc3_w"], np.float32)     # (10, 84)
    g3 = np.asarray(params["fc3_b"], np.float32)

    # conv1: c1[(oh*bb+b), ow*6+c] = sum_{i,w} x[b, oh+i, w] * m1[i, w, ow*6+c]
    m1 = np.zeros((5, 28, 256), np.float32)
    for i in range(5):
        for ow in range(24):
            for j in range(5):
                m1[i, ow + j, ow * 6:ow * 6 + 6] = w1[:, 0, i, j]
    b1l = np.zeros((1, 256), np.float32)
    for ow in range(24):
        b1l[0, ow * 6:ow * 6 + 6] = b1

    # conv2: K lanes are the UNCOMPACTED pool1 lanes 12*xin + c1 (garbage lanes
    # get zero rows); output lanes = x*16 + c2 (exactly 128 wide).
    n2 = np.zeros((5, 256, 128), np.float32)
    for i in range(5):
        for x in range(8):
            for j in range(5):
                n2[i, 12 * (x + j):12 * (x + j) + 6,
                   x * 16:x * 16 + 16] = w2[:, :, i, j].T
    b2l = np.zeros((1, 128), np.float32)
    for x in range(8):
        b2l[0, x * 16:x * 16 + 16] = b2

    # fc1, split per pooled row t, rows indexed by the UNCOMPACTED pool2 lanes
    # 32u + c2; also folds torch's NCHW x.view(-1, 16*4*4) ordering.
    wf1 = np.zeros((4, 128, 128), np.float32)
    for t in range(4):
        for u in range(4):
            for c in range(16):
                wf1[t, 32 * u + c, :120] = f1[:, c * 16 + t * 4 + u]
    bf1 = np.zeros((1, 128), np.float32); bf1[0, :120] = g1
    wf2 = np.zeros((128, 128), np.float32); wf2[:120, :84] = f2.T
    bf2 = np.zeros((1, 128), np.float32); bf2[0, :84] = g2
    wf3 = np.zeros((128, 128), np.float32); wf3[:84, :10] = f3.T
    bf3 = np.zeros((1, 128), np.float32); bf3[0, :10] = g3

    packed = dict(m1=m1, b1l=b1l, n2=n2, b2l=b2l, wf1=wf1, bf1=bf1,
                  wf2=wf2, bf2=bf2, wf3=wf3, bf3=bf3)
    return {k: jnp.asarray(v) for k, v in packed.items()}


# ------------------------------ forward wrapper -----------------------------
def _pick_block_batch(batch):
    """Largest bb (<=128, multiple of 8); keep >=2 grid steps when the batch
    allows it (v7x megacore).  128 respects v5e/v7x VMEM budgets."""
    def r8(v):
        return ((v + 7) // 8) * 8
    bb = min(128, r8(batch))
    if batch > 8 and (batch + bb - 1) // bb < 2:
        bb = max(8, r8((batch + 1) // 2))
    return bb


def convnet_forward(prep, x_nchw):
    """Forward pass matching ConvNet.forward.  x_nchw: (B, 1, 28, 28) float32."""
    B = x_nchw.shape[0]
    assert x_nchw.shape[1:] == (1, 28, 28)
    bb = _pick_block_batch(B)
    nb = (B + bb - 1) // bb

    x = x_nchw.reshape(B, 28, 28).astype(jnp.float32)
    x = jnp.pad(x, ((0, nb * bb - B), (0, 0), (0, 0)))
    # (row, batch, col): row-shifted conv operands and pooling slabs become
    # contiguous aligned leading-dim slices; no lane padding of the input.
    xt = jnp.transpose(x, (1, 0, 2))                         # (28, nb*bb, 28)

    out = pl.pallas_call(
        _make_kernel(bb),
        out_shape=jax.ShapeDtypeStruct((nb * bb, 128), jnp.float32),
        grid=(nb,),
        in_specs=[
            pl.BlockSpec((28, bb, 28), lambda i: (0, i, 0)),     # x (transposed)
            pl.BlockSpec((5, 28, 256), lambda i: (0, 0, 0)),     # m1
            pl.BlockSpec((1, 256), lambda i: (0, 0)),            # b1
            pl.BlockSpec((5, 256, 128), lambda i: (0, 0, 0)),    # n2
            pl.BlockSpec((1, 128), lambda i: (0, 0)),            # b2
            pl.BlockSpec((4, 128, 128), lambda i: (0, 0, 0)),    # wf1
            pl.BlockSpec((1, 128), lambda i: (0, 0)),            # bf1
            pl.BlockSpec((128, 128), lambda i: (0, 0)),          # wf2
            pl.BlockSpec((1, 128), lambda i: (0, 0)),            # bf2
            pl.BlockSpec((128, 128), lambda i: (0, 0)),          # wf3
            pl.BlockSpec((1, 128), lambda i: (0, 0)),            # bf3
        ],
        out_specs=pl.BlockSpec((bb, 128), lambda i: (i, 0)),
        scratch_shapes=[
            pltpu.VMEM((24 * bb, 256), jnp.float32),   # conv1 pre-activation
            pltpu.VMEM((12 * bb, 256), jnp.float32),   # pool1 output
            pltpu.VMEM((8 * bb, 128), jnp.float32),    # conv2 pre-activation
        ],
        compiler_params=pltpu.CompilerParams(
            dimension_semantics=("parallel",),
            # ~19 MiB peak at bb=128: lift v5e's 16 MiB scoped default and
            # stay well under v7x's 64 MiB physical VMEM.
            vmem_limit_bytes=40 * 1024 * 1024,
        ),
    )(xt, prep["m1"], prep["b1l"], prep["n2"], prep["b2l"],
      prep["wf1"], prep["bf1"], prep["wf2"], prep["bf2"],
      prep["wf3"], prep["bf3"])
    return out[:B, :10]


# ----------------------------- model definition -----------------------------
def init_params(key):
    keys = jax.random.split(key, 10)

    def uniform(k, shape, fan_in):
        bound = 1.0 / np.sqrt(fan_in)
        return jax.random.uniform(k, shape, jnp.float32, -bound, bound)

    return {
        "conv1_w": uniform(keys[0], (6, 1, 5, 5), 1 * 5 * 5),
        "conv1_b": uniform(keys[1], (6,), 1 * 5 * 5),
        "conv2_w": uniform(keys[2], (16, 6, 5, 5), 6 * 5 * 5),
        "conv2_b": uniform(keys[3], (16,), 6 * 5 * 5),
        "fc1_w": uniform(keys[4], (120, 16 * 4 * 4), 16 * 4 * 4),
        "fc1_b": uniform(keys[5], (120,), 16 * 4 * 4),
        "fc2_w": uniform(keys[6], (84, 120), 120),
        "fc2_b": uniform(keys[7], (84,), 120),
        "fc3_w": uniform(keys[8], (10, 84), 84),
        "fc3_b": uniform(keys[9], (10,), 84),
    }


# -------------------------------- reference ---------------------------------
def convnet_reference(params, x):
    def conv(x, w, b):
        y = lax.conv_general_dilated(
            x, w, (1, 1), "VALID",
            dimension_numbers=("NCHW", "OIHW", "NCHW"),
            precision=lax.Precision.HIGHEST)
        return y + b.reshape(1, -1, 1, 1)

    def pool(x):
        return lax.reduce_window(x, -jnp.inf, lax.max,
                                 (1, 1, 2, 2), (1, 1, 2, 2), "VALID")

    x = pool(jax.nn.relu(conv(x, params["conv1_w"], params["conv1_b"])))
    x = pool(jax.nn.relu(conv(x, params["conv2_w"], params["conv2_b"])))
    x = x.reshape(x.shape[0], -1)
    hp = lax.Precision.HIGHEST
    x = jax.nn.relu(jnp.dot(x, params["fc1_w"].T, precision=hp) + params["fc1_b"])
    x = jax.nn.relu(jnp.dot(x, params["fc2_w"].T, precision=hp) + params["fc2_b"])
    x = jnp.dot(x, params["fc3_w"].T, precision=hp) + params["fc3_b"]
    return jax.nn.softmax(x, axis=1)


if __name__ == "__main__":
    key = jax.random.PRNGKey(0)
    pkey, xkey = jax.random.split(key)
    params = init_params(pkey)
    prep = preprocess_params(params)            # one-time weight packing

    fwd = jax.jit(convnet_forward)

    # Small shape consistent with the module (LeNet on 28x28, 1 channel).
    x_small = jax.random.normal(xkey, (2, 1, 28, 28), dtype=jnp.float32)
    out_small = jax.block_until_ready(fwd(prep, x_small))
    assert out_small.shape == (2, 10)
    ref_small = convnet_reference(params, x_small)
    # In-kernel GEMMs use the MXU's default (single bf16-pass) precision, so
    # compare against the full-f32 reference with a realistic tolerance.
    np.testing.assert_allclose(np.asarray(out_small), np.asarray(ref_small),
                               rtol=2e-2, atol=2e-3)

    # Larger batch exercises the performance path: bb=128 blocks, 2 grid steps
    # (so v7x's second TensorCore has work).  Wider tail over 2560 outputs
    # under single-pass bf16 MXU precision -> slightly looser tolerance.
    x_big = jax.random.normal(jax.random.PRNGKey(1), (256, 1, 28, 28),
                              dtype=jnp.float32)
    out_big = jax.block_until_ready(fwd(prep, x_big))
    assert out_big.shape == (256, 10)
    ref_big = convnet_reference(params, x_big)
    np.testing.assert_allclose(np.asarray(out_big), np.asarray(ref_big),
                               rtol=5e-2, atol=5e-3)

    print("KERNEL_OK")
</pallas_src>

<mosaic_0001>
module attributes {stable_mosaic.version = 11 : i64} {
  func.func @kernel(%arg0: i32, %arg1: memref<28x8x28xf32, #tpu.memory_space<vmem>>, %arg2: memref<5x28x256xf32, #tpu.memory_space<vmem>>, %arg3: memref<1x256xf32, #tpu.memory_space<vmem>>, %arg4: memref<5x256x128xf32, #tpu.memory_space<vmem>>, %arg5: memref<1x128xf32, #tpu.memory_space<vmem>>, %arg6: memref<4x128x128xf32, #tpu.memory_space<vmem>>, %arg7: memref<1x128xf32, #tpu.memory_space<vmem>>, %arg8: memref<128x128xf32, #tpu.memory_space<vmem>>, %arg9: memref<1x128xf32, #tpu.memory_space<vmem>>, %arg10: memref<128x128xf32, #tpu.memory_space<vmem>>, %arg11: memref<1x128xf32, #tpu.memory_space<vmem>>, %arg12: memref<8x128xf32, #tpu.memory_space<vmem>>, %arg13: memref<192x256xf32, #tpu.memory_space<vmem>>, %arg14: memref<96x256xf32, #tpu.memory_space<vmem>>, %arg15: memref<64x128xf32, #tpu.memory_space<vmem>>) attributes {dimension_semantics = [#tpu.dimension_semantics<parallel>], iteration_bounds = array<i64: 1>, scalar_prefetch = 0 : i64, scratch_operands = 3 : i64, tpu.core_type = #tpu.core_type<tc>, window_params = [{transform_indices = @transform_0, window_bounds = array<i64: 28, 8, 28>}, {pipeline_mode = #tpu.pipeline_mode<synchronous>, transform_indices = @transform_1, window_bounds = array<i64: 5, 28, 256>}, {pipeline_mode = #tpu.pipeline_mode<synchronous>, transform_indices = @transform_2, window_bounds = array<i64: 1, 256>}, {pipeline_mode = #tpu.pipeline_mode<synchronous>, transform_indices = @transform_3, window_bounds = array<i64: 5, 256, 128>}, {pipeline_mode = #tpu.pipeline_mode<synchronous>, transform_indices = @transform_4, window_bounds = array<i64: 1, 128>}, {pipeline_mode = #tpu.pipeline_mode<synchronous>, transform_indices = @transform_5, window_bounds = array<i64: 4, 128, 128>}, {pipeline_mode = #tpu.pipeline_mode<synchronous>, transform_indices = @transform_6, window_bounds = array<i64: 1, 128>}, {pipeline_mode = #tpu.pipeline_mode<synchronous>, transform_indices = @transform_7, window_bounds = array<i64: 128, 128>}, {pipeline_mode = #tpu.pipeline_mode<synchronous>, transform_indices = @transform_8, window_bounds = array<i64: 1, 128>}, {pipeline_mode = #tpu.pipeline_mode<synchronous>, transform_indices = @transform_9, window_bounds = array<i64: 128, 128>}, {pipeline_mode = #tpu.pipeline_mode<synchronous>, transform_indices = @transform_10, window_bounds = array<i64: 1, 128>}, {transform_indices = @transform_11, window_bounds = array<i64: 8, 128>}]} {
    %c0 = arith.constant 0 : index
    %c0_0 = arith.constant 0 : index
    %c0_1 = arith.constant 0 : index
    %0 = vector.load %arg1[%c0, %c0_0, %c0_1] : memref<28x8x28xf32, #tpu.memory_space<vmem>>, vector<24x8x28xf32>
    %1 = vector.shape_cast %0 : vector<24x8x28xf32> to vector<192x28xf32>
    %c0_2 = arith.constant 0 : index
    %c0_3 = arith.constant 0 : index
    %c0_4 = arith.constant 0 : index
    %2 = vector.load %arg2[%c0_2, %c0_3, %c0_4] : memref<5x28x256xf32, #tpu.memory_space<vmem>>, vector<1x28x256xf32>
    %3 = vector.shape_cast %2 : vector<1x28x256xf32> to vector<28x256xf32>
    %cst = arith.constant dense<0.000000e+00> : vector<192x256xf32>
    %4 = tpu.matmul %1, %3, %cst {dimension_numbers = #tpu.dot_dimension_numbers<[1], [0], [0], [1], [0, 0, 1, 1], [], []>} : vector<192x28xf32>, vector<28x256xf32>, vector<192x256xf32> -> vector<192x256xf32>
    %c0_5 = arith.constant 0 : index
    %c0_6 = arith.constant 0 : index
    %5 = vector.load %arg13[%c0_5, %c0_6] : memref<192x256xf32, #tpu.memory_space<vmem>>, vector<192x256xf32>
    tpu.vector_store %arg13[%c0_5, %c0_6], %4 {strides = array<i32>} : memref<192x256xf32, #tpu.memory_space<vmem>>, vector<192x256xf32>,
    %c1 = arith.constant 1 : index
    %c0_7 = arith.constant 0 : index
    %c0_8 = arith.constant 0 : index
    %6 = vector.load %arg1[%c1, %c0_7, %c0_8] : memref<28x8x28xf32, #tpu.memory_space<vmem>>, vector<24x8x28xf32>
    %7 = vector.shape_cast %6 : vector<24x8x28xf32> to vector<192x28xf32>
    %c1_9 = arith.constant 1 : index
    %c0_10 = arith.constant 0 : index
    %c0_11 = arith.constant 0 : index
    %8 = vector.load %arg2[%c1_9, %c0_10, %c0_11] : memref<5x28x256xf32, #tpu.memory_space<vmem>>, vector<1x28x256xf32>
    %9 = vector.shape_cast %8 : vector<1x28x256xf32> to vector<28x256xf32>
    %cst_12 = arith.constant dense<0.000000e+00> : vector<192x256xf32>
    %10 = tpu.matmul %7, %9, %cst_12 {dimension_numbers = #tpu.dot_dimension_numbers<[1], [0], [0], [1], [0, 0, 1, 1], [], []>} : vector<192x28xf32>, vector<28x256xf32>, vector<192x256xf32> -> vector<192x256xf32>
    %c0_13 = arith.constant 0 : index
    %c0_14 = arith.constant 0 : index
    %11 = vector.load %arg13[%c0_13, %c0_14] : memref<192x256xf32, #tpu.memory_space<vmem>>, vector<192x256xf32>
    %12 = arith.addf %11, %10 : vector<192x256xf32>
    %c0_15 = arith.constant 0 : index
    %c0_16 = arith.constant 0 : index
    %13 = vector.load %arg13[%c0_15, %c0_16] : memref<192x256xf32, #tpu.memory_space<vmem>>, vector<192x256xf32>
    tpu.vector_store %arg13[%c0_15, %c0_16], %12 {strides = array<i32>} : memref<192x256xf32, #tpu.memory_space<vmem>>, vector<192x256xf32>,
    %c2 = arith.constant 2 : index
    %c0_17 = arith.constant 0 : index
    %c0_18 = arith.constant 0 : index
    %14 = vector.load %arg1[%c2, %c0_17, %c0_18] : memref<28x8x28xf32, #tpu.memory_space<vmem>>, vector<24x8x28xf32>
    %15 = vector.shape_cast %14 : vector<24x8x28xf32> to vector<192x28xf32>
    %c2_19 = arith.constant 2 : index
    %c0_20 = arith.constant 0 : index
    %c0_21 = arith.constant 0 : index
    %16 = vector.load %arg2[%c2_19, %c0_20, %c0_21] : memref<5x28x256xf32, #tpu.memory_space<vmem>>, vector<1x28x256xf32>
    %17 = vector.shape_cast %16 : vector<1x28x256xf32> to vector<28x256xf32>
    %cst_22 = arith.constant dense<0.000000e+00> : vector<192x256xf32>
    %18 = tpu.matmul %15, %17, %cst_22 {dimension_numbers = #tpu.dot_dimension_numbers<[1], [0], [0], [1], [0, 0, 1, 1], [], []>} : vector<192x28xf32>, vector<28x256xf32>, vector<192x256xf32> -> vector<192x256xf32>
    %c0_23 = arith.constant 0 : index
    %c0_24 = arith.constant 0 : index
    %19 = vector.load %arg13[%c0_23, %c0_24] : memref<192x256xf32, #tpu.memory_space<vmem>>, vector<192x256xf32>
    %20 = arith.addf %19, %18 : vector<192x256xf32>
    %c0_25 = arith.constant 0 : index
    %c0_26 = arith.constant 0 : index
    %21 = vector.load %arg13[%c0_25, %c0_26] : memref<192x256xf32, #tpu.memory_space<vmem>>, vector<192x256xf32>
    tpu.vector_store %arg13[%c0_25, %c0_26], %20 {strides = array<i32>} : memref<192x256xf32, #tpu.memory_space<vmem>>, vector<192x256xf32>,
    %c3 = arith.constant 3 : index
    %c0_27 = arith.constant 0 : index
    %c0_28 = arith.constant 0 : index
    %22 = vector.load %arg1[%c3, %c0_27, %c0_28] : memref<28x8x28xf32, #tpu.memory_space<vmem>>, vector<24x8x28xf32>
    %23 = vector.shape_cast %22 : vector<24x8x28xf32> to vector<192x28xf32>
    %c3_29 = arith.constant 3 : index
    %c0_30 = arith.constant 0 : index
    %c0_31 = arith.constant 0 : index
    %24 = vector.load %arg2[%c3_29, %c0_30, %c0_31] : memref<5x28x256xf32, #tpu.memory_space<vmem>>, vector<1x28x256xf32>
    %25 = vector.shape_cast %24 : vector<1x28x256xf32> to vector<28x256xf32>
    %cst_32 = arith.constant dense<0.000000e+00> : vector<192x256xf32>
    %26 = tpu.matmul %23, %25, %cst_32 {dimension_numbers = #tpu.dot_dimension_numbers<[1], [0], [0], [1], [0, 0, 1, 1], [], []>} : vector<192x28xf32>, vector<28x256xf32>, vector<192x256xf32> -> vector<192x256xf32>
    %c0_33 = arith.constant 0 : index
    %c0_34 = arith.constant 0 : index
    %27 = vector.load %arg13[%c0_33, %c0_34] : memref<192x256xf32, #tpu.memory_space<vmem>>, vector<192x256xf32>
    %28 = arith.addf %27, %26 : vector<192x256xf32>
    %c0_35 = arith.constant 0 : index
    %c0_36 = arith.constant 0 : index
    %29 = vector.load %arg13[%c0_35, %c0_36] : memref<192x256xf32, #tpu.memory_space<vmem>>, vector<192x256xf32>
    tpu.vector_store %arg13[%c0_35, %c0_36], %28 {strides = array<i32>} : memref<192x256xf32, #tpu.memory_space<vmem>>, vector<192x256xf32>,
    %c4 = arith.constant 4 : index
    %c0_37 = arith.constant 0 : index
    %c0_38 = arith.constant 0 : index
    %30 = vector.load %arg1[%c4, %c0_37, %c0_38] : memref<28x8x28xf32, #tpu.memory_space<vmem>>, vector<24x8x28xf32>
    %31 = vector.shape_cast %30 : vector<24x8x28xf32> to vector<192x28xf32>
    %c4_39 = arith.constant 4 : index
    %c0_40 = arith.constant 0 : index
    %c0_41 = arith.constant 0 : index
    %32 = vector.load %arg2[%c4_39, %c0_40, %c0_41] : memref<5x28x256xf32, #tpu.memory_space<vmem>>, vector<1x28x256xf32>
    %33 = vector.shape_cast %32 : vector<1x28x256xf32> to vector<28x256xf32>
    %cst_42 = arith.constant dense<0.000000e+00> : vector<192x256xf32>
    %34 = tpu.matmul %31, %33, %cst_42 {dimension_numbers = #tpu.dot_dimension_numbers<[1], [0], [0], [1], [0, 0, 1, 1], [], []>} : vector<192x28xf32>, vector<28x256xf32>, vector<192x256xf32> -> vector<192x256xf32>
    %c0_43 = arith.constant 0 : index
    %c0_44 = arith.constant 0 : index
    %35 = vector.load %arg13[%c0_43, %c0_44] : memref<192x256xf32, #tpu.memory_space<vmem>>, vector<192x256xf32>
    %36 = arith.addf %35, %34 : vector<192x256xf32>
    %c0_45 = arith.constant 0 : index
    %c0_46 = arith.constant 0 : index
    %37 = vector.load %arg13[%c0_45, %c0_46] : memref<192x256xf32, #tpu.memory_space<vmem>>, vector<192x256xf32>
    tpu.vector_store %arg13[%c0_45, %c0_46], %36 {strides = array<i32>} : memref<192x256xf32, #tpu.memory_space<vmem>>, vector<192x256xf32>,
    %c0_47 = arith.constant 0 : index
    %c0_48 = arith.constant 0 : index
    %38 = vector.load %arg3[%c0_47, %c0_48] : memref<1x256xf32, #tpu.memory_space<vmem>>, vector<1x256xf32>
    %39 = vector.shape_cast %38 : vector<1x256xf32> to vector<1x256xf32>
    %40 = vector.broadcast %39 : vector<1x256xf32> to vector<8x256xf32>
    %c0_49 = arith.constant 0 : index
    %c0_50 = arith.constant 0 : index
    %41 = vector.load %arg13[%c0_49, %c0_50] : memref<192x256xf32, #tpu.memory_space<vmem>>, vector<8x256xf32>
    %c8 = arith.constant 8 : index
    %c0_51 = arith.constant 0 : index
    %42 = vector.load %arg13[%c8, %c0_51] : memref<192x256xf32, #tpu.memory_space<vmem>>, vector<8x256xf32>
    %43 = arith.maximumf %41, %42 : vector<8x256xf32>
    %c250_i32 = arith.constant 250 : i32
    %44 = tpu.dynamic_rotate %43 by %c250_i32 dim 1 : vector<8x256xf32>, i32 -> vector<8x256xf32>
    %45 = arith.maximumf %43, %44 : vector<8x256xf32>
    %46 = arith.addf %45, %40 : vector<8x256xf32>
    %cst_52 = arith.constant 0.000000e+00 : f32
    %47 = vector.broadcast %cst_52 : f32 to vector<8x256xf32>
    %48 = arith.maximumf %46, %47 : vector<8x256xf32>
    %c0_53 = arith.constant 0 : index
    %c0_54 = arith.constant 0 : index
    %49 = vector.load %arg14[%c0_53, %c0_54] : memref<96x256xf32, #tpu.memory_space<vmem>>, vector<8x256xf32>
    tpu.vector_store %arg14[%c0_53, %c0_54], %48 {strides = array<i32>} : memref<96x256xf32, #tpu.memory_space<vmem>>, vector<8x256xf32>,
    %c16 = arith.constant 16 : index
    %c0_55 = arith.constant 0 : index
    %50 = vector.load %arg13[%c16, %c0_55] : memref<192x256xf32, #tpu.memory_space<vmem>>, vector<8x256xf32>
    %c24 = arith.constant 24 : index
    %c0_56 = arith.constant 0 : index
    %51 = vector.load %arg13[%c24, %c0_56] : memref<192x256xf32, #tpu.memory_space<vmem>>, vector<8x256xf32>
    %52 = arith.maximumf %50, %51 : vector<8x256xf32>
    %c250_i32_57 = arith.constant 250 : i32
    %53 = tpu.dynamic_rotate %52 by %c250_i32_57 dim 1 : vector<8x256xf32>, i32 -> vector<8x256xf32>
    %54 = arith.maximumf %52, %53 : vector<8x256xf32>
    %55 = arith.addf %54, %40 : vector<8x256xf32>
    %cst_58 = arith.constant 0.000000e+00 : f32
    %56 = vector.broadcast %cst_58 : f32 to vector<8x256xf32>
    %57 = arith.maximumf %55, %56 : vector<8x256xf32>
    %c8_59 = arith.constant 8 : index
    %c0_60 = arith.constant 0 : index
    %58 = vector.load %arg14[%c8_59, %c0_60] : memref<96x256xf32, #tpu.memory_space<vmem>>, vector<8x256xf32>
    tpu.vector_store %arg14[%c8_59, %c0_60], %57 {strides = array<i32>} : memref<96x256xf32, #tpu.memory_space<vmem>>, vector<8x256xf32>,
    %c32 = arith.constant 32 : index
    %c0_61 = arith.constant 0 : index
    %59 = vector.load %arg13[%c32, %c0_61] : memref<192x256xf32, #tpu.memory_space<vmem>>, vector<8x256xf32>
    %c40 = arith.constant 40 : index
    %c0_62 = arith.constant 0 : index
    %60 = vector.load %arg13[%c40, %c0_62] : memref<192x256xf32, #tpu.memory_space<vmem>>, vector<8x256xf32>
    %61 = arith.maximumf %59, %60 : vector<8x256xf32>
    %c250_i32_63 = arith.constant 250 : i32
    %62 = tpu.dynamic_rotate %61 by %c250_i32_63 dim 1 : vector<8x256xf32>, i32 -> vector<8x256xf32>
    %63 = arith.maximumf %61, %62 : vector<8x256xf32>
    %64 = arith.addf %63, %40 : vector<8x256xf32>
    %cst_64 = arith.constant 0.000000e+00 : f32
    %65 = vector.broadcast %cst_64 : f32 to vector<8x256xf32>
    %66 = arith.maximumf %64, %65 : vector<8x256xf32>
    %c16_65 = arith.constant 16 : index
    %c0_66 = arith.constant 0 : index
    %67 = vector.load %arg14[%c16_65, %c0_66] : memref<96x256xf32, #tpu.memory_space<vmem>>, vector<8x256xf32>
    tpu.vector_store %arg14[%c16_65, %c0_66], %66 {strides = array<i32>} : memref<96x256xf32, #tpu.memory_space<vmem>>, vector<8x256xf32>,
    %c48 = arith.constant 48 : index
    %c0_67 = arith.constant 0 : index
    %68 = vector.load %arg13[%c48, %c0_67] : memref<192x256xf32, #tpu.memory_space<vmem>>, vector<8x256xf32>
    %c56 = arith.constant 56 : index
    %c0_68 = arith.constant 0 : index
    %69 = vector.load %arg13[%c56, %c0_68] : memref<192x256xf32, #tpu.memory_space<vmem>>, vector<8x256xf32>
    %70 = arith.maximumf %68, %69 : vector<8x256xf32>
    %c250_i32_69 = arith.constant 250 : i32
    %71 = tpu.dynamic_rotate %70 by %c250_i32_69 dim 1 : vector<8x256xf32>, i32 -> vector<8x256xf32>
    %72 = arith.maximumf %70, %71 : vector<8x256xf32>
    %73 = arith.addf %72, %40 : vector<8x256xf32>
    %cst_70 = arith.constant 0.000000e+00 : f32
    %74 = vector.broadcast %cst_70 : f32 to vector<8x256xf32>
    %75 = arith.maximumf %73, %74 : vector<8x256xf32>
    %c24_71 = arith.constant 24 : index
    %c0_72 = arith.constant 0 : index
    %76 = vector.load %arg14[%c24_71, %c0_72] : memref<96x256xf32, #tpu.memory_space<vmem>>, vector<8x256xf32>
    tpu.vector_store %arg14[%c24_71, %c0_72], %75 {strides = array<i32>} : memref<96x256xf32, #tpu.memory_space<vmem>>, vector<8x256xf32>,
    %c64 = arith.constant 64 : index
    %c0_73 = arith.constant 0 : index
    %77 = vector.load %arg13[%c64, %c0_73] : memref<192x256xf32, #tpu.memory_space<vmem>>, vector<8x256xf32>
    %c72 = arith.constant 72 : index
    %c0_74 = arith.constant 0 : index
    %78 = vector.load %arg13[%c72, %c0_74] : memref<192x256xf32, #tpu.memory_space<vmem>>, vector<8x256xf32>
    %79 = arith.maximumf %77, %78 : vector<8x256xf32>
    %c250_i32_75 = arith.constant 250 : i32
    %80 = tpu.dynamic_rotate %79 by %c250_i32_75 dim 1 : vector<8x256xf32>, i32 -> vector<8x256xf32>
    %81 = arith.maximumf %79, %80 : vector<8x256xf32>
    %82 = arith.addf %81, %40 : vector<8x256xf32>
    %cst_76 = arith.constant 0.000000e+00 : f32
    %83 = vector.broadcast %cst_76 : f32 to vector<8x256xf32>
    %84 = arith.maximumf %82, %83 : vector<8x256xf32>
    %c32_77 = arith.constant 32 : index
    %c0_78 = arith.constant 0 : index
    %85 = vector.load %arg14[%c32_77, %c0_78] : memref<96x256xf32, #tpu.memory_space<vmem>>, vector<8x256xf32>
    tpu.vector_store %arg14[%c32_77, %c0_78], %84 {strides = array<i32>} : memref<96x256xf32, #tpu.memory_space<vmem>>, vector<8x256xf32>,
    %c80 = arith.constant 80 : index
    %c0_79 = arith.constant 0 : index
    %86 = vector.load %arg13[%c80, %c0_79] : memref<192x256xf32, #tpu.memory_space<vmem>>, vector<8x256xf32>
    %c88 = arith.constant 88 : index
    %c0_80 = arith.constant 0 : index
    %87 = vector.load %arg13[%c88, %c0_80] : memref<192x256xf32, #tpu.memory_space<vmem>>, vector<8x256xf32>
    %88 = arith.maximumf %86, %87 : vector<8x256xf32>
    %c250_i32_81 = arith.constant 250 : i32
    %89 = tpu.dynamic_rotate %88 by %c250_i32_81 dim 1 : vector<8x256xf32>, i32 -> vector<8x256xf32>
    %90 = arith.maximumf %88, %89 : vector<8x256xf32>
    %91 = arith.addf %90, %40 : vector<8x256xf32>
    %cst_82 = arith.constant 0.000000e+00 : f32
    %92 = vector.broadcast %cst_82 : f32 to vector<8x256xf32>
    %93 = arith.maximumf %91, %92 : vector<8x256xf32>
    %c40_83 = arith.constant 40 : index
    %c0_84 = arith.constant 0 : index
    %94 = vector.load %arg14[%c40_83, %c0_84] : memref<96x256xf32, #tpu.memory_space<vmem>>, vector<8x256xf32>
    tpu.vector_store %arg14[%c40_83, %c0_84], %93 {strides = array<i32>} : memref<96x256xf32, #tpu.memory_space<vmem>>, vector<8x256xf32>,
    %c96 = arith.constant 96 : index
    %c0_85 = arith.constant 0 : index
    %95 = vector.load %arg13[%c96, %c0_85] : memref<192x256xf32, #tpu.memory_space<vmem>>, vector<8x256xf32>
    %c104 = arith.constant 104 : index
    %c0_86 = arith.constant 0 : index
    %96 = vector.load %arg13[%c104, %c0_86] : memref<192x256xf32, #tpu.memory_space<vmem>>, vector<8x256xf32>
    %97 = arith.maximumf %95, %96 : vector<8x256xf32>
    %c250_i32_87 = arith.constant 250 : i32
    %98 = tpu.dynamic_rotate %97 by %c250_i32_87 dim 1 : vector<8x256xf32>, i32 -> vector<8x256xf32>
    %99 = arith.maximumf %97, %98 : vector<8x256xf32>
    %100 = arith.addf %99, %40 : vector<8x256xf32>
    %cst_88 = arith.constant 0.000000e+00 : f32
    %101 = vector.broadcast %cst_88 : f32 to vector<8x256xf32>
    %102 = arith.maximumf %100, %101 : vector<8x256xf32>
    %c48_89 = arith.constant 48 : index
    %c0_90 = arith.constant 0 : index
    %103 = vector.load %arg14[%c48_89, %c0_90] : memref<96x256xf32, #tpu.memory_space<vmem>>, vector<8x256xf32>
    tpu.vector_store %arg14[%c48_89, %c0_90], %102 {strides = array<i32>} : memref<96x256xf32, #tpu.memory_space<vmem>>, vector<8x256xf32>,
    %c112 = arith.constant 112 : index
    %c0_91 = arith.constant 0 : index
    %104 = vector.load %arg13[%c112, %c0_91] : memref<192x256xf32, #tpu.memory_space<vmem>>, vector<8x256xf32>
    %c120 = arith.constant 120 : index
    %c0_92 = arith.constant 0 : index
    %105 = vector.load %arg13[%c120, %c0_92] : memref<192x256xf32, #tpu.memory_space<vmem>>, vector<8x256xf32>
    %106 = arith.maximumf %104, %105 : vector<8x256xf32>
    %c250_i32_93 = arith.constant 250 : i32
    %107 = tpu.dynamic_rotate %106 by %c250_i32_93 dim 1 : vector<8x256xf32>, i32 -> vector<8x256xf32>
    %108 = arith.maximumf %106, %107 : vector<8x256xf32>
    %109 = arith.addf %108, %40 : vector<8x256xf32>
    %cst_94 = arith.constant 0.000000e+00 : f32
    %110 = vector.broadcast %cst_94 : f32 to vector<8x256xf32>
    %111 = arith.maximumf %109, %110 : vector<8x256xf32>
    %c56_95 = arith.constant 56 : index
    %c0_96 = arith.constant 0 : index
    %112 = vector.load %arg14[%c56_95, %c0_96] : memref<96x256xf32, #tpu.memory_space<vmem>>, vector<8x256xf32>
    tpu.vector_store %arg14[%c56_95, %c0_96], %111 {strides = array<i32>} : memref<96x256xf32, #tpu.memory_space<vmem>>, vector<8x256xf32>,
    %c128 = arith.constant 128 : index
    %c0_97 = arith.constant 0 : index
    %113 = vector.load %arg13[%c128, %c0_97] : memref<192x256xf32, #tpu.memory_space<vmem>>, vector<8x256xf32>
    %c136 = arith.constant 136 : index
    %c0_98 = arith.constant 0 : index
    %114 = vector.load %arg13[%c136, %c0_98] : memref<192x256xf32, #tpu.memory_space<vmem>>, vector<8x256xf32>
    %115 = arith.maximumf %113, %114 : vector<8x256xf32>
    %c250_i32_99 = arith.constant 250 : i32
    %116 = tpu.dynamic_rotate %115 by %c250_i32_99 dim 1 : vector<8x256xf32>, i32 -> vector<8x256xf32>
    %117 = arith.maximumf %115, %116 : vector<8x256xf32>
    %118 = arith.addf %117, %40 : vector<8x256xf32>
    %cst_100 = arith.constant 0.000000e+00 : f32
    %119 = vector.broadcast %cst_100 : f32 to vector<8x256xf32>
    %120 = arith.maximumf %118, %119 : vector<8x256xf32>
    %c64_101 = arith.constant 64 : index
    %c0_102 = arith.constant 0 : index
    %121 = vector.load %arg14[%c64_101, %c0_102] : memref<96x256xf32, #tpu.memory_space<vmem>>, vector<8x256xf32>
    tpu.vector_store %arg14[%c64_101, %c0_102], %120 {strides = array<i32>} : memref<96x256xf32, #tpu.memory_space<vmem>>, vector<8x256xf32>,
    %c144 = arith.constant 144 : index
    %c0_103 = arith.constant 0 : index
    %122 = vector.load %arg13[%c144, %c0_103] : memref<192x256xf32, #tpu.memory_space<vmem>>, vector<8x256xf32>
    %c152 = arith.constant 152 : index
    %c0_104 = arith.constant 0 : index
    %123 = vector.load %arg13[%c152, %c0_104] : memref<192x256xf32, #tpu.memory_space<vmem>>, vector<8x256xf32>
    %124 = arith.maximumf %122, %123 : vector<8x256xf32>
    %c250_i32_105 = arith.constant 250 : i32
    %125 = tpu.dynamic_rotate %124 by %c250_i32_105 dim 1 : vector<8x256xf32>, i32 -> vector<8x256xf32>
    %126 = arith.maximumf %124, %125 : vector<8x256xf32>
    %127 = arith.addf %126, %40 : vector<8x256xf32>
    %cst_106 = arith.constant 0.000000e+00 : f32
    %128 = vector.broadcast %cst_106 : f32 to vector<8x256xf32>
    %129 = arith.maximumf %127, %128 : vector<8x256xf32>
    %c72_107 = arith.constant 72 : index
    %c0_108 = arith.constant 0 : index
    %130 = vector.load %arg14[%c72_107, %c0_108] : memref<96x256xf32, #tpu.memory_space<vmem>>, vector<8x256xf32>
    tpu.vector_store %arg14[%c72_107, %c0_108], %129 {strides = array<i32>} : memref<96x256xf32, #tpu.memory_space<vmem>>, vector<8x256xf32>,
    %c160 = arith.constant 160 : index
    %c0_109 = arith.constant 0 : index
    %131 = vector.load %arg13[%c160, %c0_109] : memref<192x256xf32, #tpu.memory_space<vmem>>, vector<8x256xf32>
    %c168 = arith.constant 168 : index
    %c0_110 = arith.constant 0 : index
    %132 = vector.load %arg13[%c168, %c0_110] : memref<192x256xf32, #tpu.memory_space<vmem>>, vector<8x256xf32>
    %133 = arith.maximumf %131, %132 : vector<8x256xf32>
    %c250_i32_111 = arith.constant 250 : i32
    %134 = tpu.dynamic_rotate %133 by %c250_i32_111 dim 1 : vector<8x256xf32>, i32 -> vector<8x256xf32>
    %135 = arith.maximumf %133, %134 : vector<8x256xf32>
    %136 = arith.addf %135, %40 : vector<8x256xf32>
    %cst_112 = arith.constant 0.000000e+00 : f32
    %137 = vector.broadcast %cst_112 : f32 to vector<8x256xf32>
    %138 = arith.maximumf %136, %137 : vector<8x256xf32>
    %c80_113 = arith.constant 80 : index
    %c0_114 = arith.constant 0 : index
    %139 = vector.load %arg14[%c80_113, %c0_114] : memref<96x256xf32, #tpu.memory_space<vmem>>, vector<8x256xf32>
    tpu.vector_store %arg14[%c80_113, %c0_114], %138 {strides = array<i32>} : memref<96x256xf32, #tpu.memory_space<vmem>>, vector<8x256xf32>,
    %c176 = arith.constant 176 : index
    %c0_115 = arith.constant 0 : index
    %140 = vector.load %arg13[%c176, %c0_115] : memref<192x256xf32, #tpu.memory_space<vmem>>, vector<8x256xf32>
    %c184 = arith.constant 184 : index
    %c0_116 = arith.constant 0 : index
    %141 = vector.load %arg13[%c184, %c0_116] : memref<192x256xf32, #tpu.memory_space<vmem>>, vector<8x256xf32>
    %142 = arith.maximumf %140, %141 : vector<8x256xf32>
    %c250_i32_117 = arith.constant 250 : i32
    %143 = tpu.dynamic_rotate %142 by %c250_i32_117 dim 1 : vector<8x256xf32>, i32 -> vector<8x256xf32>
    %144 = arith.maximumf %142, %143 : vector<8x256xf32>
    %145 = arith.addf %144, %40 : vector<8x256xf32>
    %cst_118 = arith.constant 0.000000e+00 : f32
    %146 = vector.broadcast %cst_118 : f32 to vector<8x256xf32>
    %147 = arith.maximumf %145, %146 : vector<8x256xf32>
    %c88_119 = arith.constant 88 : index
    %c0_120 = arith.constant 0 : index
    %148 = vector.load %arg14[%c88_119, %c0_120] : memref<96x256xf32, #tpu.memory_space<vmem>>, vector<8x256xf32>
    tpu.vector_store %arg14[%c88_119, %c0_120], %147 {strides = array<i32>} : memref<96x256xf32, #tpu.memory_space<vmem>>, vector<8x256xf32>,
    %c0_121 = arith.constant 0 : index
    %c0_122 = arith.constant 0 : index
    %149 = vector.load %arg14[%c0_121, %c0_122] : memref<96x256xf32, #tpu.memory_space<vmem>>, vector<64x256xf32>
    %c0_123 = arith.constant 0 : index
    %c0_124 = arith.constant 0 : index
    %c0_125 = arith.constant 0 : index
    %150 = vector.load %arg4[%c0_123, %c0_124, %c0_125] : memref<5x256x128xf32, #tpu.memory_space<vmem>>, vector<1x256x128xf32>
    %151 = vector.shape_cast %150 : vector<1x256x128xf32> to vector<256x128xf32>
    %cst_126 = arith.constant dense<0.000000e+00> : vector<64x128xf32>
    %152 = tpu.matmul %149, %151, %cst_126 {dimension_numbers = #tpu.dot_dimension_numbers<[1], [0], [0], [1], [0, 0, 1, 1], [], []>} : vector<64x256xf32>, vector<256x128xf32>, vector<64x128xf32> -> vector<64x128xf32>
    %c0_127 = arith.constant 0 : index
    %c0_128 = arith.constant 0 : index
    %153 = vector.load %arg15[%c0_127, %c0_128] : memref<64x128xf32, #tpu.memory_space<vmem>>, vector<64x128xf32>
    tpu.vector_store %arg15[%c0_127, %c0_128], %152 {strides = array<i32>} : memref<64x128xf32, #tpu.memory_space<vmem>>, vector<64x128xf32>,
    %c8_129 = arith.constant 8 : index
    %c0_130 = arith.constant 0 : index
    %154 = vector.load %arg14[%c8_129, %c0_130] : memref<96x256xf32, #tpu.memory_space<vmem>>, vector<64x256xf32>
    %c1_131 = arith.constant 1 : index
    %c0_132 = arith.constant 0 : index
    %c0_133 = arith.constant 0 : index
    %155 = vector.load %arg4[%c1_131, %c0_132, %c0_133] : memref<5x256x128xf32, #tpu.memory_space<vmem>>, vector<1x256x128xf32>
    %156 = vector.shape_cast %155 : vector<1x256x128xf32> to vector<256x128xf32>
    %cst_134 = arith.constant dense<0.000000e+00> : vector<64x128xf32>
    %157 = tpu.matmul %154, %156, %cst_134 {dimension_numbers = #tpu.dot_dimension_numbers<[1], [0], [0], [1], [0, 0, 1, 1], [], []>} : vector<64x256xf32>, vector<256x128xf32>, vector<64x128xf32> -> vector<64x128xf32>
    %c0_135 = arith.constant 0 : index
    %c0_136 = arith.constant 0 : index
    %158 = vector.load %arg15[%c0_135, %c0_136] : memref<64x128xf32, #tpu.memory_space<vmem>>, vector<64x128xf32>
    %159 = arith.addf %158, %157 : vector<64x128xf32>
    %c0_137 = arith.constant 0 : index
    %c0_138 = arith.constant 0 : index
    %160 = vector.load %arg15[%c0_137, %c0_138] : memref<64x128xf32, #tpu.memory_space<vmem>>, vector<64x128xf32>
    tpu.vector_store %arg15[%c0_137, %c0_138], %159 {strides = array<i32>} : memref<64x128xf32, #tpu.memory_space<vmem>>, vector<64x128xf32>,
    %c16_139 = arith.constant 16 : index
    %c0_140 = arith.constant 0 : index
    %161 = vector.load %arg14[%c16_139, %c0_140] : memref<96x256xf32, #tpu.memory_space<vmem>>, vector<64x256xf32>
    %c2_141 = arith.constant 2 : index
    %c0_142 = arith.constant 0 : index
    %c0_143 = arith.constant 0 : index
    %162 = vector.load %arg4[%c2_141, %c0_142, %c0_143] : memref<5x256x128xf32, #tpu.memory_space<vmem>>, vector<1x256x128xf32>
    %163 = vector.shape_cast %162 : vector<1x256x128xf32> to vector<256x128xf32>
    %cst_144 = arith.constant dense<0.000000e+00> : vector<64x128xf32>
    %164 = tpu.matmul %161, %163, %cst_144 {dimension_numbers = #tpu.dot_dimension_numbers<[1], [0], [0], [1], [0, 0, 1, 1], [], []>} : vector<64x256xf32>, vector<256x128xf32>, vector<64x128xf32> -> vector<64x128xf32>
    %c0_145 = arith.constant 0 : index
    %c0_146 = arith.constant 0 : index
    %165 = vector.load %arg15[%c0_145, %c0_146] : memref<64x128xf32, #tpu.memory_space<vmem>>, vector<64x128xf32>
    %166 = arith.addf %165, %164 : vector<64x128xf32>
    %c0_147 = arith.constant 0 : index
    %c0_148 = arith.constant 0 : index
    %167 = vector.load %arg15[%c0_147, %c0_148] : memref<64x128xf32, #tpu.memory_space<vmem>>, vector<64x128xf32>
    tpu.vector_store %arg15[%c0_147, %c0_148], %166 {strides = array<i32>} : memref<64x128xf32, #tpu.memory_space<vmem>>, vector<64x128xf32>,
    %c24_149 = arith.constant 24 : index
    %c0_150 = arith.constant 0 : index
    %168 = vector.load %arg14[%c24_149, %c0_150] : memref<96x256xf32, #tpu.memory_space<vmem>>, vector<64x256xf32>
    %c3_151 = arith.constant 3 : index
    %c0_152 = arith.constant 0 : index
    %c0_153 = arith.constant 0 : index
    %169 = vector.load %arg4[%c3_151, %c0_152, %c0_153] : memref<5x256x128xf32, #tpu.memory_space<vmem>>, vector<1x256x128xf32>
    %170 = vector.shape_cast %169 : vector<1x256x128xf32> to vector<256x128xf32>
    %cst_154 = arith.constant dense<0.000000e+00> : vector<64x128xf32>
    %171 = tpu.matmul %168, %170, %cst_154 {dimension_numbers = #tpu.dot_dimension_numbers<[1], [0], [0], [1], [0, 0, 1, 1], [], []>} : vector<64x256xf32>, vector<256x128xf32>, vector<64x128xf32> -> vector<64x128xf32>
    %c0_155 = arith.constant 0 : index
    %c0_156 = arith.constant 0 : index
    %172 = vector.load %arg15[%c0_155, %c0_156] : memref<64x128xf32, #tpu.memory_space<vmem>>, vector<64x128xf32>
    %173 = arith.addf %172, %171 : vector<64x128xf32>
    %c0_157 = arith.constant 0 : index
    %c0_158 = arith.constant 0 : index
    %174 = vector.load %arg15[%c0_157, %c0_158] : memref<64x128xf32, #tpu.memory_space<vmem>>, vector<64x128xf32>
    tpu.vector_store %arg15[%c0_157, %c0_158], %173 {strides = array<i32>} : memref<64x128xf32, #tpu.memory_space<vmem>>, vector<64x128xf32>,
    %c32_159 = arith.constant 32 : index
    %c0_160 = arith.constant 0 : index
    %175 = vector.load %arg14[%c32_159, %c0_160] : memref<96x256xf32, #tpu.memory_space<vmem>>, vector<64x256xf32>
    %c4_161 = arith.constant 4 : index
    %c0_162 = arith.constant 0 : index
    %c0_163 = arith.constant 0 : index
    %176 = vector.load %arg4[%c4_161, %c0_162, %c0_163] : memref<5x256x128xf32, #tpu.memory_space<vmem>>, vector<1x256x128xf32>
    %177 = vector.shape_cast %176 : vector<1x256x128xf32> to vector<256x128xf32>
    %cst_164 = arith.constant dense<0.000000e+00> : vector<64x128xf32>
    %178 = tpu.matmul %175, %177, %cst_164 {dimension_numbers = #tpu.dot_dimension_numbers<[1], [0], [0], [1], [0, 0, 1, 1], [], []>} : vector<64x256xf32>, vector<256x128xf32>, vector<64x128xf32> -> vector<64x128xf32>
    %c0_165 = arith.constant 0 : index
    %c0_166 = arith.constant 0 : index
    %179 = vector.load %arg15[%c0_165, %c0_166] : memref<64x128xf32, #tpu.memory_space<vmem>>, vector<64x128xf32>
    %180 = arith.addf %179, %178 : vector<64x128xf32>
    %c0_167 = arith.constant 0 : index
    %c0_168 = arith.constant 0 : index
    %181 = vector.load %arg15[%c0_167, %c0_168] : memref<64x128xf32, #tpu.memory_space<vmem>>, vector<64x128xf32>
    tpu.vector_store %arg15[%c0_167, %c0_168], %180 {strides = array<i32>} : memref<64x128xf32, #tpu.memory_space<vmem>>, vector<64x128xf32>,
    %c0_169 = arith.constant 0 : index
    %c0_170 = arith.constant 0 : index
    %182 = vector.load %arg5[%c0_169, %c0_170] : memref<1x128xf32, #tpu.memory_space<vmem>>, vector<1x128xf32>
    %183 = vector.shape_cast %182 : vector<1x128xf32> to vector<1x128xf32>
    %184 = vector.broadcast %183 : vector<1x128xf32> to vector<8x128xf32>
    %c0_171 = arith.constant 0 : index
    %c0_172 = arith.constant 0 : index
    %185 = vector.load %arg7[%c0_171, %c0_172] : memref<1x128xf32, #tpu.memory_space<vmem>>, vector<1x128xf32>
    %186 = vector.shape_cast %185 : vector<1x128xf32> to vector<1x128xf32>
    %187 = vector.broadcast %186 : vector<1x128xf32> to vector<8x128xf32>
    %c0_173 = arith.constant 0 : index
    %c0_174 = arith.constant 0 : index
    %188 = vector.load %arg15[%c0_173, %c0_174] : memref<64x128xf32, #tpu.memory_space<vmem>>, vector<8x128xf32>
    %c8_175 = arith.constant 8 : index
    %c0_176 = arith.constant 0 : index
    %189 = vector.load %arg15[%c8_175, %c0_176] : memref<64x128xf32, #tpu.memory_space<vmem>>, vector<8x128xf32>
    %190 = arith.maximumf %188, %189 : vector<8x128xf32>
    %c112_i32 = arith.constant 112 : i32
    %191 = tpu.dynamic_rotate %190 by %c112_i32 dim 1 : vector<8x128xf32>, i32 -> vector<8x128xf32>
    %192 = arith.maximumf %190, %191 : vector<8x128xf32>
    %193 = arith.addf %192, %184 : vector<8x128xf32>
    %cst_177 = arith.constant 0.000000e+00 : f32
    %194 = vector.broadcast %cst_177 : f32 to vector<8x128xf32>
    %195 = arith.maximumf %193, %194 : vector<8x128xf32>
    %c0_178 = arith.constant 0 : index
    %c0_179 = arith.constant 0 : index
    %c0_180 = arith.constant 0 : index
    %196 = vector.load %arg6[%c0_178, %c0_179, %c0_180] : memref<4x128x128xf32, #tpu.memory_space<vmem>>, vector<1x128x128xf32>
    %197 = vector.shape_cast %196 : vector<1x128x128xf32> to vector<128x128xf32>
    %cst_181 = arith.constant dense<0.000000e+00> : vector<8x128xf32>
    %198 = tpu.matmul %195, %197, %cst_181 {dimension_numbers = #tpu.dot_dimension_numbers<[1], [0], [0], [1], [0, 0, 1, 1], [], []>} : vector<8x128xf32>, vector<128x128xf32>, vector<8x128xf32> -> vector<8x128xf32>
    %199 = arith.addf %187, %198 : vector<8x128xf32>
    %c16_182 = arith.constant 16 : index
    %c0_183 = arith.constant 0 : index
    %200 = vector.load %arg15[%c16_182, %c0_183] : memref<64x128xf32, #tpu.memory_space<vmem>>, vector<8x128xf32>
    %c24_184 = arith.constant 24 : index
    %c0_185 = arith.constant 0 : index
    %201 = vector.load %arg15[%c24_184, %c0_185] : memref<64x128xf32, #tpu.memory_space<vmem>>, vector<8x128xf32>
    %202 = arith.maximumf %200, %201 : vector<8x128xf32>
    %c112_i32_186 = arith.constant 112 : i32
    %203 = tpu.dynamic_rotate %202 by %c112_i32_186 dim 1 : vector<8x128xf32>, i32 -> vector<8x128xf32>
    %204 = arith.maximumf %202, %203 : vector<8x128xf32>
    %205 = arith.addf %204, %184 : vector<8x128xf32>
    %cst_187 = arith.constant 0.000000e+00 : f32
    %206 = vector.broadcast %cst_187 : f32 to vector<8x128xf32>
    %207 = arith.maximumf %205, %206 : vector<8x128xf32>
    %c1_188 = arith.constant 1 : index
    %c0_189 = arith.constant 0 : index
    %c0_190 = arith.constant 0 : index
    %208 = vector.load %arg6[%c1_188, %c0_189, %c0_190] : memref<4x128x128xf32, #tpu.memory_space<vmem>>, vector<1x128x128xf32>
    %209 = vector.shape_cast %208 : vector<1x128x128xf32> to vector<128x128xf32>
    %cst_191 = arith.constant dense<0.000000e+00> : vector<8x128xf32>
    %210 = tpu.matmul %207, %209, %cst_191 {dimension_numbers = #tpu.dot_dimension_numbers<[1], [0], [0], [1], [0, 0, 1, 1], [], []>} : vector<8x128xf32>, vector<128x128xf32>, vector<8x128xf32> -> vector<8x128xf32>
    %211 = arith.addf %199, %210 : vector<8x128xf32>
    %c32_192 = arith.constant 32 : index
    %c0_193 = arith.constant 0 : index
    %212 = vector.load %arg15[%c32_192, %c0_193] : memref<64x128xf32, #tpu.memory_space<vmem>>, vector<8x128xf32>
    %c40_194 = arith.constant 40 : index
    %c0_195 = arith.constant 0 : index
    %213 = vector.load %arg15[%c40_194, %c0_195] : memref<64x128xf32, #tpu.memory_space<vmem>>, vector<8x128xf32>
    %214 = arith.maximumf %212, %213 : vector<8x128xf32>
    %c112_i32_196 = arith.constant 112 : i32
    %215 = tpu.dynamic_rotate %214 by %c112_i32_196 dim 1 : vector<8x128xf32>, i32 -> vector<8x128xf32>
    %216 = arith.maximumf %214, %215 : vector<8x128xf32>
    %217 = arith.addf %216, %184 : vector<8x128xf32>
    %cst_197 = arith.constant 0.000000e+00 : f32
    %218 = vector.broadcast %cst_197 : f32 to vector<8x128xf32>
    %219 = arith.maximumf %217, %218 : vector<8x128xf32>
    %c2_198 = arith.constant 2 : index
    %c0_199 = arith.constant 0 : index
    %c0_200 = arith.constant 0 : index
    %220 = vector.load %arg6[%c2_198, %c0_199, %c0_200] : memref<4x128x128xf32, #tpu.memory_space<vmem>>, vector<1x128x128xf32>
    %221 = vector.shape_cast %220 : vector<1x128x128xf32> to vector<128x128xf32>
    %cst_201 = arith.constant dense<0.000000e+00> : vector<8x128xf32>
    %222 = tpu.matmul %219, %221, %cst_201 {dimension_numbers = #tpu.dot_dimension_numbers<[1], [0], [0], [1], [0, 0, 1, 1], [], []>} : vector<8x128xf32>, vector<128x128xf32>, vector<8x128xf32> -> vector<8x128xf32>
    %223 = arith.addf %211, %222 : vector<8x128xf32>
    %c48_202 = arith.constant 48 : index
    %c0_203 = arith.constant 0 : index
    %224 = vector.load %arg15[%c48_202, %c0_203] : memref<64x128xf32, #tpu.memory_space<vmem>>, vector<8x128xf32>
    %c56_204 = arith.constant 56 : index
    %c0_205 = arith.constant 0 : index
    %225 = vector.load %arg15[%c56_204, %c0_205] : memref<64x128xf32, #tpu.memory_space<vmem>>, vector<8x128xf32>
    %226 = arith.maximumf %224, %225 : vector<8x128xf32>
    %c112_i32_206 = arith.constant 112 : i32
    %227 = tpu.dynamic_rotate %226 by %c112_i32_206 dim 1 : vector<8x128xf32>, i32 -> vector<8x128xf32>
    %228 = arith.maximumf %226, %227 : vector<8x128xf32>
    %229 = arith.addf %228, %184 : vector<8x128xf32>
    %cst_207 = arith.constant 0.000000e+00 : f32
    %230 = vector.broadcast %cst_207 : f32 to vector<8x128xf32>
    %231 = arith.maximumf %229, %230 : vector<8x128xf32>
    %c3_208 = arith.constant 3 : index
    %c0_209 = arith.constant 0 : index
    %c0_210 = arith.constant 0 : index
    %232 = vector.load %arg6[%c3_208, %c0_209, %c0_210] : memref<4x128x128xf32, #tpu.memory_space<vmem>>, vector<1x128x128xf32>
    %233 = vector.shape_cast %232 : vector<1x128x128xf32> to vector<128x128xf32>
    %cst_211 = arith.constant dense<0.000000e+00> : vector<8x128xf32>
    %234 = tpu.matmul %231, %233, %cst_211 {dimension_numbers = #tpu.dot_dimension_numbers<[1], [0], [0], [1], [0, 0, 1, 1], [], []>} : vector<8x128xf32>, vector<128x128xf32>, vector<8x128xf32> -> vector<8x128xf32>
    %235 = arith.addf %223, %234 : vector<8x128xf32>
    %cst_212 = arith.constant 0.000000e+00 : f32
    %236 = vector.broadcast %cst_212 : f32 to vector<8x128xf32>
    %237 = arith.maximumf %235, %236 : vector<8x128xf32>
    %c0_213 = arith.constant 0 : index
    %c0_214 = arith.constant 0 : index
    %238 = vector.load %arg8[%c0_213, %c0_214] : memref<128x128xf32, #tpu.memory_space<vmem>>, vector<128x128xf32>
    %cst_215 = arith.constant dense<0.000000e+00> : vector<8x128xf32>
    %239 = tpu.matmul %237, %238, %cst_215 {dimension_numbers = #tpu.dot_dimension_numbers<[1], [0], [0], [1], [0, 0, 1, 1], [], []>} : vector<8x128xf32>, vector<128x128xf32>, vector<8x128xf32> -> vector<8x128xf32>
    %c0_216 = arith.constant 0 : index
    %c0_217 = arith.constant 0 : index
    %240 = vector.load %arg9[%c0_216, %c0_217] : memref<1x128xf32, #tpu.memory_space<vmem>>, vector<1x128xf32>
    %241 = vector.broadcast %240 : vector<1x128xf32> to vector<8x128xf32>
    %242 = arith.addf %239, %241 : vector<8x128xf32>
    %cst_218 = arith.constant 0.000000e+00 : f32
    %243 = vector.broadcast %cst_218 : f32 to vector<8x128xf32>
    %244 = arith.maximumf %242, %243 : vector<8x128xf32>
    %c0_219 = arith.constant 0 : index
    %c0_220 = arith.constant 0 : index
    %245 = vector.load %arg10[%c0_219, %c0_220] : memref<128x128xf32, #tpu.memory_space<vmem>>, vector<128x128xf32>
    %cst_221 = arith.constant dense<0.000000e+00> : vector<8x128xf32>
    %246 = tpu.matmul %244, %245, %cst_221 {dimension_numbers = #tpu.dot_dimension_numbers<[1], [0], [0], [1], [0, 0, 1, 1], [], []>} : vector<8x128xf32>, vector<128x128xf32>, vector<8x128xf32> -> vector<8x128xf32>
    %c0_222 = arith.constant 0 : index
    %c0_223 = arith.constant 0 : index
    %247 = vector.load %arg11[%c0_222, %c0_223] : memref<1x128xf32, #tpu.memory_space<vmem>>, vector<1x128xf32>
    %248 = vector.broadcast %247 : vector<1x128xf32> to vector<8x128xf32>
    %249 = arith.addf %246, %248 : vector<8x128xf32>
    %250 = tpu.iota {dimensions = array<i32: 1>} : vector<8x128xi32>
    %c10_i32 = arith.constant 10 : i32
    %251 = vector.broadcast %c10_i32 : i32 to vector<8x128xi32>
    %252 = arith.cmpi slt, %250, %251 : vector<8x128xi32>
    %cst_224 = arith.constant -1.000000e+30 : f32
    %253 = vector.broadcast %cst_224 : f32 to vector<8x128xf32>
    %254 = arith.select %252, %249, %253 : vector<8x128xi1>, vector<8x128xf32>
    %cst_225 = arith.constant dense<0xFF800000> : vector<8xf32>
    %255 = vector.multi_reduction <maximumf>, %254, %cst_225 [1] : vector<8x128xf32> to vector<8xf32>
    %256 = vector.shape_cast %255 : vector<8xf32> to vector<8x1xf32>
    %257 = vector.broadcast %256 : vector<8x1xf32> to vector<8x128xf32>
    %258 = arith.subf %254, %257 : vector<8x128xf32>
    %259 = math.exp %258 : vector<8x128xf32>
    %cst_226 = arith.constant dense<0.000000e+00> : vector<8xf32>
    %260 = vector.multi_reduction <add>, %259, %cst_226 [1] : vector<8x128xf32> to vector<8xf32>
    %261 = vector.shape_cast %260 : vector<8xf32> to vector<8x1xf32>
    %262 = tpu.reciprocal %261 {approx = true} : vector<8x1xf32> -> vector<8x1xf32>
    %263 = vector.broadcast %262 : vector<8x1xf32> to vector<8x128xf32>
    %264 = arith.mulf %259, %263 : vector<8x128xf32>
    %c0_227 = arith.constant 0 : index
    %c0_228 = arith.constant 0 : index
    %265 = vector.load %arg12[%c0_227, %c0_228] : memref<8x128xf32, #tpu.memory_space<vmem>>, vector<8x128xf32>
    tpu.vector_store %arg12[%c0_227, %c0_228], %264 {strides = array<i32>} : memref<8x128xf32, #tpu.memory_space<vmem>>, vector<8x128xf32>,
    return
  }
  func.func @transform_0(%arg0: i32) -> (i32, i32, i32) {
    %c0_i32 = arith.constant 0 : i32
    %c0_i32_0 = arith.constant 0 : i32
    %c0_i32_1 = arith.constant 0 : i32
    return %c0_i32, %arg0, %c0_i32_0 : i32, i32, i32
  }
  func.func @transform_1(%arg0: i32) -> (i32, i32, i32) {
    %c0_i32 = arith.constant 0 : i32
    %c0_i32_0 = arith.constant 0 : i32
    %c0_i32_1 = arith.constant 0 : i32
    %c0_i32_2 = arith.constant 0 : i32
    return %c0_i32, %c0_i32_0, %c0_i32_1 : i32, i32, i32
  }
  func.func @transform_2(%arg0: i32) -> (i32, i32) {
    %c0_i32 = arith.constant 0 : i32
    %c0_i32_0 = arith.constant 0 : i32
    %c0_i32_1 = arith.constant 0 : i32
    return %c0_i32, %c0_i32_0 : i32, i32
  }
  func.func @transform_3(%arg0: i32) -> (i32, i32, i32) {
    %c0_i32 = arith.constant 0 : i32
    %c0_i32_0 = arith.constant 0 : i32
    %c0_i32_1 = arith.constant 0 : i32
    %c0_i32_2 = arith.constant 0 : i32
    return %c0_i32, %c0_i32_0, %c0_i32_1 : i32, i32, i32
  }
  func.func @transform_4(%arg0: i32) -> (i32, i32) {
    %c0_i32 = arith.constant 0 : i32
    %c0_i32_0 = arith.constant 0 : i32
    %c0_i32_1 = arith.constant 0 : i32
    return %c0_i32, %c0_i32_0 : i32, i32
  }
  func.func @transform_5(%arg0: i32) -> (i32, i32, i32) {
    %c0_i32 = arith.constant 0 : i32
    %c0_i32_0 = arith.constant 0 : i32
    %c0_i32_1 = arith.constant 0 : i32
    %c0_i32_2 = arith.constant 0 : i32
    return %c0_i32, %c0_i32_0, %c0_i32_1 : i32, i32, i32
  }
  func.func @transform_6(%arg0: i32) -> (i32, i32) {
    %c0_i32 = arith.constant 0 : i32
    %c0_i32_0 = arith.constant 0 : i32
    %c0_i32_1 = arith.constant 0 : i32
    return %c0_i32, %c0_i32_0 : i32, i32
  }
  func.func @transform_7(%arg0: i32) -> (i32, i32) {
    %c0_i32 = arith.constant 0 : i32
    %c0_i32_0 = arith.constant 0 : i32
    %c0_i32_1 = arith.constant 0 : i32
    return %c0_i32, %c0_i32_0 : i32, i32
  }
  func.func @transform_8(%arg0: i32) -> (i32, i32) {
    %c0_i32 = arith.constant 0 : i32
    %c0_i32_0 = arith.constant 0 : i32
    %c0_i32_1 = arith.constant 0 : i32
    return %c0_i32, %c0_i32_0 : i32, i32
  }
  func.func @transform_9(%arg0: i32) -> (i32, i32) {
    %c0_i32 = arith.constant 0 : i32
    %c0_i32_0 = arith.constant 0 : i32
    %c0_i32_1 = arith.constant 0 : i32
    return %c0_i32, %c0_i32_0 : i32, i32
  }
  func.func @transform_10(%arg0: i32) -> (i32, i32) {
    %c0_i32 = arith.constant 0 : i32
    %c0_i32_0 = arith.constant 0 : i32
    %c0_i32_1 = arith.constant 0 : i32
    return %c0_i32, %c0_i32_0 : i32, i32
  }
  func.func @transform_11(%arg0: i32) -> (i32, i32) {
    %c0_i32 = arith.constant 0 : i32
    %c0_i32_0 = arith.constant 0 : i32
    return %arg0, %c0_i32 : i32, i32
  }
}

</mosaic_0001>

<bundles_post_ra>
// kernel: convnet_forward.1
= control target key start
LH: loop header
LB: loop body
LE: loop exit
PB: predicated region body
PF: predicated region fallthrough
CT: control target
= control target key end

     0   :  { %16 = vsyncpa [#allocation6], 0  ;;  %s6756_s0 = inlined_call_operand.vmem [shape: f32[28,8,28], index: 0, kind: input, shape index: {}]   ;;  %s6757_s1 = inlined_call_operand.vmem [shape: f32[5,28,256], index: 1, kind: input, shape index: {}]   ;;  %s6758_s2 = inlined_call_operand.vmem [shape: f32[1,256], index: 2, kind: input, shape index: {}]   ;;  %s6759_s3 = inlined_call_operand.hbm [shape: f32[5,256,128], index: 3, kind: input, shape index: {}]   ;;  %s6760_s4 = inlined_call_operand.vmem [shape: f32[1,128], index: 4, kind: input, shape index: {}]   ;;  %s6761_s5 = inlined_call_operand.hbm [shape: f32[4,128,128], index: 5, kind: input, shape index: {}]   ;;  %s6762_s6 = inlined_call_operand.vmem [shape: f32[1,128], index: 6, kind: input, shape index: {}]   ;;  %s6763_s7 = inlined_call_operand.hbm [shape: f32[128,128], index: 7, kind: input, shape index: {}]   ;;  %s6764_s8 = inlined_call_operand.vmem [shape: f32[1,128], index: 8, kind: input, shape index: {}]   ;;  %s6765_s9 = inlined_call_operand.hbm [shape: f32[128,128], index: 9, kind: input, shape index: {}]   ;;  %s6766_s10 = inlined_call_operand.vmem [shape: f32[1,128], index: 10, kind: input, shape index: {}]   ;;  %s6767_s11 = inlined_call_operand.vmem [shape: f32[8,128], index: 11, kind: output, shape index: {}]  }
   0x1   :  { %17 = vsyncpa [#allocation8], 0 }
   0x2   :  { %18 = vsyncpa [#allocation11], 0  ;;  %s5008_s17 = smov [#allocation7]   ;;  %s5009_s19 = smov [#allocation5]  }
   0x3   :  { %s44_s18 = sshll.u32 %s5008_s17, 4  ;;  %s30_s20 = sshll.u32 %s5009_s19, 4  ;;  %s45_s18 = int_to_ptr.vmem [resolvable:$true] %s44_s18  ;;  %s31_s20 = int_to_ptr.vmem [resolvable:$true] %s30_s20 }
   0x4   :  { %s4930_s21 = scalar_lea.vmem %s45_s18, 8192  ;;  %p4935_p1 = scmp.lt.s32.totalorder %s45_s18, %s45_s18 }
   0x5   :  { %p4931_p0 = scmp.ne.s32.totalorder %s45_s18, %s4930_s21  ;;  %p4936_p2 = scmp.lt.s32.totalorder %s4930_s21, %s4930_s21 }
   0x7   :  { %p4937_p3 = por %p4936_p2, %p4935_p1 }
   0x9   :  { %p4938_p4 = pnand %p4937_p3, %p4931_p0 }
   0xb   :  { %4941 = shalt.err (!%p4938_p4)
}
   0xc   :  { %s5010_s22 = smov 128   ;;  %s5011_s23 = smov 8  }
   0xd   :  { %50 = dma.hbm_to_vmem [thread:$0]  %s6761_s5, 8192, %s45_s18, [#allocation8], %s5010_s22, %s5010_s22, %s5011_s23  }
   0xe   :  { %s4950_s26 = scalar_lea.vmem %s31_s20, 20480  ;;  %p4955_p6 = scmp.lt.s32.totalorder %s31_s20, %s31_s20 }
   0xf   :  { %p4951_p5 = scmp.ne.s32.totalorder %s31_s20, %s4950_s26  ;;  %p4956_p7 = scmp.lt.s32.totalorder %s4950_s26, %s4950_s26 }
  0x11   :  { %p4957_p8 = por %p4956_p7, %p4955_p6 }
  0x13   :  { %p4958_p9 = pnand %p4957_p8, %p4951_p5 }
  0x15   :  { %4961 = shalt.err (!%p4958_p9)
}
  0x16   :  { %36 = dma.hbm_to_vmem [thread:$0]  %s6759_s3, 20480, %s31_s20, [#allocation6], %s5010_s22, %s5010_s22, %s5011_s23  }
  0x17   :  { %s5012_s29 = smov [#allocation9]   ;;  %s5013_s12 = smov [#allocation10]  }
  0x18   :  { %s58_s30 = sshll.u32 %s5012_s29, 4  ;;  %s72_s13 = sshll.u32 %s5013_s12, 4  ;;  %s59_s30 = int_to_ptr.vmem [resolvable:$true] %s58_s30  ;;  %s73_s13 = int_to_ptr.vmem [resolvable:$true] %s72_s13 }
  0x19   :  { %s4970_s5 = scalar_lea.vmem %s59_s30, 2048  ;;  %p4975_p11 = scmp.lt.s32.totalorder %s59_s30, %s59_s30 }
  0x1a   :  { %p4971_p10 = scmp.ne.s32.totalorder %s59_s30, %s4970_s5  ;;  %p4976_p12 = scmp.lt.s32.totalorder %s4970_s5, %s4970_s5 }
  0x1c   :  { %p4977_p13 = por %p4976_p12, %p4975_p11 }
  0x1e   :  { %p4978_p0 = pnand %p4977_p13, %p4971_p10 }
  0x20   :  { %4981 = shalt.err (!%p4978_p0)
}
  0x21   :  { %64 = dma.hbm_to_vmem [thread:$0]  %s6763_s7, 2048, %s59_s30, [#allocation8], %s5010_s22, %s5010_s22, %s5011_s23  }
  0x22   :  { %s4990_s3 = scalar_lea.vmem %s73_s13, 2048  ;;  %p4995_p2 = scmp.lt.s32.totalorder %s73_s13, %s73_s13 }
  0x23   :  { %p4991_p1 = scmp.ne.s32.totalorder %s73_s13, %s4990_s3  ;;  %p4996_p3 = scmp.lt.s32.totalorder %s4990_s3, %s4990_s3 }
  0x25   :  { %p4997_p4 = por %p4996_p3, %p4995_p2 }
  0x27   :  { %p4998_p5 = pnand %p4997_p4, %p4991_p1 }
  0x29   :  { %5001 = shalt.err (!%p4998_p5)
}
  0x2a   :  { %78 = dma.hbm_to_vmem [thread:$0]  %s6765_s9, 2048, %s73_s13, [#allocation11], %s5010_s22, %s5010_s22, %s5011_s23  }
  0x2b   :  { %5002 = dma.done.wait [#allocation6], 20480  }
  0x2c   :  { %5003 = vsyncadd [#allocation6], 4294946816 }
  0x2d   :  { %5004 = dma.done.wait [#allocation8], 10240  }
  0x2e   :  { %5005 = vsyncadd [#allocation8], 4294957056 }
  0x2f   :  { %5006 = dma.done.wait [#allocation11], 2048  }
  0x30   :  { %5007 = vsyncadd [#allocation11], 4294965248  ;;  %v6768_v0 = vmov 0.0   ;;  %vm198_vm0 = vcmask 1043456   ;;  %v124_v1 = vld [vmem:[%s6757_s1 + $0x38] sm:$0xf] }
  0x31   :  { %269 = vmatprep.mubr.f32.mxu0 %v6768_v0  ;;  %638 = vmatprep.mubr.f32.mxu1 %v6768_v0  ;;  %v4111_v2 = vld [vmem:[%s6757_s1 + $0x78] sm:$0xf]  ;;  %v123_v3 = vld [vmem:[%s6757_s1 + $0x30] sm:$0xf]  ;;  %v122_v5 = vld [vmem:[%s6757_s1 + $0x28] sm:$0xff]  ;;  %vm125_vm1 = vcmask 228352  }
  0x32   :  { %4054 = vmatprep.subr.msk.mxu0 %vm198_vm0, %v124_v1  ;;  %4112 = vmatprep.subr.msk.mxu1 %vm198_vm0, %v4111_v2  ;;  %v4110_v4 = vld [vmem:[%s6757_s1 + $0x70] sm:$0xf]  ;;  %v4109_v6 = vld [vmem:[%s6757_s1 + $0x68] sm:$0xff]  ;;  %v121_v7 = vld [vmem:[%s6757_s1 + $0x20] sm:$0xff]  ;;  %vm5016_vm3 = vmmov 0  }
  0x33   :  { %4055 = vmatpush1.msk.msra.mxu0 %vm198_vm0, %v123_v3  ;;  %4113 = vmatpush1.msk.msra.mxu1 %vm198_vm0, %v4110_v4  ;;  %v4108_v8 = vld [vmem:[%s6757_s1 + $0x60] sm:$0xff]  ;;  %v120_v9 = vld [vmem:[%s6757_s1 + $0x18] sm:$0xff]  ;;  %v119_v11 = vld [vmem:[%s6757_s1 + $0x10] sm:$0xff] }
  0x34   :  { %231 = vmatprep.subr.mxu0 %v122_v5  ;;  %600 = vmatprep.subr.mxu1 %v4109_v6  ;;  %v4107_v10 = vld [vmem:[%s6757_s1 + $0x58] sm:$0xff]  ;;  %v4106_v12 = vld [vmem:[%s6757_s1 + $0x50] sm:$0xff]  ;;  %v118_v13 = vld [vmem:[%s6757_s1 + $0x8] sm:$0xff] }
  0x35   :  { %232 = vmatpush1.msra.mxu0 %v121_v7  ;;  %601 = vmatpush1.msra.mxu1 %v4108_v8  ;;  %v4105_v14 = vld [vmem:[%s6757_s1 + $0x48] sm:$0xff]  ;;  %v117_v15 = vld [vmem:[%s6757_s1] sm:$0xff]  ;;  %v4169_v19 = vld [vmem:[%s6757_s1 + $0xb8] sm:$0xf] }
  0x36   :  { %233 = vmatprep.subr.mxu0 %v120_v9  ;;  %602 = vmatprep.subr.mxu1 %v4107_v10  ;;  %v4104_v16 = vld [vmem:[%s6757_s1 + $0x40] sm:$0xff]  ;;  %v4080_v18 = vld [vmem:[%s6756_s0 + $0x8] sm:$0xff]  ;;  %v4168_v20 = vld [vmem:[%s6757_s1 + $0xb0] sm:$0xf] }
  0x37   :  { %234 = vmatpush1.msra.mxu0 %v119_v11  ;;  %603 = vmatpush1.msra.mxu1 %v4106_v12  ;;  %v93_v17 = vld [vmem:[%s6756_s0] sm:$0xff]  ;;  %v4167_v21 = vld [vmem:[%s6757_s1 + $0xa8] sm:$0xff]  ;;  %v5178_v22 = vld [vmem:[%s6756_s0 + $0x10] sm:$0xff] }
  0x38   :  { %235 = vmatprep.subr.mxu0 %v118_v13  ;;  %604 = vmatprep.subr.mxu1 %v4105_v14  ;;  %v4166_v23 = vld [vmem:[%s6757_s1 + $0xa0] sm:$0xff]  ;;  %v4165_v24 = vld [vmem:[%s6757_s1 + $0x98] sm:$0xff]  ;;  %v4164_v26 = vld [vmem:[%s6757_s1 + $0x90] sm:$0xff] }
  0x39   :  { %236 = vmatpush1.msra.mxu0 %v117_v15  ;;  %605 = vmatpush1.msra.mxu1 %v4104_v16  ;;  %v5196_v25 = vld [vmem:[%s6756_s0 + $0x18] sm:$0xff]  ;;  %v4163_v28 = vld [vmem:[%s6757_s1 + $0x88] sm:$0xff]  ;;  %v4226_v29 = vld [vmem:[%s6757_s1 + $0xf0] sm:$0xf] }
  0x3a   :  { %4056 = vmatmul.mubr.msk.f32.vlgmr.msra.gmra.mxu0 %vm125_vm1, %v93_v17  ;;  %4114 = vmatmul.mubr.msk.f32.vlgmr.msra.gmra.mxu1 %vm125_vm1, %v4080_v18  ;;  %v4227_v27 = vld [vmem:[%s6757_s1 + $0xf8] sm:$0xf]  ;;  %v5219_v30 = vld [vmem:[%s6756_s0 + $0x20] sm:$0xff]  ;;  %v4225_v32 = vld [vmem:[%s6757_s1 + $0xe8] sm:$0xff] }
  0x3b   :  { %4170 = vmatprep.subr.msk.mxu0 %vm198_vm0, %v4169_v19  ;;  %275 = vmatprep.mubr.f32.mxu0 %v6768_v0  ;;  %v4162_v31 = vld [vmem:[%s6757_s1 + $0x80] sm:$0xff]  ;;  %v4285_v34 = vld [vmem:[%s6757_s1 + $0x138] sm:$0xf]  ;;  %v5244_v35 = vld [vmem:[%s6756_s0 + $0x28] sm:$0xff] }
  0x3c   :  { %4171 = vmatpush1.msk.msra.mxu0 %vm198_vm0, %v4168_v20  ;;  %644 = vmatprep.mubr.f32.mxu1 %v6768_v0  ;;  %v4224_v33 = vld [vmem:[%s6757_s1 + $0xe0] sm:$0xff]  ;;  %v4223_v36 = vld [vmem:[%s6757_s1 + $0xd8] sm:$0xff]  ;;  %v4222_v37 = vld [vmem:[%s6757_s1 + $0xd0] sm:$0xff] }
  0x3d   :  { %1065 = vmatprep.subr.mxu0 %v4167_v21  ;;  %4228 = vmatprep.subr.msk.mxu1 %vm198_vm0, %v4227_v27  ;;  %v5262_v38 = vld [vmem:[%s6756_s0 + $0x30] sm:$0xff]  ;;  %v4221_v39 = vld [vmem:[%s6757_s1 + $0xc8] sm:$0xff]  ;;  %v4220_v40 = vld [vmem:[%s6757_s1 + $0xc0] sm:$0xff] }
  0x3e   :  { %4057 = vmatmul.mubr.msk.f32.gmra.mxu0 %vm125_vm1, %v4080_v18  ;;  %4115 = vmatmul.mubr.msk.f32.gmra.mxu1 %vm125_vm1, %v5178_v22  ;;  %v5279_v41 = vld [vmem:[%s6756_s0 + $0x38] sm:$0xff]  ;;  %v5290_v42 = vld [vmem:[%s6756_s0 + $0x40] sm:$0xff]  ;;  %v5301_v43 = vld [vmem:[%s6756_s0 + $0x48] sm:$0xff] }
  0x3f   :  { %281 = vmatprep.mubr.f32.mxu0 %v6768_v0  ;;  %650 = vmatprep.mubr.f32.mxu1 %v6768_v0  ;;  %v5312_v44 = vld [vmem:[%s6756_s0 + $0x50] sm:$0xff]  ;;  %v5323_v45 = vld [vmem:[%s6756_s0 + $0x58] sm:$0xff]  ;;  %v5334_v46 = vld [vmem:[%s6756_s0 + $0x60] sm:$0xff] }
  0x40   :  { %1066 = vmatpush1.msra.mxu0 %v4166_v23  ;;  %4229 = vmatpush1.msk.msra.mxu1 %vm198_vm0, %v4226_v29  ;;  %v5345_v47 = vld [vmem:[%s6756_s0 + $0x68] sm:$0xff]  ;;  %v5356_v48 = vld [vmem:[%s6756_s0 + $0x70] sm:$0xff]  ;;  %v5367_v49 = vld [vmem:[%s6756_s0 + $0x78] sm:$0xff] }
  0x41   :  { %1067 = vmatprep.subr.mxu0 %v4165_v24  ;;  %1530 = vmatprep.subr.mxu1 %v4225_v32  ;;  %v5378_v50 = vld [vmem:[%s6756_s0 + $0x80] sm:$0xff]  ;;  %v5389_v51 = vld [vmem:[%s6756_s0 + $0x88] sm:$0xff]  ;;  %v5400_v52 = vld [vmem:[%s6756_s0 + $0x90] sm:$0xff] }
  0x42   :  { %4058 = vmatmul.mubr.msk.f32.gmra.mxu0 %vm125_vm1, %v5178_v22  ;;  %4116 = vmatmul.mubr.msk.f32.gmra.mxu1 %vm125_vm1, %v5196_v25  ;;  %v5411_v53 = vld [vmem:[%s6756_s0 + $0x98] sm:$0xff]  ;;  %v5422_v54 = vld [vmem:[%s6756_s0 + $0xa0] sm:$0xff]  ;;  %v5433_v55 = vld [vmem:[%s6756_s0 + $0xa8] sm:$0xff] }
  0x43   :  { %287 = vmatprep.mubr.f32.mxu0 %v6768_v0  ;;  %656 = vmatprep.mubr.f32.mxu1 %v6768_v0  ;;  %v5444_v56 = vld [vmem:[%s6756_s0 + $0xb0] sm:$0xff]  ;;  %v5455_v57 = vld [vmem:[%s6756_s0 + $0xb8] sm:$0xff]  ;;  %v5466_v58 = vld [vmem:[%s6756_s0 + $0xc0] sm:$0xff] }
  0x44   :  { %1068 = vmatpush1.msra.mxu0 %v4164_v26  ;;  %1531 = vmatpush1.msra.mxu1 %v4224_v33  ;;  %v4284_v59 = vld [vmem:[%s6757_s1 + $0x130] sm:$0xf]  ;;  %v4283_v60 = vld [vmem:[%s6757_s1 + $0x128] sm:$0xff]  ;;  %v4282_v61 = vld [vmem:[%s6757_s1 + $0x120] sm:$0xff] }
  0x45   :  { %1069 = vmatprep.subr.mxu0 %v4163_v28  ;;  %1532 = vmatprep.subr.mxu1 %v4223_v36  ;;  %v4281_v62 = vld [vmem:[%s6757_s1 + $0x118] sm:$0xff]  ;;  %v4280_v63 = vld [vmem:[%s6757_s1 + $0x110] sm:$0xff]  ;;  %v4279_v1 = vld [vmem:[%s6757_s1 + $0x108] sm:$0xff] }
  0x46   :  { %4059 = vmatmul.mubr.msk.f32.gmra.mxu0 %vm125_vm1, %v5196_v25  ;;  %4117 = vmatmul.mubr.msk.f32.gmra.mxu1 %vm125_vm1, %v5219_v30  ;;  %v4278_v2 = vld [vmem:[%s6757_s1 + $0x100] sm:$0xff]  ;;  %v5631_v3 = vld [vmem:[%s6756_s0 + $0xc8] sm:$0xff]  ;;  %v5642_v4 = vld [vmem:[%s6756_s0 + $0xd0] sm:$0xff] }
  0x47   :  { %293 = vmatprep.mubr.f32.mxu0 %v6768_v0  ;;  %662 = vmatprep.mubr.f32.mxu1 %v6768_v0 }
  0x48   :  { %1070 = vmatpush1.msra.mxu0 %v4162_v31  ;;  %1533 = vmatpush1.msra.mxu1 %v4222_v37 }
  0x49   :  { %4286 = vmatprep.subr.msk.mxu0 %vm198_vm0, %v4285_v34  ;;  %1534 = vmatprep.subr.mxu1 %v4221_v39 }
  0x4a   :  { %4060 = vmatmul.mubr.msk.f32.gmra.mxu0 %vm125_vm1, %v5219_v30  ;;  %4118 = vmatmul.mubr.msk.f32.gmra.mxu1 %vm125_vm1, %v5244_v35 }
  0x4b   :  { %299 = vmatprep.mubr.f32.mxu0 %v6768_v0  ;;  %668 = vmatprep.mubr.f32.mxu1 %v6768_v0 }
  0x4c   :  { %1535 = vmatpush1.msra.mxu1 %v4220_v40 }
  0x4e   :  { %4061 = vmatmul.mubr.msk.f32.gmra.mxu0 %vm125_vm1, %v5244_v35  ;;  %4119 = vmatmul.mubr.msk.f32.gmra.mxu1 %vm125_vm1, %v5262_v38 }
  0x4f   :  { %305 = vmatprep.mubr.f32.mxu0 %v6768_v0  ;;  %674 = vmatprep.mubr.f32.mxu1 %v6768_v0 }
  0x52   :  { %4062 = vmatmul.mubr.msk.f32.gmra.mxu0 %vm125_vm1, %v5262_v38  ;;  %4120 = vmatmul.mubr.msk.f32.gmra.mxu1 %vm125_vm1, %v5279_v41 }
  0x53   :  { %311 = vmatprep.mubr.f32.mxu0 %v6768_v0  ;;  %680 = vmatprep.mubr.f32.mxu1 %v6768_v0 }
  0x56   :  { %4063 = vmatmul.mubr.msk.f32.gmra.mxu0 %vm125_vm1, %v5279_v41  ;;  %4121 = vmatmul.mubr.msk.f32.gmra.mxu1 %vm125_vm1, %v5290_v42 }
  0x57   :  { %317 = vmatprep.mubr.f32.mxu0 %v6768_v0  ;;  %686 = vmatprep.mubr.f32.mxu1 %v6768_v0 }
  0x5a   :  { %4064 = vmatmul.mubr.msk.f32.gmra.mxu0 %vm125_vm1, %v5290_v42  ;;  %4122 = vmatmul.mubr.msk.f32.gmra.mxu1 %vm125_vm1, %v5301_v43 }
  0x5b   :  { %323 = vmatprep.mubr.f32.mxu0 %v6768_v0  ;;  %692 = vmatprep.mubr.f32.mxu1 %v6768_v0 }
  0x5e   :  { %4065 = vmatmul.mubr.msk.f32.gmra.mxu0 %vm125_vm1, %v5301_v43  ;;  %4123 = vmatmul.mubr.msk.f32.gmra.mxu1 %vm125_vm1, %v5312_v44 }
  0x5f   :  { %329 = vmatprep.mubr.f32.mxu0 %v6768_v0  ;;  %698 = vmatprep.mubr.f32.mxu1 %v6768_v0 }
  0x62   :  { %4066 = vmatmul.mubr.msk.f32.gmra.mxu0 %vm125_vm1, %v5312_v44  ;;  %4124 = vmatmul.mubr.msk.f32.gmra.mxu1 %vm125_vm1, %v5323_v45 }
  0x63   :  { %335 = vmatprep.mubr.f32.mxu0 %v6768_v0  ;;  %704 = vmatprep.mubr.f32.mxu1 %v6768_v0 }
  0x66   :  { %4067 = vmatmul.mubr.msk.f32.gmra.mxu0 %vm125_vm1, %v5323_v45  ;;  %4125 = vmatmul.mubr.msk.f32.gmra.mxu1 %vm125_vm1, %v5334_v46 }
  0x67   :  { %341 = vmatprep.mubr.f32.mxu0 %v6768_v0  ;;  %710 = vmatprep.mubr.f32.mxu1 %v6768_v0 }
  0x6a   :  { %4068 = vmatmul.mubr.msk.f32.gmra.mxu0 %vm125_vm1, %v5334_v46  ;;  %4126 = vmatmul.mubr.msk.f32.gmra.mxu1 %vm125_vm1, %v5345_v47 }
  0x6b   :  { %347 = vmatprep.mubr.f32.mxu0 %v6768_v0  ;;  %716 = vmatprep.mubr.f32.mxu1 %v6768_v0 }
  0x6e   :  { %4069 = vmatmul.mubr.msk.f32.gmra.mxu0 %vm125_vm1, %v5345_v47  ;;  %4127 = vmatmul.mubr.msk.f32.gmra.mxu1 %vm125_vm1, %v5356_v48 }
  0x6f   :  { %353 = vmatprep.mubr.f32.mxu0 %v6768_v0  ;;  %722 = vmatprep.mubr.f32.mxu1 %v6768_v0 }
  0x72   :  { %4070 = vmatmul.mubr.msk.f32.gmra.mxu0 %vm125_vm1, %v5356_v48  ;;  %4128 = vmatmul.mubr.msk.f32.gmra.mxu1 %vm125_vm1, %v5367_v49 }
  0x73   :  { %359 = vmatprep.mubr.f32.mxu0 %v6768_v0  ;;  %728 = vmatprep.mubr.f32.mxu1 %v6768_v0 }
  0x76   :  { %4071 = vmatmul.mubr.msk.f32.gmra.mxu0 %vm125_vm1, %v5367_v49  ;;  %4129 = vmatmul.mubr.msk.f32.gmra.mxu1 %vm125_vm1, %v5378_v50 }
  0x77   :  { %365 = vmatprep.mubr.f32.mxu0 %v6768_v0  ;;  %734 = vmatprep.mubr.f32.mxu1 %v6768_v0 }
  0x7a   :  { %4072 = vmatmul.mubr.msk.f32.gmra.mxu0 %vm125_vm1, %v5378_v50  ;;  %4130 = vmatmul.mubr.msk.f32.gmra.mxu1 %vm125_vm1, %v5389_v51 }
  0x7b   :  { %371 = vmatprep.mubr.f32.mxu0 %v6768_v0  ;;  %740 = vmatprep.mubr.f32.mxu1 %v6768_v0 }
  0x7e   :  { %4073 = vmatmul.mubr.msk.f32.gmra.mxu0 %vm125_vm1, %v5389_v51  ;;  %4131 = vmatmul.mubr.msk.f32.gmra.mxu1 %vm125_vm1, %v5400_v52 }
  0x7f   :  { %377 = vmatprep.mubr.f32.mxu0 %v6768_v0  ;;  %746 = vmatprep.mubr.f32.mxu1 %v6768_v0 }
  0x82   :  { %4074 = vmatmul.mubr.msk.f32.gmra.mxu0 %vm125_vm1, %v5400_v52  ;;  %4132 = vmatmul.mubr.msk.f32.gmra.mxu1 %vm125_vm1, %v5411_v53 }
  0x83   :  { %383 = vmatprep.mubr.f32.mxu0 %v6768_v0  ;;  %752 = vmatprep.mubr.f32.mxu1 %v6768_v0 }
  0x86   :  { %4075 = vmatmul.mubr.msk.f32.gmra.mxu0 %vm125_vm1, %v5411_v53  ;;  %4133 = vmatmul.mubr.msk.f32.gmra.mxu1 %vm125_vm1, %v5422_v54 }
  0x87   :  { %389 = vmatprep.mubr.f32.mxu0 %v6768_v0  ;;  %758 = vmatprep.mubr.f32.mxu1 %v6768_v0 }
  0x8a   :  { %4076 = vmatmul.mubr.msk.f32.gmra.mxu0 %vm125_vm1, %v5422_v54  ;;  %4134 = vmatmul.mubr.msk.f32.gmra.mxu1 %vm125_vm1, %v5433_v55 }
  0x8b   :  { %395 = vmatprep.mubr.f32.mxu0 %v6768_v0  ;;  %764 = vmatprep.mubr.f32.mxu1 %v6768_v0 }
  0x8e   :  { %4077 = vmatmul.mubr.msk.f32.gmra.mxu0 %vm125_vm1, %v5433_v55  ;;  %4135 = vmatmul.mubr.msk.f32.gmra.mxu1 %vm125_vm1, %v5444_v56 }
  0x8f   :  { %401 = vmatprep.mubr.f32.mxu0 %v6768_v0  ;;  %770 = vmatprep.mubr.f32.mxu1 %v6768_v0 }
  0x92   :  { %4078 = vmatmul.mubr.msk.f32.gmra.mxu0 %vm125_vm1, %v5444_v56  ;;  %4136 = vmatmul.mubr.msk.f32.gmra.mxu1 %vm125_vm1, %v5455_v57 }
  0x93   :  { %407 = vmatprep.mubr.f32.mxu0 %v6768_v0  ;;  %776 = vmatprep.mubr.f32.mxu1 %v6768_v0 }
  0x96   :  { %4079 = vmatmul.mubr.msk.f32.gmra.mxu0 %vm125_vm1, %v5455_v57  ;;  %4137 = vmatmul.mubr.msk.f32.gmra.mxu1 %vm125_vm1, %v5466_v58 }
  0x97   :  { %1103 = vmatprep.mubr.f32.mxu0 %v6768_v0  ;;  %1568 = vmatprep.mubr.f32.mxu1 %v6768_v0 }
  0x9a   :  { %4172 = vmatmul.mubr.msk.f32.vlgmr.msra.gmra.mxu0 %vm125_vm1, %v5178_v22  ;;  %4230 = vmatmul.mubr.msk.f32.vlgmr.msra.gmra.mxu1 %vm125_vm1, %v5196_v25 }
  0x9b   :  { %4287 = vmatpush1.msk.msra.mxu0 %vm198_vm0, %v4284_v59  ;;  %1109 = vmatprep.mubr.f32.mxu0 %v6768_v0 }
  0x9c   :  { %1574 = vmatprep.mubr.f32.mxu1 %v6768_v0  ;;  %1995 = vmatprep.subr.mxu0 %v4283_v60 }
  0x9d   :  { %1996 = vmatpush1.msra.mxu0 %v4282_v61 }
  0x9e   :  { %4173 = vmatmul.mubr.msk.f32.gmra.mxu0 %vm125_vm1, %v5196_v25  ;;  %4231 = vmatmul.mubr.msk.f32.gmra.mxu1 %vm125_vm1, %v5219_v30 }
  0x9f   :  { %1115 = vmatprep.mubr.f32.mxu0 %v6768_v0  ;;  %1580 = vmatprep.mubr.f32.mxu1 %v6768_v0 }
  0xa0   :  { %1997 = vmatprep.subr.mxu0 %v4281_v62 }
  0xa1   :  { %1998 = vmatpush1.msra.mxu0 %v4280_v63 }
  0xa2   :  { %4174 = vmatmul.mubr.msk.f32.gmra.mxu0 %vm125_vm1, %v5219_v30  ;;  %4232 = vmatmul.mubr.msk.f32.gmra.mxu1 %vm125_vm1, %v5244_v35 }
  0xa3   :  { %1121 = vmatprep.mubr.f32.mxu0 %v6768_v0  ;;  %1586 = vmatprep.mubr.f32.mxu1 %v6768_v0 }
  0xa4   :  { %1999 = vmatprep.subr.mxu0 %v4279_v1 }
  0xa5   :  { %2000 = vmatpush1.msra.mxu0 %v4278_v2 }
  0xa6   :  { %4175 = vmatmul.mubr.msk.f32.gmra.mxu0 %vm125_vm1, %v5244_v35  ;;  %4233 = vmatmul.mubr.msk.f32.gmra.mxu1 %vm125_vm1, %v5262_v38 }
  0xa7   :  { %1127 = vmatprep.mubr.f32.mxu0 %v6768_v0  ;;  %1592 = vmatprep.mubr.f32.mxu1 %v6768_v0 }
  0xaa   :  { %4176 = vmatmul.mubr.msk.f32.gmra.mxu0 %vm125_vm1, %v5262_v38  ;;  %4234 = vmatmul.mubr.msk.f32.gmra.mxu1 %vm125_vm1, %v5279_v41 }
  0xab   :  { %1133 = vmatprep.mubr.f32.mxu0 %v6768_v0  ;;  %1598 = vmatprep.mubr.f32.mxu1 %v6768_v0 }
  0xae   :  { %4177 = vmatmul.mubr.msk.f32.gmra.mxu0 %vm125_vm1, %v5279_v41  ;;  %4235 = vmatmul.mubr.msk.f32.gmra.mxu1 %vm125_vm1, %v5290_v42 }
  0xaf   :  { %1139 = vmatprep.mubr.f32.mxu0 %v6768_v0  ;;  %1604 = vmatprep.mubr.f32.mxu1 %v6768_v0 }
  0xb2   :  { %4178 = vmatmul.mubr.msk.f32.gmra.mxu0 %vm125_vm1, %v5290_v42  ;;  %4236 = vmatmul.mubr.msk.f32.gmra.mxu1 %vm125_vm1, %v5301_v43 }
  0xb3   :  { %1145 = vmatprep.mubr.f32.mxu0 %v6768_v0  ;;  %1610 = vmatprep.mubr.f32.mxu1 %v6768_v0 }
  0xb6   :  { %4179 = vmatmul.mubr.msk.f32.gmra.mxu0 %vm125_vm1, %v5301_v43  ;;  %4237 = vmatmul.mubr.msk.f32.gmra.mxu1 %vm125_vm1, %v5312_v44 }
  0xb7   :  { %1151 = vmatprep.mubr.f32.mxu0 %v6768_v0  ;;  %1616 = vmatprep.mubr.f32.mxu1 %v6768_v0 }
  0xba   :  { %4180 = vmatmul.mubr.msk.f32.gmra.mxu0 %vm125_vm1, %v5312_v44  ;;  %4238 = vmatmul.mubr.msk.f32.gmra.mxu1 %vm125_vm1, %v5323_v45 }
  0xbb   :  { %1157 = vmatprep.mubr.f32.mxu0 %v6768_v0  ;;  %1622 = vmatprep.mubr.f32.mxu1 %v6768_v0 }
  0xbe   :  { %4181 = vmatmul.mubr.msk.f32.gmra.mxu0 %vm125_vm1, %v5323_v45  ;;  %4239 = vmatmul.mubr.msk.f32.gmra.mxu1 %vm125_vm1, %v5334_v46 }
  0xbf   :  { %1163 = vmatprep.mubr.f32.mxu0 %v6768_v0  ;;  %1628 = vmatprep.mubr.f32.mxu1 %v6768_v0 }
  0xc2   :  { %4182 = vmatmul.mubr.msk.f32.gmra.mxu0 %vm125_vm1, %v5334_v46  ;;  %4240 = vmatmul.mubr.msk.f32.gmra.mxu1 %vm125_vm1, %v5345_v47 }
  0xc3   :  { %1169 = vmatprep.mubr.f32.mxu0 %v6768_v0  ;;  %1634 = vmatprep.mubr.f32.mxu1 %v6768_v0 }
  0xc6   :  { %4183 = vmatmul.mubr.msk.f32.gmra.mxu0 %vm125_vm1, %v5345_v47  ;;  %4241 = vmatmul.mubr.msk.f32.gmra.mxu1 %vm125_vm1, %v5356_v48 }
  0xc7   :  { %1175 = vmatprep.mubr.f32.mxu0 %v6768_v0  ;;  %1640 = vmatprep.mubr.f32.mxu1 %v6768_v0 }
  0xca   :  { %4184 = vmatmul.mubr.msk.f32.gmra.mxu0 %vm125_vm1, %v5356_v48  ;;  %4242 = vmatmul.mubr.msk.f32.gmra.mxu1 %vm125_vm1, %v5367_v49 }
  0xcb   :  { %1181 = vmatprep.mubr.f32.mxu0 %v6768_v0  ;;  %1646 = vmatprep.mubr.f32.mxu1 %v6768_v0 }
  0xce   :  { %4185 = vmatmul.mubr.msk.f32.gmra.mxu0 %vm125_vm1, %v5367_v49  ;;  %4243 = vmatmul.mubr.msk.f32.gmra.mxu1 %vm125_vm1, %v5378_v50 }
  0xcf   :  { %1187 = vmatprep.mubr.f32.mxu0 %v6768_v0  ;;  %1652 = vmatprep.mubr.f32.mxu1 %v6768_v0 }
  0xd2   :  { %4186 = vmatmul.mubr.msk.f32.gmra.mxu0 %vm125_vm1, %v5378_v50  ;;  %4244 = vmatmul.mubr.msk.f32.gmra.mxu1 %vm125_vm1, %v5389_v51 }
  0xd3   :  { %1193 = vmatprep.mubr.f32.mxu0 %v6768_v0  ;;  %1658 = vmatprep.mubr.f32.mxu1 %v6768_v0 }
  0xd6   :  { %4187 = vmatmul.mubr.msk.f32.gmra.mxu0 %vm125_vm1, %v5389_v51  ;;  %4245 = vmatmul.mubr.msk.f32.gmra.mxu1 %vm125_vm1, %v5400_v52 }
  0xd7   :  { %1199 = vmatprep.mubr.f32.mxu0 %v6768_v0  ;;  %1664 = vmatprep.mubr.f32.mxu1 %v6768_v0 }
  0xda   :  { %4188 = vmatmul.mubr.msk.f32.gmra.mxu0 %vm125_vm1, %v5400_v52  ;;  %4246 = vmatmul.mubr.msk.f32.gmra.mxu1 %vm125_vm1, %v5411_v53 }
  0xdb   :  { %1205 = vmatprep.mubr.f32.mxu0 %v6768_v0  ;;  %1670 = vmatprep.mubr.f32.mxu1 %v6768_v0 }
  0xde   :  { %4189 = vmatmul.mubr.msk.f32.gmra.mxu0 %vm125_vm1, %v5411_v53  ;;  %4247 = vmatmul.mubr.msk.f32.gmra.mxu1 %vm125_vm1, %v5422_v54 }
  0xdf   :  { %1211 = vmatprep.mubr.f32.mxu0 %v6768_v0  ;;  %1676 = vmatprep.mubr.f32.mxu1 %v6768_v0 }
  0xe2   :  { %4190 = vmatmul.mubr.msk.f32.gmra.mxu0 %vm125_vm1, %v5422_v54  ;;  %4248 = vmatmul.mubr.msk.f32.gmra.mxu1 %vm125_vm1, %v5433_v55 }
  0xe3   :  { %1217 = vmatprep.mubr.f32.mxu0 %v6768_v0  ;;  %1682 = vmatprep.mubr.f32.mxu1 %v6768_v0 }
  0xe6   :  { %4191 = vmatmul.mubr.msk.f32.gmra.mxu0 %vm125_vm1, %v5433_v55  ;;  %4249 = vmatmul.mubr.msk.f32.gmra.mxu1 %vm125_vm1, %v5444_v56 }
  0xe7   :  { %1223 = vmatprep.mubr.f32.mxu0 %v6768_v0  ;;  %1688 = vmatprep.mubr.f32.mxu1 %v6768_v0 }
  0xea   :  { %4192 = vmatmul.mubr.msk.f32.gmra.mxu0 %vm125_vm1, %v5444_v56  ;;  %4250 = vmatmul.mubr.msk.f32.gmra.mxu1 %vm125_vm1, %v5455_v57 }
  0xeb   :  { %1229 = vmatprep.mubr.f32.mxu0 %v6768_v0  ;;  %1694 = vmatprep.mubr.f32.mxu1 %v6768_v0 }
  0xee   :  { %4193 = vmatmul.mubr.msk.f32.gmra.mxu0 %vm125_vm1, %v5455_v57  ;;  %4251 = vmatmul.mubr.msk.f32.gmra.mxu1 %vm125_vm1, %v5466_v58 }
  0xef   :  { %1235 = vmatprep.mubr.f32.mxu0 %v6768_v0  ;;  %1700 = vmatprep.mubr.f32.mxu1 %v6768_v0 }
  0xf2   :  { %4194 = vmatmul.mubr.msk.f32.gmra.mxu0 %vm125_vm1, %v5466_v58  ;;  %4252 = vmatmul.mubr.msk.f32.gmra.mxu1 %vm125_vm1, %v5631_v3 }
  0xf3   :  { %1241 = vmatprep.mubr.f32.mxu0 %v6768_v0  ;;  %1706 = vmatprep.mubr.f32.mxu1 %v6768_v0 }
  0xf6   :  { %4195 = vmatmul.mubr.msk.f32.gmra.mxu0 %vm125_vm1, %v5631_v3  ;;  %4253 = vmatmul.mubr.msk.f32.gmra.mxu1 %vm125_vm1, %v5642_v4 }
  0xf7   :  { %2033 = vmatprep.mubr.f32.mxu0 %v6768_v0 }
  0xfa   :  { %v271_v5 = vpop.f32.mrf.mxu0  ;;  %v640_v6 = vpop.f32.mrf.mxu1  ;;  %4288 = vmatmul.mubr.msk.f32.vlgmr.msra.gmra.mxu0 %vm125_vm1, %v5219_v30 }
  0xfb   :  { %v5651_v7 = vadd.f32 %v640_v6, %v271_v5  ;;  %2039 = vmatprep.mubr.f32.mxu0 %v6768_v0 }
  0xfc   :  { %v5654_v8 = vpop.f32.mrf.mxu0  ;;  %v5656_v9 = vpop.f32.mrf.mxu1 }
  0xfe   :  { %v277_v10 = vpop.f32.mrf.mxu0  ;;  %v646_v11 = vpop.f32.mrf.mxu1  ;;  %4289 = vmatmul.mubr.msk.f32.gmra.mxu0 %vm125_vm1, %v5244_v35 }
  0xff   :  { %v5660_v12 = vadd.f32 %v646_v11, %v277_v10  ;;  %2045 = vmatprep.mubr.f32.mxu0 %v6768_v0 }
 0x100   :  { %v5663_v13 = vpop.f32.mrf.mxu0  ;;  %v5665_v14 = vpop.f32.mrf.mxu1 }
 0x101   :  { %6770 = vst [vmem:[#allocation15_spill] sm:$0xff] %v5663_v13  ;;  %6771 = vst [vmem:[#allocation16_spill] sm:$0xff] %v5665_v14 }
 0x102   :  { %v283_v15 = vpop.f32.mrf.mxu0  ;;  %v652_v16 = vpop.f32.mrf.mxu1  ;;  %4290 = vmatmul.mubr.msk.f32.gmra.mxu0 %vm125_vm1, %v5262_v38 }
 0x103   :  { %v5669_v17 = vadd.f32 %v652_v16, %v283_v15  ;;  %2051 = vmatprep.mubr.f32.mxu0 %v6768_v0 }
 0x104   :  { %v5672_v18 = vpop.f32.mrf.mxu0  ;;  %v5674_v19 = vpop.f32.mrf.mxu1 }
 0x105   :  { %6772 = vst [vmem:[#allocation17_spill] sm:$0xff] %v5672_v18  ;;  %6773 = vst [vmem:[#allocation18_spill] sm:$0xff] %v5674_v19 }
 0x106   :  { %v289_v20 = vpop.f32.mrf.mxu0  ;;  %v658_v21 = vpop.f32.mrf.mxu1  ;;  %4291 = vmatmul.mubr.msk.f32.gmra.mxu0 %vm125_vm1, %v5279_v41 }
 0x107   :  { %v5678_v22 = vadd.f32 %v658_v21, %v289_v20  ;;  %2057 = vmatprep.mubr.f32.mxu0 %v6768_v0 }
 0x108   :  { %v5681_v23 = vpop.f32.mrf.mxu0  ;;  %v5683_v24 = vpop.f32.mrf.mxu1 }
 0x10a   :  { %v295_v25 = vpop.f32.mrf.mxu0  ;;  %v664_v26 = vpop.f32.mrf.mxu1  ;;  %4292 = vmatmul.mubr.msk.f32.gmra.mxu0 %vm125_vm1, %v5290_v42 }
 0x10b   :  { %v5687_v27 = vadd.f32 %v664_v26, %v295_v25  ;;  %2063 = vmatprep.mubr.f32.mxu0 %v6768_v0 }
 0x10c   :  { %v5690_v28 = vpop.f32.mrf.mxu0  ;;  %v5692_v29 = vpop.f32.mrf.mxu1 }
 0x10e   :  { %v301_v30 = vpop.f32.mrf.mxu0  ;;  %v670_v31 = vpop.f32.mrf.mxu1  ;;  %4293 = vmatmul.mubr.msk.f32.gmra.mxu0 %vm125_vm1, %v5301_v43 }
 0x10f   :  { %v5696_v32 = vadd.f32 %v670_v31, %v301_v30  ;;  %2069 = vmatprep.mubr.f32.mxu0 %v6768_v0 }
 0x110   :  { %v5699_v33 = vpop.f32.mrf.mxu0  ;;  %v5701_v34 = vpop.f32.mrf.mxu1 }
 0x112   :  { %v307_v35 = vpop.f32.mrf.mxu0  ;;  %v676_v36 = vpop.f32.mrf.mxu1  ;;  %4294 = vmatmul.mubr.msk.f32.gmra.mxu0 %vm125_vm1, %v5312_v44 }
 0x113   :  { %v5705_v37 = vadd.f32 %v676_v36, %v307_v35  ;;  %2075 = vmatprep.mubr.f32.mxu0 %v6768_v0 }
 0x114   :  { %v5708_v38 = vpop.f32.mrf.mxu0  ;;  %v5710_v39 = vpop.f32.mrf.mxu1 }
 0x116   :  { %v313_v40 = vpop.f32.mrf.mxu0  ;;  %v682_v41 = vpop.f32.mrf.mxu1  ;;  %4295 = vmatmul.mubr.msk.f32.gmra.mxu0 %vm125_vm1, %v5323_v45 }
 0x117   :  { %v5714_v42 = vadd.f32 %v682_v41, %v313_v40  ;;  %2081 = vmatprep.mubr.f32.mxu0 %v6768_v0 }
 0x118   :  { %v5717_v43 = vpop.f32.mrf.mxu0  ;;  %v5719_v44 = vpop.f32.mrf.mxu1 }
 0x11a   :  { %v319_v59 = vpop.f32.mrf.mxu0  ;;  %v688_v60 = vpop.f32.mrf.mxu1  ;;  %4296 = vmatmul.mubr.msk.f32.gmra.mxu0 %vm125_vm1, %v5334_v46 }
 0x11b   :  { %v5723_v61 = vadd.f32 %v688_v60, %v319_v59  ;;  %2087 = vmatprep.mubr.f32.mxu0 %v6768_v0 }
 0x11c   :  { %v5726_v62 = vpop.f32.mrf.mxu0  ;;  %v5728_v45 = vpop.f32.mrf.mxu1 }
 0x11e   :  { %v325_v63 = vpop.f32.mrf.mxu0  ;;  %v694_v1 = vpop.f32.mrf.mxu1  ;;  %4297 = vmatmul.mubr.msk.f32.gmra.mxu0 %vm125_vm1, %v5345_v47 }
 0x11f   :  { %v5732_v2 = vadd.f32 %v694_v1, %v325_v63  ;;  %2093 = vmatprep.mubr.f32.mxu0 %v6768_v0 }
 0x120   :  { %v5735_v5 = vpop.f32.mrf.mxu0  ;;  %v5737_v46 = vpop.f32.mrf.mxu1 }
 0x122   :  { %v331_v6 = vpop.f32.mrf.mxu0  ;;  %v700_v10 = vpop.f32.mrf.mxu1  ;;  %4298 = vmatmul.mubr.msk.f32.gmra.mxu0 %vm125_vm1, %v5356_v48 }
 0x123   :  { %v5741_v11 = vadd.f32 %v700_v10, %v331_v6  ;;  %2099 = vmatprep.mubr.f32.mxu0 %v6768_v0 }
 0x124   :  { %v5744_v15 = vpop.f32.mrf.mxu0  ;;  %v5746_v47 = vpop.f32.mrf.mxu1 }
 0x126   :  { %v337_v16 = vpop.f32.mrf.mxu0  ;;  %v706_v20 = vpop.f32.mrf.mxu1  ;;  %4299 = vmatmul.mubr.msk.f32.gmra.mxu0 %vm125_vm1, %v5367_v49 }
 0x127   :  { %v5750_v21 = vadd.f32 %v706_v20, %v337_v16  ;;  %2105 = vmatprep.mubr.f32.mxu0 %v6768_v0 }
 0x128   :  { %v5753_v25 = vpop.f32.mrf.mxu0  ;;  %v5755_v48 = vpop.f32.mrf.mxu1 }
 0x12a   :  { %v343_v26 = vpop.f32.mrf.mxu0  ;;  %v712_v30 = vpop.f32.mrf.mxu1  ;;  %4300 = vmatmul.mubr.msk.f32.gmra.mxu0 %vm125_vm1, %v5378_v50 }
 0x12b   :  { %v5759_v31 = vadd.f32 %v712_v30, %v343_v26  ;;  %2111 = vmatprep.mubr.f32.mxu0 %v6768_v0 }
 0x12c   :  { %v5762_v35 = vpop.f32.mrf.mxu0  ;;  %v5764_v49 = vpop.f32.mrf.mxu1 }
 0x12e   :  { %v349_v36 = vpop.f32.mrf.mxu0  ;;  %v718_v40 = vpop.f32.mrf.mxu1  ;;  %4301 = vmatmul.mubr.msk.f32.gmra.mxu0 %vm125_vm1, %v5389_v51 }
 0x12f   :  { %v5768_v41 = vadd.f32 %v718_v40, %v349_v36  ;;  %2117 = vmatprep.mubr.f32.mxu0 %v6768_v0 }
 0x130   :  { %v5771_v59 = vpop.f32.mrf.mxu0  ;;  %v5773_v50 = vpop.f32.mrf.mxu1 }
 0x132   :  { %v355_v60 = vpop.f32.mrf.mxu0  ;;  %v724_v63 = vpop.f32.mrf.mxu1  ;;  %4302 = vmatmul.mubr.msk.f32.gmra.mxu0 %vm125_vm1, %v5400_v52 }
 0x133   :  { %v5777_v1 = vadd.f32 %v724_v63, %v355_v60  ;;  %2123 = vmatprep.mubr.f32.mxu0 %v6768_v0 }
 0x134   :  { %v5780_v6 = vpop.f32.mrf.mxu0  ;;  %v5782_v51 = vpop.f32.mrf.mxu1 }
 0x136   :  { %v361_v10 = vpop.f32.mrf.mxu0  ;;  %v730_v16 = vpop.f32.mrf.mxu1  ;;  %4303 = vmatmul.mubr.msk.f32.gmra.mxu0 %vm125_vm1, %v5411_v53 }
 0x137   :  { %v5786_v20 = vadd.f32 %v730_v16, %v361_v10  ;;  %2129 = vmatprep.mubr.f32.mxu0 %v6768_v0 }
 0x138   :  { %v5789_v26 = vpop.f32.mrf.mxu0  ;;  %v5791_v52 = vpop.f32.mrf.mxu1 }
 0x13a   :  { %v367_v30 = vpop.f32.mrf.mxu0  ;;  %v736_v36 = vpop.f32.mrf.mxu1  ;;  %4304 = vmatmul.mubr.msk.f32.gmra.mxu0 %vm125_vm1, %v5422_v54 }
 0x13b   :  { %v5795_v40 = vadd.f32 %v736_v36, %v367_v30  ;;  %2135 = vmatprep.mubr.f32.mxu0 %v6768_v0 }
 0x13c   :  { %v5798_v60 = vpop.f32.mrf.mxu0  ;;  %v5800_v53 = vpop.f32.mrf.mxu1 }
 0x13d   :  { %6774 = vst [vmem:[#allocation19_spill] sm:$0xff] %v5798_v60  ;;  %6775 = vst [vmem:[#allocation20_spill] sm:$0xff] %v5800_v53 }
 0x13e   :  { %v373_v63 = vpop.f32.mrf.mxu0  ;;  %v742_v10 = vpop.f32.mrf.mxu1  ;;  %4305 = vmatmul.mubr.msk.f32.gmra.mxu0 %vm125_vm1, %v5433_v55 }
 0x13f   :  { %v5804_v16 = vadd.f32 %v742_v10, %v373_v63  ;;  %2141 = vmatprep.mubr.f32.mxu0 %v6768_v0 }
 0x140   :  { %v5807_v19 = vpop.f32.mrf.mxu0  ;;  %v5809_v54 = vpop.f32.mrf.mxu1 }
 0x141   :  { %6776 = vst [vmem:[#allocation21_spill] sm:$0xff] %v5807_v19  ;;  %6777 = vst [vmem:[#allocation22_spill] sm:$0xff] %v5809_v54 }
 0x142   :  { %v379_v30 = vpop.f32.mrf.mxu0  ;;  %v748_v36 = vpop.f32.mrf.mxu1  ;;  %4306 = vmatmul.mubr.msk.f32.gmra.mxu0 %vm125_vm1, %v5444_v56 }
 0x143   :  { %v5813_v60 = vadd.f32 %v748_v36, %v379_v30  ;;  %2147 = vmatprep.mubr.f32.mxu0 %v6768_v0 }
 0x144   :  { %v5816_v53 = vpop.f32.mrf.mxu0  ;;  %v5818_v55 = vpop.f32.mrf.mxu1 }
 0x145   :  { %6778 = vst [vmem:[#allocation23_spill] sm:$0xff] %v5816_v53  ;;  %6779 = vst [vmem:[#allocation24_spill] sm:$0xff] %v5818_v55 }
 0x146   :  { %v385_v63 = vpop.f32.mrf.mxu0  ;;  %v754_v10 = vpop.f32.mrf.mxu1  ;;  %4307 = vmatmul.mubr.msk.f32.gmra.mxu0 %vm125_vm1, %v5455_v57 }
 0x147   :  { %v5822_v19 = vadd.f32 %v754_v10, %v385_v63  ;;  %2153 = vmatprep.mubr.f32.mxu0 %v6768_v0 }
 0x148   :  { %v5825_v54 = vpop.f32.mrf.mxu0  ;;  %v5827_v56 = vpop.f32.mrf.mxu1 }
 0x149   :  { %6780 = vst [vmem:[#allocation25_spill] sm:$0xff] %v5825_v54  ;;  %6781 = vst [vmem:[#allocation26_spill] sm:$0xff] %v5827_v56 }
 0x14a   :  { %v391_v30 = vpop.f32.mrf.mxu0  ;;  %v760_v36 = vpop.f32.mrf.mxu1  ;;  %4308 = vmatmul.mubr.msk.f32.gmra.mxu0 %vm125_vm1, %v5466_v58 }
 0x14b   :  { %v5831_v53 = vadd.f32 %v760_v36, %v391_v30  ;;  %2159 = vmatprep.mubr.f32.mxu0 %v6768_v0 }
 0x14c   :  { %v5834_v55 = vpop.f32.mrf.mxu0  ;;  %v5836_v57 = vpop.f32.mrf.mxu1 }
 0x14d   :  { %6782 = vst [vmem:[#allocation27_spill] sm:$0xff] %v5834_v55  ;;  %6783 = vst [vmem:[#allocation28_spill] sm:$0xff] %v5836_v57 }
 0x14e   :  { %v397_v63 = vpop.f32.mrf.mxu0  ;;  %v766_v10 = vpop.f32.mrf.mxu1  ;;  %4309 = vmatmul.mubr.msk.f32.gmra.mxu0 %vm125_vm1, %v5631_v3  ;;  %v4277_v3 = vld [vmem:[%s6756_s0 + $0xd8] sm:$0xff]  ;;  %s5015_s0 = smov 122  }
 0x14f   :  { %v5840_v54 = vadd.f32 %v766_v10, %v397_v63  ;;  %2165 = vmatprep.mubr.f32.mxu0 %v6768_v0 }
 0x150   :  { %v5843_v56 = vpop.f32.mrf.mxu0  ;;  %v5845_v58 = vpop.f32.mrf.mxu1 }
 0x151   :  { %6784 = vst [vmem:[#allocation29_spill] sm:$0xff] %v5843_v56  ;;  %6785 = vst [vmem:[#allocation30_spill] sm:$0xff] %v5845_v58 }
 0x152   :  { %v403_v30 = vpop.f32.mrf.mxu0  ;;  %v772_v36 = vpop.f32.mrf.mxu1  ;;  %4310 = vmatmul.mubr.msk.f32.gmra.mxu0 %vm125_vm1, %v5642_v4 }
 0x153   :  { %v5849_v55 = vadd.f32 %v772_v36, %v403_v30  ;;  %2171 = vmatprep.mubr.f32.mxu0 %v6768_v0 }
 0x154   :  { %v5855_v63 = vpop.f32.mrf.mxu0  ;;  %v5857_v10 = vpop.f32.mrf.mxu1 }
 0x155   :  { %6786 = vst [vmem:[#allocation31_spill] sm:$0xff] %v5855_v63  ;;  %6787 = vst [vmem:[#allocation32_spill] sm:$0xff] %v5857_v10 }
 0x156   :  { %v409_v56 = vpop.f32.mrf.mxu0  ;;  %v778_v57 = vpop.f32.mrf.mxu1  ;;  %4311 = vmatmul.mubr.msk.f32.gmra.mxu0 %vm125_vm1, %v4277_v3 }
 0x157   :  { %v5860_v58 = vadd.f32 %v778_v57, %v409_v56 }
 0x158   :  { %v5862_v18 = vpop.f32.mrf.mxu0  ;;  %v5864_v4 = vpop.f32.mrf.mxu1 }
 0x159   :  { %6788 = vst [vmem:[#allocation33_spill] sm:$0xff] %v5862_v18  ;;  %6789 = vst [vmem:[#allocation34_spill] sm:$0xff] %v5864_v4 }
 0x15a   :  { %v1105_v30 = vpop.f32.mrf.mxu0  ;;  %v5866_v36 = vpop.f32.mrf.mxu1 }
 0x15b   :  { %6790 = vst [vmem:[#allocation35_spill] sm:$0xff] %v5866_v36  ;;  %v5869_v0 = vadd.f32 %v1105_v30, %v5651_v7 }
 0x15c   :  { %v5871_v14 = vpop.f32.mrf.mxu0  ;;  %v5873_v63 = vpop.f32.mrf.mxu1 }
 0x15d   :  { %6791 = vst [vmem:[#allocation36_spill] sm:$0xff] %v5873_v63  ;;  %v838_v63 = vadd.f32 %v5683_v24, %v5681_v23 }
 0x15e   :  { %v1111_v10 = vpop.f32.mrf.mxu0  ;;  %v5880_v57 = vpop.f32.mrf.mxu1 }
 0x15f   :  { %v5876_v13 = vadd.f32 %v1111_v10, %v5660_v12  ;;  %6793 = vst [vmem:[#allocation38_spill] sm:$0xff] %v5880_v57 }
 0x160   :  { %v5878_v56 = vpop.f32.mrf.mxu0  ;;  %v5885_v18 = vpop.f32.mrf.mxu1 }
 0x161   :  { %6792 = vst [vmem:[#allocation37_spill] sm:$0xff] %v5876_v13  ;;  %6795 = vst [vmem:[#allocation40_spill] sm:$0xff] %v5885_v18 }
 0x162   :  { %v1117_v3 = vpop.f32.mrf.mxu0  ;;  %v5894_v12 = vpop.f32.mrf.mxu1 }
 0x163   :  { %v5883_v4 = vadd.f32 %v1117_v3, %v5669_v17  ;;  %v840_v17 = vadd.f32 %v5692_v29, %v5690_v28 }
 0x164   :  { %v5887_v7 = vpop.f32.mrf.mxu0 }
 0x165   :  { %6794 = vst [vmem:[#allocation39_spill] sm:$0xff] %v5883_v4  ;;  %6796 = vst [vmem:[#allocation41_spill] sm:$0xff] %v5887_v7  ;;  %v5903_v4 = vpop.f32.mrf.mxu1 }
 0x166   :  { %v1123_v30 = vpop.f32.mrf.mxu0 }
 0x167   :  { %v5892_v36 = vadd.f32 %v1123_v30, %v5678_v22  ;;  %v842_v22 = vadd.f32 %v5701_v34, %v5699_v33 }
 0x168   :  { %v1125_v10 = vpop.f32.mrf.mxu0 }
 0x169   :  { %v5896_v13 = vadd.f32 %v1125_v10, %v838_v63  ;;  %v5912_v63 = vpop.f32.mrf.mxu1 }
 0x16a   :  { %v1129_v57 = vpop.f32.mrf.mxu0 }
 0x16b   :  { %v5901_v3 = vadd.f32 %v1129_v57, %v5687_v27  ;;  %v844_v27 = vadd.f32 %v5710_v39, %v5708_v38  ;;  %v5921_v57 = vpop.f32.mrf.mxu1 }
 0x16c   :  { %v1131_v7 = vpop.f32.mrf.mxu0 }
 0x16d   :  { %v5905_v18 = vadd.f32 %v1131_v7, %v840_v17 }
 0x16e   :  { %v1135_v23 = vpop.f32.mrf.mxu0 }
 0x16f   :  { %v5910_v24 = vadd.f32 %v1135_v23, %v5696_v32  ;;  %v846_v32 = vadd.f32 %v5719_v44, %v5717_v43  ;;  %v5930_v23 = vpop.f32.mrf.mxu1  ;;  %v2624_v43 = vld [vmem:[#allocation5 + $0xf8] sm:$0xff] }
 0x170   :  { %v1137_v30 = vpop.f32.mrf.mxu0  ;;  %4316 = vmatprep.subr.mxu1 %v2624_v43  ;;  %v2607_v43 = vld [vmem:[#allocation5 + $0x70] sm:$0xff] }
 0x171   :  { %v5914_v10 = vadd.f32 %v1137_v30, %v842_v22 }
 0x172   :  { %v1141_v28 = vpop.f32.mrf.mxu0 }
 0x173   :  { %v5919_v29 = vadd.f32 %v1141_v28, %v5705_v37  ;;  %v848_v37 = vadd.f32 %v5728_v45, %v5726_v62  ;;  %v5939_v28 = vpop.f32.mrf.mxu1 }
 0x174   :  { %v1143_v7 = vpop.f32.mrf.mxu0 }
 0x175   :  { %v5923_v17 = vadd.f32 %v1143_v7, %v844_v27  ;;  %v5948_v62 = vpop.f32.mrf.mxu1 }
 0x176   :  { %v1147_v33 = vpop.f32.mrf.mxu0 }
 0x177   :  { %v5928_v34 = vadd.f32 %v1147_v33, %v5714_v42  ;;  %v2608_v42 = vld [vmem:[#allocation5 + $0x78] sm:$0xff]  ;;  %v850_v33 = vadd.f32 %v5737_v46, %v5735_v5 }
 0x178   :  { %v1149_v22 = vpop.f32.mrf.mxu0  ;;  %4317 = vmatpush3.msra.mxu1 %v2608_v42  ;;  %v854_v42 = vadd.f32 %v5755_v48, %v5753_v25 }
 0x179   :  { %v5932_v30 = vadd.f32 %v1149_v22, %v846_v32 }
 0x17a   :  { %v1153_v38 = vpop.f32.mrf.mxu0 }
 0x17b   :  { %v5937_v39 = vadd.f32 %v1153_v38, %v5723_v61  ;;  %v852_v38 = vadd.f32 %v5746_v47, %v5744_v15 }
 0x17c   :  { %v1155_v27 = vpop.f32.mrf.mxu0 }
 0x17d   :  { %v5941_v7 = vadd.f32 %v1155_v27, %v848_v37  ;;  %v2623_v27 = vld [vmem:[#allocation5 + $0xf0] sm:$0xff] }
 0x17e   :  { %v1159_v44 = vpop.f32.mrf.mxu0  ;;  %4318 = vmatprep.subr.mxu1 %v2623_v27  ;;  %v2606_v27 = vld [vmem:[#allocation5 + $0x68] sm:$0xff] }
 0x17f   :  { %6797 = vst [vmem:[#allocation42_spill] sm:$0xff] %v5941_v7  ;;  %v5946_v32 = vadd.f32 %v1159_v44, %v5732_v2  ;;  %v5957_v7 = vpop.f32.mrf.mxu1  ;;  %4319 = vmatpush3.msra.mxu1 %v2607_v43 }
 0x180   :  { %v1161_v61 = vpop.f32.mrf.mxu0 }
 0x181   :  { %v5950_v45 = vadd.f32 %v1161_v61, %v850_v33  ;;  %v5966_v15 = vpop.f32.mrf.mxu1  ;;  %v856_v61 = vadd.f32 %v5764_v49, %v5762_v35 }
 0x182   :  { %v1165_v22 = vpop.f32.mrf.mxu0 }
 0x183   :  { %v5955_v37 = vadd.f32 %v1165_v22, %v5741_v11  ;;  %v5975_v43 = vpop.f32.mrf.mxu1 }
 0x184   :  { %v1167_v5 = vpop.f32.mrf.mxu0 }
 0x185   :  { %v5959_v2 = vadd.f32 %v1167_v5, %v852_v38  ;;  %v2622_v38 = vld [vmem:[#allocation5 + $0xe8] sm:$0xff]  ;;  %v858_v5 = vadd.f32 %v5773_v50, %v5771_v59  ;;  %v5984_v35 = vpop.f32.mrf.mxu1 }
 0x186   :  { %v1171_v46 = vpop.f32.mrf.mxu0  ;;  %4320 = vmatprep.subr.mxu1 %v2622_v38 }
 0x187   :  { %v5964_v44 = vadd.f32 %v1171_v46, %v5750_v21  ;;  %4321 = vmatpush3.msra.mxu1 %v2606_v27  ;;  %v5993_v59 = vpop.f32.mrf.mxu1  ;;  %v2620_v27 = vld [vmem:[#allocation5 + $0xd8] sm:$0xff] }
 0x188   :  { %v1173_v11 = vpop.f32.mrf.mxu0 }
 0x189   :  { %v5968_v47 = vadd.f32 %v1173_v11, %v854_v42  ;;  %v2621_v42 = vld [vmem:[#allocation5 + $0xe0] sm:$0xff] }
 0x18a   :  { %v1177_v33 = vpop.f32.mrf.mxu0  ;;  %v2605_v11 = vld [vmem:[#allocation5 + $0x60] sm:$0xff]  ;;  %4322 = vmatprep.subr.mxu1 %v2621_v42 }
 0x18b   :  { %v5973_v22 = vadd.f32 %v1177_v33, %v5759_v31  ;;  %4323 = vmatpush3.msra.mxu1 %v2605_v11 }
 0x18c   :  { %v1179_v25 = vpop.f32.mrf.mxu0  ;;  %4324 = vmatprep.subr.mxu1 %v2620_v27 }
 0x18d   :  { %v5977_v21 = vadd.f32 %v1179_v25, %v856_v61  ;;  %v860_v61 = vadd.f32 %v5782_v51, %v5780_v6  ;;  %v2604_v25 = vld [vmem:[#allocation5 + $0x58] sm:$0xff]  ;;  %v6002_v6 = vpop.f32.mrf.mxu1 }
 0x18e   :  { %v1183_v48 = vpop.f32.mrf.mxu0  ;;  %4325 = vmatpush3.msra.mxu1 %v2604_v25 }
 0x18f   :  { %6798 = vst [vmem:[#allocation43_spill] sm:$0xff] %v5977_v21  ;;  %v5982_v46 = vadd.f32 %v1183_v48, %v5768_v41 }
 0x190   :  { %v1185_v31 = vpop.f32.mrf.mxu0 }
 0x191   :  { %6799 = vst [vmem:[#allocation44_spill] sm:$0xff] %v5982_v46  ;;  %v5986_v49 = vadd.f32 %v1185_v31, %v858_v5  ;;  %v862_v5 = vadd.f32 %v5791_v52, %v5789_v26  ;;  %v2602_v26 = vld [vmem:[#allocation5 + $0x48] sm:$0xff]  ;;  %v2617_v52 = vld [vmem:[#allocation5 + $0xc0] sm:$0xff] }
 0x192   :  { %v1189_v33 = vpop.f32.mrf.mxu0 }
 0x193   :  { %6800 = vst [vmem:[#allocation45_spill] sm:$0xff] %v5986_v49  ;;  %v5991_v38 = vadd.f32 %v1189_v33, %v5777_v1  ;;  %v2619_v33 = vld [vmem:[#allocation5 + $0xd0] sm:$0xff] }
 0x194   :  { %v1191_v41 = vpop.f32.mrf.mxu0  ;;  %4326 = vmatprep.subr.mxu1 %v2619_v33  ;;  %v2615_v33 = vld [vmem:[#allocation5 + $0xb0] sm:$0xff] }
 0x195   :  { %6801 = vst [vmem:[#allocation46_spill] sm:$0xff] %v5991_v38  ;;  %v5995_v50 = vadd.f32 %v1191_v41, %v860_v61  ;;  %v2603_v61 = vld [vmem:[#allocation5 + $0x50] sm:$0xff]  ;;  %v6009_v41 = vpop.f32.mrf.mxu1 }
 0x196   :  { %v1195_v48 = vpop.f32.mrf.mxu0  ;;  %4327 = vmatpush3.msra.mxu1 %v2603_v61 }
 0x197   :  { %6802 = vst [vmem:[#allocation47_spill] sm:$0xff] %v5995_v50  ;;  %v6000_v31 = vadd.f32 %v1195_v48, %v5786_v20  ;;  %v2618_v20 = vld [vmem:[#allocation5 + $0xc8] sm:$0xff]  ;;  %v2601_v48 = vld [vmem:[#allocation5 + $0x40] sm:$0xff]  ;;  %v3141_v50 = vld [vmem:[#allocation5 + $0x3f0] sm:$0xff] }
 0x198   :  { %v1197_v1 = vpop.f32.mrf.mxu0  ;;  %4328 = vmatprep.subr.mxu1 %v2618_v20 }
 0x199   :  { %6803 = vst [vmem:[#allocation48_spill] sm:$0xff] %v6000_v31  ;;  %v6004_v51 = vadd.f32 %v1197_v1, %v862_v5  ;;  %4329 = vmatpush3.msra.mxu1 %v2602_v26  ;;  %v6016_v1 = vpop.f32.mrf.mxu1  ;;  %v2594_v31 = vld [vmem:[#allocation5 + $0x8] sm:$0xff] }
 0x19a   :  { %v1201_v42 = vpop.f32.mrf.mxu0  ;;  %4330 = vmatprep.subr.mxu1 %v2617_v52 }
 0x19b   :  { %6804 = vst [vmem:[#allocation49_spill] sm:$0xff] %v6004_v51  ;;  %v6007_v11 = vadd.f32 %v1201_v42, %v5795_v40  ;;  %v2616_v40 = vld [vmem:[#allocation5 + $0xb8] sm:$0xff]  ;;  %4331 = vmatpush3.msra.mxu1 %v2601_v48  ;;  %v6023_v20 = vpop.f32.mrf.mxu1 }
 0x19c   :  { %v6011_v27 = vpop.f32.mrf.mxu0  ;;  %4332 = vmatprep.subr.mxu1 %v2616_v40 }
 0x19d   :  { %6805 = vst [vmem:[#allocation50_spill] sm:$0xff] %v6007_v11  ;;  %6806 = vst [vmem:[#allocation51_spill] sm:$0xff] %v6011_v27  ;;  %v2600_v11 = vld [vmem:[#allocation5 + $0x38] sm:$0xff]  ;;  %v2599_v27 = vld [vmem:[#allocation5 + $0x30] sm:$0xff]  ;;  %v6030_v52 = vpop.f32.mrf.mxu1 }
 0x19e   :  { %v1207_v25 = vpop.f32.mrf.mxu0  ;;  %4333 = vmatpush3.msra.mxu1 %v2600_v11 }
 0x19f   :  { %v6014_v5 = vadd.f32 %v1207_v25, %v5804_v16  ;;  %4334 = vmatprep.subr.mxu1 %v2615_v33 }
 0x1a0   :  { %v6018_v42 = vpop.f32.mrf.mxu0  ;;  %4335 = vmatpush3.msra.mxu1 %v2599_v27 }
 0x1a1   :  { %6807 = vst [vmem:[#allocation52_spill] sm:$0xff] %v6014_v5  ;;  %6808 = vst [vmem:[#allocation53_spill] sm:$0xff] %v6018_v42  ;;  %v2612_v42 = vld [vmem:[#allocation5 + $0x98] sm:$0xff] }
 0x1a2   :  { %v1213_v61 = vpop.f32.mrf.mxu0 }
 0x1a3   :  { %v6021_v51 = vadd.f32 %v1213_v61, %v5813_v60  ;;  %v6037_v60 = vpop.f32.mrf.mxu1 }
 0x1a4   :  { %v6025_v16 = vpop.f32.mrf.mxu0 }
 0x1a5   :  { %6809 = vst [vmem:[#allocation54_spill] sm:$0xff] %v6021_v51  ;;  %6810 = vst [vmem:[#allocation55_spill] sm:$0xff] %v6025_v16  ;;  %v6044_v27 = vpop.f32.mrf.mxu1  ;;  %v3142_v16 = vld [vmem:[#allocation5 + $0x3f8] sm:$0xff] }
 0x1a6   :  { %v1219_v26 = vpop.f32.mrf.mxu0  ;;  %4484 = vmatprep.subr.mxu0 %v3142_v16  ;;  %v3125_v16 = vld [vmem:[#allocation5 + $0x370] sm:$0xff] }
 0x1a7   :  { %v6028_v25 = vadd.f32 %v1219_v26, %v5822_v19  ;;  %v6051_v51 = vpop.f32.mrf.mxu1 }
 0x1a8   :  { %v6032_v48 = vpop.f32.mrf.mxu0 }
 0x1a9   :  { %6811 = vst [vmem:[#allocation56_spill] sm:$0xff] %v6028_v25  ;;  %6812 = vst [vmem:[#allocation57_spill] sm:$0xff] %v6032_v48  ;;  %v2613_v48 = vld [vmem:[#allocation5 + $0xa0] sm:$0xff] }
 0x1aa   :  { %v1225_v40 = vpop.f32.mrf.mxu0 }
 0x1ab   :  { %v6035_v5 = vadd.f32 %v1225_v40, %v5831_v53  ;;  %v2614_v40 = vld [vmem:[#allocation5 + $0xa8] sm:$0xff] }
 0x1ac   :  { %v6039_v11 = vpop.f32.mrf.mxu0  ;;  %4336 = vmatprep.subr.mxu1 %v2614_v40 }
 0x1ad   :  { %6813 = vst [vmem:[#allocation58_spill] sm:$0xff] %v6035_v5  ;;  %6814 = vst [vmem:[#allocation59_spill] sm:$0xff] %v6039_v11  ;;  %v2598_v5 = vld [vmem:[#allocation5 + $0x28] sm:$0xff] }
 0x1ae   :  { %v1231_v61 = vpop.f32.mrf.mxu0  ;;  %4337 = vmatpush3.msra.mxu1 %v2598_v5  ;;  %v2596_v5 = vld [vmem:[#allocation5 + $0x18] sm:$0xff] }
 0x1af   :  { %v6042_v33 = vadd.f32 %v1231_v61, %v5840_v54  ;;  %v2597_v54 = vld [vmem:[#allocation5 + $0x20] sm:$0xff]  ;;  %v3126_v61 = vld [vmem:[#allocation5 + $0x378] sm:$0xff]  ;;  %4338 = vmatprep.subr.mxu1 %v2613_v48  ;;  %v3140_v48 = vld [vmem:[#allocation5 + $0x3e8] sm:$0xff] }
 0x1b0   :  { %v6046_v19 = vpop.f32.mrf.mxu0  ;;  %4485 = vmatpush3.msra.mxu0 %v3126_v61  ;;  %4339 = vmatpush3.msra.mxu1 %v2597_v54 }
 0x1b1   :  { %6815 = vst [vmem:[#allocation60_spill] sm:$0xff] %v6042_v33  ;;  %6816 = vst [vmem:[#allocation61_spill] sm:$0xff] %v6046_v19  ;;  %v6822_v19 = vld [vmem:[#allocation16_spill] sm:$0xff]  ;;  %4340 = vmatprep.subr.mxu1 %v2612_v42  ;;  %4486 = vmatprep.subr.mxu0 %v3141_v50  ;;  %v6825_v42 = vld [vmem:[#allocation37_spill] sm:$0xff] }
 0x1b2   :  { %v1237_v26 = vpop.f32.mrf.mxu0  ;;  %4341 = vmatpush3.msra.mxu1 %v2596_v5  ;;  %4487 = vmatpush3.msra.mxu0 %v3125_v16  ;;  %v6826_v50 = vld [vmem:[#allocation38_spill] sm:$0xff]  ;;  %v6827_v5 = vld [vmem:[#allocation36_spill] sm:$0xff] }
 0x1b3   :  { %v6049_v25 = vadd.f32 %v1237_v26, %v5849_v55  ;;  %v832_v55 = vadd.f32 %v5656_v9, %v5654_v8  ;;  %v6060_v26 = vpop.f32.mrf.mxu1  ;;  %v2611_v9 = vld [vmem:[#allocation5 + $0x90] sm:$0xff]  ;;  %4488 = vmatprep.subr.mxu0 %v3140_v48  ;;  %v6828_v48 = vld [vmem:[#allocation40_spill] sm:$0xff] }
 0x1b4   :  { %v6053_v53 = vpop.f32.mrf.mxu0  ;;  %4342 = vmatprep.subr.mxu1 %v2611_v9  ;;  %v3123_v9 = vld [vmem:[#allocation5 + $0x360] sm:$0xff] }
 0x1b5   :  { %6817 = vst [vmem:[#allocation62_spill] sm:$0xff] %v6049_v25  ;;  %6818 = vst [vmem:[#allocation63_spill] sm:$0xff] %v6053_v53  ;;  %v6821_v53 = vld [vmem:[#allocation15_spill] sm:$0xff]  ;;  %v6068_v61 = vpop.f32.mrf.mxu1 }
 0x1b6   :  { %v1243_v11 = vpop.f32.mrf.mxu0  ;;  %v834_v40 = vadd.f32 %v6822_v19, %v6821_v53  ;;  %6823 = vst [vmem:[#allocation15_spill] sm:$0xff] %v6068_v61  ;;  %v2595_v19 = vld [vmem:[#allocation5 + $0x10] sm:$0xff]  ;;  %v3124_v53 = vld [vmem:[#allocation5 + $0x368] sm:$0xff] }
 0x1b7   :  { %v6056_v33 = vadd.f32 %v1243_v11, %v5860_v58  ;;  %v1297_v58 = vadd.f32 %v5871_v14, %v832_v55  ;;  %v6824_v14 = vld [vmem:[#allocation35_spill] sm:$0xff]  ;;  %v1763_v55 = vadd.f32 %v6826_v50, %v6825_v42  ;;  %4343 = vmatpush3.msra.mxu1 %v2595_v19  ;;  %4489 = vmatpush3.msra.mxu0 %v3124_v53  ;;  %v6829_v19 = vld [vmem:[#allocation17_spill] sm:$0xff]  ;;  %v6830_v53 = vld [vmem:[#allocation18_spill] sm:$0xff]  ;;  %v6078_v21 = vpop.f32.mrf.mxu1 }
 0x1b8   :  { %v6062_v25 = vpop.f32.mrf.mxu0  ;;  %v1299_v8 = vadd.f32 %v5878_v56, %v834_v40  ;;  %v1761_v54 = vadd.f32 %v6824_v14, %v5869_v0  ;;  %v2610_v56 = vld [vmem:[#allocation5 + $0x88] sm:$0xff]  ;;  %v3139_v40 = vld [vmem:[#allocation5 + $0x3e0] sm:$0xff]  ;;  %v3138_v14 = vld [vmem:[#allocation5 + $0x3d8] sm:$0xff]  ;;  %v836_v50 = vadd.f32 %v6830_v53, %v6829_v19  ;;  %v1768_v53 = vadd.f32 %v5921_v57, %v5896_v13 }
 0x1b9   :  { %6819 = vst [vmem:[#allocation64_spill] sm:$0xff] %v6056_v33  ;;  %6820 = vst [vmem:[#allocation65_spill] sm:$0xff] %v6062_v25  ;;  %v1762_v16 = vadd.f32 %v6827_v5, %v1297_v58  ;;  %4344 = vmatprep.subr.mxu1 %v2610_v56  ;;  %4490 = vmatprep.subr.mxu0 %v3139_v40  ;;  %v2609_v0 = vld [vmem:[#allocation5 + $0x80] sm:$0xff]  ;;  %v3122_v56 = vld [vmem:[#allocation5 + $0x358] sm:$0xff] }
 0x1ba   :  { %v2035_v11 = vpop.f32.mrf.mxu0  ;;  %v1764_v38 = vadd.f32 %v6828_v48, %v1299_v8  ;;  %4345 = vmatpush3.msra.mxu1 %v2594_v31  ;;  %4491 = vmatpush3.msra.mxu0 %v3123_v9  ;;  %v2593_v42 = vld [vmem:[#allocation5] sm:$0xff]  ;;  %v3137_v31 = vld [vmem:[#allocation5 + $0x3d0] sm:$0xff]  ;;  %v3136_v9 = vld [vmem:[#allocation5 + $0x3c8] sm:$0xff]  ;;  %v1767_v48 = vadd.f32 %v5912_v63, %v5892_v36 }
 0x1bb   :  { %v2226_v49 = vadd.f32 %v2035_v11, %v1761_v54  ;;  %4346 = vmatprep.subr.mxu1 %v2609_v0  ;;  %4492 = vmatprep.subr.mxu0 %v3138_v14  ;;  %v3121_v54 = vld [vmem:[#allocation5 + $0x350] sm:$0xff]  ;;  %v3135_v0 = vld [vmem:[#allocation5 + $0x3c0] sm:$0xff]  ;;  %v3118_v63 = vld [vmem:[#allocation5 + $0x338] sm:$0xff] }
 0x1bc   :  { %v2037_v33 = vpop.f32.mrf.mxu0  ;;  %4347 = vmatpush3.msra.mxu1 %v2593_v42  ;;  %4493 = vmatpush3.msra.mxu0 %v3122_v56  ;;  %v3119_v14 = vld [vmem:[#allocation5 + $0x340] sm:$0xff]  ;;  %v3117_v13 = vld [vmem:[#allocation5 + $0x330] sm:$0xff]  ;;  %v3132_v57 = vld [vmem:[#allocation5 + $0x3a8] sm:$0xff] }
 0x1bd   :  { %v2227_v40 = vadd.f32 %v2037_v33, %v1762_v16  ;;  %4494 = vmatprep.subr.mxu0 %v3137_v31  ;;  %v3120_v33 = vld [vmem:[#allocation5 + $0x348] sm:$0xff]  ;;  %v3133_v31 = vld [vmem:[#allocation5 + $0x3b0] sm:$0xff] }
 0x1be   :  { %v2041_v25 = vpop.f32.mrf.mxu0  ;;  %4495 = vmatpush3.msra.mxu0 %v3121_v54 }
 0x1bf   :  { %v2228_v61 = vadd.f32 %v2041_v25, %v1763_v55  ;;  %v6831_v25 = vld [vmem:[#allocation41_spill] sm:$0xff]  ;;  %4496 = vmatprep.subr.mxu0 %v3136_v9 }
 0x1c0   :  { %v2043_v58 = vpop.f32.mrf.mxu0  ;;  %v1301_v11 = vadd.f32 %v6831_v25, %v836_v50  ;;  %4497 = vmatpush3.msra.mxu0 %v3120_v33  ;;  %v1769_v33 = vadd.f32 %v5930_v23, %v5901_v3  ;;  %v3130_v3 = vld [vmem:[#allocation5 + $0x398] sm:$0xff] }
 0x1c1   :  { %v2229_v5 = vadd.f32 %v2043_v58, %v1764_v38  ;;  %v6080_v46 = vmax.f32 %v2226_v49, %v2228_v61  ;;  %v6087_v38 = vpop.f32.mrf.mxu1  ;;  %v6832_v61 = vld [vmem:[#allocation39_spill] sm:$0xff]  ;;  %4498 = vmatprep.subr.mxu0 %v3135_v0 }
 0x1c2   :  { %v2047_v8 = vpop.f32.mrf.mxu0  ;;  %v1765_v16 = vadd.f32 %v5894_v12, %v6832_v61  ;;  %v1766_v42 = vadd.f32 %v5903_v4, %v1301_v11  ;;  %4499 = vmatpush3.msra.mxu0 %v3119_v14  ;;  %v3134_v12 = vld [vmem:[#allocation5 + $0x3b8] sm:$0xff]  ;;  %v3116_v11 = vld [vmem:[#allocation5 + $0x328] sm:$0xff]  ;;  %v3131_v61 = vld [vmem:[#allocation5 + $0x3a0] sm:$0xff]  ;;  %v1772_v14 = vadd.f32 %v5957_v7, %v5914_v10 }
 0x1c3   :  { %v6083_v55 = vmax.f32 %v2227_v40, %v2229_v5  ;;  %2340 = vrot.lane.b32.xlu0 %v6080_v46, %s5015_s0  ;;  %v6098_v56 = vpop.f32.mrf.mxu1  ;;  %4500 = vmatprep.subr.mxu0 %v3134_v12  ;;  %v3115_v0 = vld [vmem:[#allocation5 + $0x320] sm:$0xff]  ;;  %v3113_v10 = vld [vmem:[#allocation5 + $0x310] sm:$0xff]  ;;  %v3128_v12 = vld [vmem:[#allocation5 + $0x388] sm:$0xff] }
 0x1c4   :  { %v2049_v49 = vpop.f32.mrf.mxu0  ;;  %v2230_v50 = vadd.f32 %v2047_v8, %v1765_v16  ;;  %4501 = vmatpush3.msra.mxu0 %v3118_v63  ;;  %v1770_v16 = vadd.f32 %v5939_v28, %v5905_v18 }
 0x1c5   :  { %v2231_v40 = vadd.f32 %v2049_v49, %v1766_v42  ;;  %4502 = vmatprep.subr.mxu0 %v3133_v31  ;;  %v6106_v54 = vpop.f32.mrf.mxu1  ;;  %v1771_v49 = vadd.f32 %v5948_v62, %v5910_v24  ;;  %v3114_v62 = vld [vmem:[#allocation5 + $0x318] sm:$0xff]  ;;  %v1775_v31 = vadd.f32 %v5984_v35, %v5928_v34 }
 0x1c6   :  { %v2053_v19 = vpop.f32.mrf.mxu0  ;;  %4503 = vmatpush3.msra.mxu0 %v3117_v13 }
 0x1c7   :  { %v2232_v58 = vadd.f32 %v2053_v19, %v1767_v48  ;;  %2342 = vrot.lane.b32.xlu0 %v6083_v55, %s5015_s0  ;;  %4504 = vmatprep.subr.mxu0 %v3132_v57  ;;  %v6118_v23 = vpop.f32.mrf.mxu1  ;;  %v3111_v57 = vld [vmem:[#allocation5 + $0x300] sm:$0xff] }
 0x1c8   :  { %v2055_v36 = vpop.f32.mrf.mxu0  ;;  %4505 = vmatpush3.msra.mxu0 %v3116_v11  ;;  %v1774_v11 = vadd.f32 %v5975_v43, %v5923_v17  ;;  %v2786_v17 = vld [vmem:[#allocation5 + $0x1f8] sm:$0xff] }
 0x1c9   :  { %v2233_v5 = vadd.f32 %v2055_v36, %v1768_v53  ;;  %v6100_v4 = vmax.f32 %v2230_v50, %v2232_v58  ;;  %4506 = vmatprep.subr.mxu0 %v3131_v61  ;;  %v3129_v50 = vld [vmem:[#allocation5 + $0x390] sm:$0xff]  ;;  %v6126_v36 = vpop.f32.mrf.mxu1  ;;  %4372 = vmatprep.subr.mxu1 %v2786_v17 }
 0x1ca   :  { %v2059_v25 = vpop.f32.mrf.mxu0  ;;  %4507 = vmatpush3.msra.mxu0 %v3115_v0 }
 0x1cb   :  { %v6102_v8 = vmax.f32 %v2231_v40, %v2233_v5  ;;  %2363 = vrot.lane.b32.xlu1 %v6100_v4, %s5015_s0  ;;  %v2234_v42 = vadd.f32 %v2059_v25, %v1769_v33  ;;  %4508 = vmatprep.subr.mxu0 %v3130_v3  ;;  %v3112_v40 = vld [vmem:[#allocation5 + $0x308] sm:$0xff]  ;;  %v1773_v5 = vadd.f32 %v5966_v15, %v5919_v29  ;;  %v3127_v25 = vld [vmem:[#allocation5 + $0x380] sm:$0xff]  ;;  %v6138_v29 = vpop.f32.mrf.mxu1  ;;  %v6833_v15 = vmov 0.0  }
 0x1cc   :  { %v2061_v9 = vpop.f32.mrf.mxu0  ;;  %4509 = vmatpush3.msra.mxu0 %v3114_v62 }
 0x1cd   :  { %v2235_v53 = vadd.f32 %v2061_v9, %v1770_v16  ;;  %4510 = vmatprep.subr.mxu0 %v3129_v50  ;;  %v1776_v9 = vadd.f32 %v5993_v59, %v5932_v30  ;;  %v6147_v30 = vpop.f32.mrf.mxu1  ;;  %v1777_v59 = vadd.f32 %v6002_v6, %v5937_v39 }
 0x1ce   :  { %v2065_v48 = vpop.f32.mrf.mxu0  ;;  %4511 = vmatpush3.msra.mxu0 %v3113_v10 }
 0x1cf   :  { %v2236_v19 = vadd.f32 %v2065_v48, %v1771_v49  ;;  %2365 = vrot.lane.b32.xlu1 %v6102_v8, %s5015_s0  ;;  %4512 = vmatprep.subr.mxu0 %v3128_v12 }
 0x1d0   :  { %v2067_v24 = vpop.f32.mrf.mxu0  ;;  %4513 = vmatpush3.msra.mxu0 %v3112_v40  ;;  %v1784_v40 = vadd.f32 %v6051_v51, %v5968_v47  ;;  %v1785_v47 = vadd.f32 %v6060_v26, %v5973_v22  ;;  %v6835_v51 = vld [vmem:[#allocation44_spill] sm:$0xff] }
 0x1d1   :  { %v6120_v18 = vmax.f32 %v2234_v42, %v2236_v19  ;;  %v2237_v28 = vadd.f32 %v2067_v24, %v1772_v14  ;;  %4514 = vmatprep.subr.mxu0 %v3127_v25  ;;  %v1779_v14 = vadd.f32 %v6016_v1, %v5946_v32  ;;  %v6834_v19 = vld [vmem:[#allocation42_spill] sm:$0xff]  ;;  %v1780_v24 = vadd.f32 %v6023_v20, %v5950_v45 }
 0x1d2   :  { %v2071_v58 = vpop.f32.mrf.mxu0  ;;  %4515 = vmatpush3.msra.mxu0 %v3111_v57  ;;  %v1778_v3 = vadd.f32 %v6009_v41, %v6834_v19  ;;  %v1781_v45 = vadd.f32 %v6030_v52, %v5955_v37  ;;  %v1783_v20 = vadd.f32 %v6044_v27, %v5964_v44 }
 0x1d3   :  { %v6122_v7 = vmax.f32 %v2235_v53, %v2237_v28  ;;  %2383 = vrot.lane.b32.xlu0 %v6120_v18, %s5015_s0  ;;  %v2238_v33 = vadd.f32 %v2071_v58, %v1773_v5  ;;  %4698 = vmatprep.subr.mxu0 %v6833_v15  ;;  %v6159_v28 = vpop.f32.mrf.mxu1 }
 0x1d4   :  { %v2073_v63 = vpop.f32.mrf.mxu0 }
 0x1d5   :  { %2385 = vrot.lane.b32.xlu1 %v6122_v7, %s5015_s0  ;;  %v2239_v35 = vadd.f32 %v2073_v63, %v1774_v11  ;;  %v6167_v10 = vpop.f32.mrf.mxu1  ;;  %v1782_v63 = vadd.f32 %v6037_v60, %v5959_v2  ;;  %v1787_v60 = vadd.f32 %v6078_v21, %v6835_v51  ;;  %v6848_v51 = vld [vmem:[#allocation53_spill] sm:$0xff] }
 0x1d6   :  { %v2077_v13 = vpop.f32.mrf.mxu0 }
 0x1d7   :  { %v2240_v49 = vadd.f32 %v2077_v13, %v1775_v31  ;;  %v6179_v25 = vpop.f32.mrf.mxu1 }
 0x1d8   :  { %v2079_v34 = vpop.f32.mrf.mxu0 }
 0x1d9   :  { %v6141_v61 = vmax.f32 %v2238_v33, %v2240_v49  ;;  %v2241_v16 = vadd.f32 %v2079_v34, %v1776_v9  ;;  %v6187_v11 = vpop.f32.mrf.mxu1  ;;  %v6836_v33 = vld [vmem:[#allocation43_spill] sm:$0xff] }
 0x1da   :  { %v2083_v48 = vpop.f32.mrf.mxu0  ;;  %v6837_v49 = vld [vmem:[#allocation15_spill] sm:$0xff] }
 0x1db   :  { %v6143_v0 = vmax.f32 %v2239_v35, %v2241_v16  ;;  %2403 = vrot.lane.b32.xlu0 %v6141_v61, %s5015_s0  ;;  %v2242_v62 = vadd.f32 %v2083_v48, %v1777_v59  ;;  %v1786_v34 = vadd.f32 %v6837_v49, %v6836_v33  ;;  %v6838_v35 = vld [vmem:[#allocation45_spill] sm:$0xff]  ;;  %v6849_v49 = vld [vmem:[#allocation50_spill] sm:$0xff] }
 0x1dc   :  { %v2085_v43 = vpop.f32.mrf.mxu0  ;;  %v1788_v16 = vadd.f32 %v6087_v38, %v6838_v35  ;;  %v6840_v38 = vld [vmem:[#allocation48_spill] sm:$0xff] }
 0x1dd   :  { %2405 = vrot.lane.b32.xlu1 %v6143_v0, %s5015_s0  ;;  %v2243_v58 = vadd.f32 %v2085_v43, %v1778_v3  ;;  %v1684_v43 = vpop.f32.mrf.mxu1  ;;  %v6850_v35 = vld [vmem:[#allocation52_spill] sm:$0xff] }
 0x1de   :  { %v2089_v42 = vpop.f32.mrf.mxu0 }
 0x1df   :  { %v2244_v53 = vadd.f32 %v2089_v42, %v1779_v14  ;;  %v1686_v19 = vpop.f32.mrf.mxu1 }
 0x1e0   :  { %v2091_v50 = vpop.f32.mrf.mxu0 }
 0x1e1   :  { %v6161_v39 = vmax.f32 %v2242_v62, %v2244_v53  ;;  %v2245_v6 = vadd.f32 %v2091_v50, %v1780_v24  ;;  %v6839_v24 = vld [vmem:[#allocation46_spill] sm:$0xff]  ;;  %v1791_v53 = vadd.f32 %v6118_v23, %v6840_v38 }
 0x1e2   :  { %v2095_v32 = vpop.f32.mrf.mxu0  ;;  %v1789_v62 = vadd.f32 %v6098_v56, %v6839_v24 }
 0x1e3   :  { %v6163_v1 = vmax.f32 %v2243_v58, %v2245_v6  ;;  %2423 = vrot.lane.b32.xlu0 %v6161_v39, %s5015_s0  ;;  %v2246_v5 = vadd.f32 %v2095_v32, %v1781_v45  ;;  %v6841_v58 = vld [vmem:[#allocation47_spill] sm:$0xff]  ;;  %v6842_v32 = vld [vmem:[#allocation49_spill] sm:$0xff] }
 0x1e4   :  { %v2097_v41 = vpop.f32.mrf.mxu0  ;;  %v1790_v6 = vadd.f32 %v6106_v54, %v6841_v58 }
 0x1e5   :  { %2425 = vrot.lane.b32.xlu1 %v6163_v1, %s5015_s0  ;;  %v2247_v57 = vadd.f32 %v2097_v41, %v1782_v63  ;;  %v1792_v41 = vadd.f32 %v6126_v36, %v6842_v32  ;;  %v6844_v63 = vld [vmem:[#allocation20_spill] sm:$0xff] }
 0x1e6   :  { %v2101_v12 = vpop.f32.mrf.mxu0 }
 0x1e7   :  { %v2248_v31 = vadd.f32 %v2101_v12, %v1783_v20  ;;  %v6843_v12 = vld [vmem:[#allocation19_spill] sm:$0xff] }
 0x1e8   :  { %v2103_v13 = vpop.f32.mrf.mxu0 }
 0x1e9   :  { %v6181_v37 = vmax.f32 %v2246_v5, %v2248_v31  ;;  %v2249_v52 = vadd.f32 %v2103_v13, %v1784_v40  ;;  %v864_v40 = vadd.f32 %v6844_v63, %v6843_v12  ;;  %v1690_v5 = vpop.f32.mrf.mxu1  ;;  %v6845_v31 = vld [vmem:[#allocation21_spill] sm:$0xff]  ;;  %v6846_v13 = vld [vmem:[#allocation22_spill] sm:$0xff] }
 0x1ea   :  { %v2107_v44 = vpop.f32.mrf.mxu0  ;;  %v866_v23 = vadd.f32 %v6846_v13, %v6845_v31  ;;  %v6858_v31 = vld [vmem:[#allocation56_spill] sm:$0xff] }
 0x1eb   :  { %v6183_v27 = vmax.f32 %v2247_v57, %v2249_v52  ;;  %2443 = vrot.lane.b32.xlu0 %v6181_v37, %s5015_s0  ;;  %v2250_v48 = vadd.f32 %v2107_v44, %v1785_v47  ;;  %v6847_v47 = vld [vmem:[#allocation51_spill] sm:$0xff]  ;;  %v1799_v13 = vadd.f32 %v1684_v43, %v6858_v31  ;;  %v6870_v31 = vld [vmem:[#allocation34_spill] sm:$0xff] }
 0x1ec   :  { %v2109_v2 = vpop.f32.mrf.mxu0  ;;  %v1329_v54 = vadd.f32 %v6847_v47, %v864_v40  ;;  %v6857_v40 = vld [vmem:[#allocation54_spill] sm:$0xff] }
 0x1ed   :  { %2445 = vrot.lane.b32.xlu1 %v6183_v27, %s5015_s0  ;;  %v2251_v14 = vadd.f32 %v2109_v2, %v1786_v34  ;;  %v1793_v34 = vadd.f32 %v6138_v29, %v6849_v49  ;;  %v6854_v29 = vld [vmem:[#allocation26_spill] sm:$0xff] }
 0x1ee   :  { %v2113_v9 = vpop.f32.mrf.mxu0 }
 0x1ef   :  { %v2252_v17 = vadd.f32 %v2113_v9, %v1787_v60  ;;  %v1331_v60 = vadd.f32 %v6848_v51, %v866_v23  ;;  %v1692_v9 = vpop.f32.mrf.mxu1  ;;  %v6860_v51 = vld [vmem:[#allocation28_spill] sm:$0xff] }
 0x1f0   :  { %v2115_v59 = vpop.f32.mrf.mxu0 }
 0x1f1   :  { %v6199_v42 = vmax.f32 %v2250_v48, %v2252_v17  ;;  %v2253_v22 = vadd.f32 %v2115_v59, %v1788_v16  ;;  %v1795_v16 = vadd.f32 %v6159_v28, %v6850_v35  ;;  %v1794_v17 = vadd.f32 %v6147_v30, %v1329_v54  ;;  %v6856_v30 = vld [vmem:[#allocation57_spill] sm:$0xff]  ;;  %v6859_v54 = vld [vmem:[#allocation27_spill] sm:$0xff]  ;;  %v6862_v35 = vld [vmem:[#allocation30_spill] sm:$0xff] }
 0x1f2   :  { %v2119_v26 = vpop.f32.mrf.mxu0  ;;  %v1796_v59 = vadd.f32 %v6167_v10, %v1331_v60  ;;  %v872_v60 = vadd.f32 %v6860_v51, %v6859_v54 }
 0x1f3   :  { %v6201_v21 = vmax.f32 %v2251_v14, %v2253_v22  ;;  %2463 = vrot.lane.b32.xlu0 %v6199_v42, %s5015_s0  ;;  %v2254_v45 = vadd.f32 %v2119_v26, %v1789_v62  ;;  %v6851_v26 = vld [vmem:[#allocation23_spill] sm:$0xff]  ;;  %v1696_v62 = vpop.f32.mrf.mxu1 }
 0x1f4   :  { %v2121_v3 = vpop.f32.mrf.mxu0 }
 0x1f5   :  { %2465 = vrot.lane.b32.xlu1 %v6201_v21, %s5015_s0  ;;  %v2255_v57 = vadd.f32 %v2121_v3, %v1790_v6  ;;  %v6852_v3 = vld [vmem:[#allocation24_spill] sm:$0xff]  ;;  %v1698_v12 = vpop.f32.mrf.mxu1 }
 0x1f6   :  { %v2125_v50 = vpop.f32.mrf.mxu0  ;;  %v868_v24 = vadd.f32 %v6852_v3, %v6851_v26 }
 0x1f7   :  { %v2256_v20 = vadd.f32 %v2125_v50, %v1791_v53  ;;  %v6853_v53 = vld [vmem:[#allocation25_spill] sm:$0xff] }
 0x1f8   :  { %v2127_v56 = vpop.f32.mrf.mxu0  ;;  %v870_v50 = vadd.f32 %v6854_v29, %v6853_v53  ;;  %v6866_v53 = vld [vmem:[#allocation60_spill] sm:$0xff] }
 0x1f9   :  { %v6219_v52 = vmax.f32 %v2254_v45, %v2256_v20  ;;  %v2257_v44 = vadd.f32 %v2127_v56, %v1792_v41  ;;  %v6855_v41 = vld [vmem:[#allocation55_spill] sm:$0xff]  ;;  %v1797_v56 = vadd.f32 %v6179_v25, %v6857_v40  ;;  %v1803_v29 = vadd.f32 %v1696_v62, %v6866_v53 }
 0x1fa   :  { %v2131_v2 = vpop.f32.mrf.mxu0  ;;  %v1333_v45 = vadd.f32 %v6855_v41, %v868_v24  ;;  %v1335_v20 = vadd.f32 %v6856_v30, %v870_v50  ;;  %v6865_v24 = vld [vmem:[#allocation58_spill] sm:$0xff]  ;;  %v6868_v30 = vld [vmem:[#allocation32_spill] sm:$0xff] }
 0x1fb   :  { %v6223_v36 = vmax.f32 %v2255_v57, %v2257_v44  ;;  %2483 = vrot.lane.b32.xlu0 %v6219_v52, %s5015_s0  ;;  %v2258_v14 = vadd.f32 %v2131_v2, %v1793_v34  ;;  %v6861_v34 = vld [vmem:[#allocation29_spill] sm:$0xff] }
 0x1fc   :  { %v2133_v33 = vpop.f32.mrf.mxu0  ;;  %v1798_v57 = vadd.f32 %v6187_v11, %v1333_v45  ;;  %v1800_v44 = vadd.f32 %v1686_v19, %v1335_v20  ;;  %v6867_v45 = vld [vmem:[#allocation31_spill] sm:$0xff] }
 0x1fd   :  { %2485 = vrot.lane.b32.xlu1 %v6223_v36, %s5015_s0  ;;  %v2259_v58 = vadd.f32 %v2133_v33, %v1794_v17  ;;  %v1702_v33 = vpop.f32.mrf.mxu1  ;;  %v876_v20 = vadd.f32 %v6868_v30, %v6867_v45 }
 0x1fe   :  { %v2137_v48 = vpop.f32.mrf.mxu0 }
 0x1ff   :  { %v2260_v22 = vadd.f32 %v2137_v48, %v1795_v16  ;;  %v874_v16 = vadd.f32 %v6862_v35, %v6861_v34  ;;  %v1704_v26 = vpop.f32.mrf.mxu1  ;;  %v6874_v34 = vld [vmem:[#allocation64_spill] sm:$0xff] }
 0x200   :  { %v2139_v38 = vpop.f32.mrf.mxu0 }
 0x201   :  { %v6239_v28 = vmax.f32 %v2258_v14, %v2260_v22  ;;  %v2261_v6 = vadd.f32 %v2139_v38, %v1796_v59  ;;  %v6863_v59 = vld [vmem:[#allocation59_spill] sm:$0xff]  ;;  %v6864_v22 = vld [vmem:[#allocation61_spill] sm:$0xff]  ;;  %v1801_v38 = vadd.f32 %v1690_v5, %v6865_v24 }
 0x202   :  { %v2143_v32 = vpop.f32.mrf.mxu0  ;;  %v1337_v14 = vadd.f32 %v6863_v59, %v872_v60  ;;  %v1339_v11 = vadd.f32 %v6864_v22, %v874_v16  ;;  %v6873_v60 = vld [vmem:[#allocation62_spill] sm:$0xff] }
 0x203   :  { %v6243_v10 = vmax.f32 %v2259_v58, %v2261_v6  ;;  %2503 = vrot.lane.b32.xlu0 %v6239_v28, %s5015_s0  ;;  %v2262_v2 = vadd.f32 %v2143_v32, %v1797_v56  ;;  %v6869_v56 = vld [vmem:[#allocation33_spill] sm:$0xff] }
 0x204   :  { %v2145_v63 = vpop.f32.mrf.mxu0  ;;  %v1802_v58 = vadd.f32 %v1692_v9, %v1337_v14  ;;  %v1804_v6 = vadd.f32 %v1698_v12, %v1339_v11 }
 0x205   :  { %2505 = vrot.lane.b32.xlu1 %v6243_v10, %s5015_s0  ;;  %v2263_v25 = vadd.f32 %v2145_v63, %v1798_v57  ;;  %v1708_v63 = vpop.f32.mrf.mxu1 }
 0x206   :  { %v2149_v23 = vpop.f32.mrf.mxu0  ;;  %v1807_v35 = vadd.f32 %v1708_v63, %v6874_v34  ;;  %v2783_v34 = vld [vmem:[#allocation5 + $0x1e0] sm:$0xff] }
 0x207   :  { %v2264_v47 = vadd.f32 %v2149_v23, %v1799_v13  ;;  %v878_v13 = vadd.f32 %v6870_v31, %v6869_v56  ;;  %v1710_v54 = vpop.f32.mrf.mxu1 }
 0x208   :  { %v2151_v49 = vpop.f32.mrf.mxu0 }
 0x209   :  { %v6257_v48 = vmax.f32 %v2262_v2, %v2264_v47  ;;  %v2265_v43 = vadd.f32 %v2151_v49, %v1800_v44  ;;  %v6871_v44 = vld [vmem:[#allocation63_spill] sm:$0xff]  ;;  %v6872_v47 = vld [vmem:[#allocation65_spill] sm:$0xff]  ;;  %v1805_v49 = vadd.f32 %v1702_v33, %v6873_v60  ;;  %v2324_v33 = vlaneseq }
 0x20a   :  { %v2155_v17 = vpop.f32.mrf.mxu0  ;;  %v1341_v2 = vadd.f32 %v6871_v44, %v876_v20  ;;  %v1343_v9 = vadd.f32 %v6872_v47, %v878_v13  ;;  %v2785_v44 = vld [vmem:[#allocation5 + $0x1f0] sm:$0xff] }
 0x20b   :  { %v6261_v19 = vmax.f32 %v2263_v25, %v2265_v43  ;;  %2523 = vrot.lane.b32.xlu0 %v6257_v48, %s5015_s0  ;;  %v2266_v32 = vadd.f32 %v2155_v17, %v1801_v38  ;;  %v2325_v38 = vshrl.u32 %v2324_v33, 7  ;;  %v6293_v53 = vand.u32 127, %v2324_v33  ;;  %v2781_v33 = vld [vmem:[#allocation5 + $0x1d0] sm:$0xff] }
 0x20c   :  { %v2157_v3 = vpop.f32.mrf.mxu0  ;;  %v1806_v25 = vadd.f32 %v1704_v26, %v1341_v2  ;;  %v1808_v43 = vadd.f32 %v1710_v54, %v1343_v9  ;;  %v2784_v54 = vld [vmem:[#allocation5 + $0x1e8] sm:$0xff] }
 0x20d   :  { %2525 = vrot.lane.b32.xlu1 %v6261_v19, %s5015_s0  ;;  %v2267_v23 = vadd.f32 %v2157_v3, %v1802_v58  ;;  %v2322_v58 = vld [vmem:[%s6758_s2] sm:$0x3]  ;;  %vm2346_vm2 = vcmp.lt.s32.totalorder %v6293_v53, 122  ;;  %s5017_s2 = smov 112   ;;  %vm4035_vm4 = vcmp.lt.s32.totalorder %v6293_v53, 10 }
 0x20e   :  { %v2161_v50 = vpop.f32.mrf.mxu0 }
 0x20f   :  { %v2268_v41 = vadd.f32 %v2161_v50, %v1803_v29  ;;  %v2326_v29 = vsub.s32 0, %v2325_v38  ;;  %v2330_v50 = vsub.s32 1, %v2325_v38  ;;  %v2765_v38 = vld [vmem:[#allocation5 + $0x150] sm:$0xff] }
 0x210   :  { %v2163_v40 = vpop.f32.mrf.mxu0 }
 0x211   :  { %v6273_v5 = vmax.f32 %v2266_v32, %v2268_v41  ;;  %v2269_v62 = vadd.f32 %v2163_v40, %v1804_v6  ;;  %v6299_v6 = vrot.slane %v2322_v58, %v2326_v29  ;;  %v6301_v41 = vrot.slane %v2322_v58, %v2330_v50  ;;  %v2780_v50 = vld [vmem:[#allocation5 + $0x1c8] sm:$0xff] }
 0x212   :  { %v2167_v57 = vpop.f32.mrf.mxu0 }
 0x213   :  { %v6277_v12 = vmax.f32 %v2267_v23, %v2269_v62  ;;  %2543 = vrot.lane.b32.xlu0 %v6273_v5, %s5015_s0  ;;  %v2270_v17 = vadd.f32 %v2167_v57, %v1805_v49  ;;  %v2770_v62 = vld [vmem:[#allocation5 + $0x178] sm:$0xff] }
 0x214   :  { %v2169_v51 = vpop.f32.mrf.mxu0 }
 0x215   :  { %2545 = vrot.lane.b32.xlu1 %v6277_v12, %s5015_s0  ;;  %v2271_v22 = vadd.f32 %v2169_v51, %v1806_v25  ;;  %v2768_v51 = vld [vmem:[#allocation5 + $0x168] sm:$0xff] }
 0x216   :  { %v2173_v16 = vpop.f32.mrf.mxu0 }
 0x217   :  { %v2272_v59 = vadd.f32 %v2173_v16, %v1807_v35  ;;  %v2767_v35 = vld [vmem:[#allocation5 + $0x160] sm:$0xff] }
 0x218   :  { %v2175_v14 = vpop.f32.mrf.mxu0 }
 0x219   :  { %v6285_v11 = vmax.f32 %v2270_v17, %v2272_v59  ;;  %v2273_v3 = vadd.f32 %v2175_v14, %v1808_v43  ;;  %v2782_v43 = vld [vmem:[#allocation5 + $0x1d8] sm:$0xff] }
 0x21a   :  { %v2766_v14 = vld [vmem:[#allocation5 + $0x158] sm:$0xff] }
 0x21b   :  { %v6287_v24 = vmax.f32 %v2271_v22, %v2273_v3  ;;  %2563 = vrot.lane.b32.xlu0 %v6285_v11, %s5015_s0 }
 0x21d   :  { %2565 = vrot.lane.b32.xlu1 %v6287_v24, %s5015_s0 }
 0x235   :  { %v2341_v26 = vpop.permute.xlu0 %2340 }
 0x239   :  { %v2343_v32 = vpop.permute.xlu0 %2342 }
 0x23a   :  { %v2347_v45 = vsel %vm2346_vm2, %v2341_v26, %v2343_v32  ;;  %v2348_v30 = vsel %vm2346_vm2, %v2343_v32, %v2341_v26  ;;  %v2779_v32 = vld [vmem:[#allocation5 + $0x1c0] sm:$0xff] }
 0x23b   :  { %v2349_v20 = vmax.f32 %v6080_v46, %v2347_v45  ;;  %v2350_v63 = vmax.f32 %v6083_v55, %v2348_v30  ;;  %v2769_v46 = vld [vmem:[#allocation5 + $0x170] sm:$0xff]  ;;  %v2763_v45 = vld [vmem:[#allocation5 + $0x140] sm:$0xff] }
 0x23d   :  { %v2351_v40 = vadd.f32 %v2349_v20, %v6299_v6  ;;  %v2364_v56 = vpop.permute.xlu1 %2363  ;;  %v2352_v31 = vadd.f32 %v2350_v63, %v6301_v41  ;;  %v2778_v63 = vld [vmem:[#allocation5 + $0x1b8] sm:$0xff] }
 0x23f   :  { %v2353_v13 = vmax.f32 %v2351_v40, 0.0  ;;  %v2354_v23 = vmax.f32 %v2352_v31, 0.0  ;;  %v2762_v31 = vld [vmem:[#allocation5 + $0x138] sm:$0xff] }
 0x241   :  { %2689 = vmatprep.mubr.f32.mxu1 %v2354_v23  ;;  %v2366_v57 = vpop.permute.xlu1 %2365 }
 0x242   :  { %v2367_v2 = vsel %vm2346_vm2, %v2364_v56, %v2366_v57  ;;  %v2368_v47 = vsel %vm2346_vm2, %v2366_v57, %v2364_v56  ;;  %2690 = vmatmul.mubr.f32.vlgmr.msra.gmra.mxu1 %v2353_v13  ;;  %v2761_v57 = vld [vmem:[#allocation5 + $0x130] sm:$0xff] }
 0x243   :  { %v2369_v55 = vmax.f32 %v6100_v4, %v2367_v2  ;;  %v2370_v9 = vmax.f32 %v6102_v8, %v2368_v47  ;;  %4373 = vmatpush3.msra.mxu1 %v2770_v62  ;;  %v2777_v62 = vld [vmem:[#allocation5 + $0x1b0] sm:$0xff]  ;;  %v2776_v47 = vld [vmem:[#allocation5 + $0x1a8] sm:$0xff] }
 0x244   :  { %4374 = vmatprep.subr.mxu1 %v2785_v44 }
 0x245   :  { %v6318_v60 = vadd.f32 %v2370_v9, %v6301_v41  ;;  %v6321_v49 = vadd.f32 %v2369_v55, %v6299_v6  ;;  %4375 = vmatpush3.msra.mxu1 %v2769_v46  ;;  %v2384_v16 = vpop.permute.xlu0 %2383 }
 0x246   :  { %4376 = vmatprep.subr.mxu1 %v2784_v54  ;;  %v2775_v54 = vld [vmem:[#allocation5 + $0x1a0] sm:$0xff] }
 0x247   :  { %v2386_v25 = vpop.permute.xlu1 %2385  ;;  %v2374_v4 = vmax.f32 %v6318_v60, 0.0  ;;  %v2373_v8 = vmax.f32 %v6321_v49, 0.0  ;;  %4377 = vmatpush3.msra.mxu1 %v2768_v51 }
 0x248   :  { %v2387_v17 = vsel %vm2346_vm2, %v2384_v16, %v2386_v25  ;;  %v2388_v59 = vsel %vm2346_vm2, %v2386_v25, %v2384_v16  ;;  %4378 = vmatprep.subr.mxu1 %v2783_v34 }
 0x249   :  { %v2389_v22 = vmax.f32 %v6120_v18, %v2387_v17  ;;  %v2390_v3 = vmax.f32 %v6122_v7, %v2388_v59  ;;  %2694 = vmatprep.mubr.f32.mxu1 %v2374_v4  ;;  %4379 = vmatpush3.msra.mxu1 %v2767_v35  ;;  %v2764_v18 = vld [vmem:[#allocation5 + $0x148] sm:$0xff]  ;;  %v2759_v35 = vld [vmem:[#allocation5 + $0x120] sm:$0xff]  ;;  %v2758_v17 = vld [vmem:[#allocation5 + $0x118] sm:$0xff] }
 0x24a   :  { %2695 = vmatmul.mubr.f32.gmra.mxu1 %v2373_v8  ;;  %4380 = vmatprep.subr.mxu1 %v2782_v43  ;;  %v2774_v43 = vld [vmem:[#allocation5 + $0x198] sm:$0xff] }
 0x24b   :  { %v2392_v26 = vadd.f32 %v2390_v3, %v6301_v41  ;;  %v2391_v29 = vadd.f32 %v2389_v22, %v6299_v6  ;;  %4381 = vmatpush3.msra.mxu1 %v2766_v14  ;;  %v2773_v22 = vld [vmem:[#allocation5 + $0x190] sm:$0xff] }
 0x24c   :  { %4382 = vmatprep.subr.mxu1 %v2781_v33 }
 0x24d   :  { %v6337_v58 = vmax.f32 %v2392_v26, 0.0  ;;  %v6339_v7 = vmax.f32 %v2391_v29, 0.0  ;;  %4383 = vmatpush3.msra.mxu1 %v2765_v38  ;;  %v2404_v30 = vpop.permute.xlu0 %2403  ;;  %v2772_v26 = vld [vmem:[#allocation5 + $0x188] sm:$0xff] }
 0x24e   :  { %4384 = vmatprep.subr.mxu1 %v2780_v50 }
 0x24f   :  { %2699 = vmatprep.mubr.f32.mxu1 %v6337_v58  ;;  %v2406_v20 = vpop.permute.xlu1 %2405  ;;  %4385 = vmatpush3.msra.mxu1 %v2764_v18  ;;  %v2756_v18 = vld [vmem:[#allocation5 + $0x108] sm:$0xff] }
 0x250   :  { %v2407_v40 = vsel %vm2346_vm2, %v2404_v30, %v2406_v20  ;;  %v2408_v56 = vsel %vm2346_vm2, %v2406_v20, %v2404_v30  ;;  %2700 = vmatmul.mubr.f32.gmra.mxu1 %v6339_v7  ;;  %4386 = vmatprep.subr.mxu1 %v2779_v32  ;;  %v2771_v30 = vld [vmem:[#allocation5 + $0x180] sm:$0xff] }
 0x251   :  { %v2409_v13 = vmax.f32 %v6141_v61, %v2407_v40  ;;  %v2410_v23 = vmax.f32 %v6143_v0, %v2408_v56  ;;  %4387 = vmatpush3.msra.mxu1 %v2763_v45  ;;  %v2760_v61 = vld [vmem:[#allocation5 + $0x128] sm:$0xff]  ;;  %v2755_v20 = vld [vmem:[#allocation5 + $0x100] sm:$0xff]  ;;  %v2964_v56 = vld [vmem:[#allocation5 + $0x2f8] sm:$0xff] }
 0x252   :  { %4388 = vmatprep.subr.mxu1 %v2778_v63 }
 0x253   :  { %v2411_v44 = vadd.f32 %v2409_v13, %v6299_v6  ;;  %v2412_v2 = vadd.f32 %v2410_v23, %v6301_v41  ;;  %4389 = vmatpush3.msra.mxu1 %v2762_v31 }
 0x254   :  { %4390 = vmatprep.subr.mxu1 %v2777_v62 }
 0x255   :  { %v6351_v46 = vmax.f32 %v2411_v44, 0.0  ;;  %v6353_v55 = vmax.f32 %v2412_v2, 0.0  ;;  %4391 = vmatpush3.msra.mxu1 %v2761_v57  ;;  %v2424_v9 = vpop.permute.xlu0 %2423 }
 0x256   :  { %4392 = vmatprep.subr.mxu1 %v2776_v47 }
 0x257   :  { %2704 = vmatprep.mubr.f32.mxu1 %v6353_v55  ;;  %3207 = vmatprep.mubr.f32.mxu0 %v6353_v55  ;;  %v2426_v0 = vpop.permute.xlu1 %2425 }
 0x258   :  { %v2427_v51 = vsel %vm2346_vm2, %v2424_v9, %v2426_v0  ;;  %v2428_v34 = vsel %vm2346_vm2, %v2426_v0, %v2424_v9  ;;  %2705 = vmatmul.mubr.f32.gmra.mxu1 %v6351_v46  ;;  %3208 = vmatmul.mubr.f32.vlgmr.msra.gmra.mxu0 %v6351_v46 }
 0x259   :  { %v2429_v16 = vmax.f32 %v6161_v39, %v2427_v51  ;;  %v2430_v25 = vmax.f32 %v6163_v1, %v2428_v34  ;;  %4393 = vmatpush3.msra.mxu1 %v2760_v61  ;;  %v2757_v39 = vld [vmem:[#allocation5 + $0x110] sm:$0xff] }
 0x25a   :  { %4394 = vmatprep.subr.mxu1 %v2775_v54 }
 0x25b   :  { %v2431_v59 = vadd.f32 %v2429_v16, %v6299_v6  ;;  %v2432_v14 = vadd.f32 %v2430_v25, %v6301_v41  ;;  %4395 = vmatpush3.msra.mxu1 %v2759_v35 }
 0x25c   :  { %4396 = vmatprep.subr.mxu1 %v2774_v43 }
 0x25d   :  { %v6367_v3 = vmax.f32 %v2431_v59, 0.0  ;;  %v6369_v33 = vmax.f32 %v2432_v14, 0.0  ;;  %4397 = vmatpush3.msra.mxu1 %v2758_v17  ;;  %v2444_v38 = vpop.permute.xlu0 %2443 }
 0x25e   :  { %4398 = vmatprep.subr.mxu1 %v2773_v22 }
 0x25f   :  { %2709 = vmatprep.mubr.f32.mxu1 %v6369_v33  ;;  %3212 = vmatprep.mubr.f32.mxu0 %v6369_v33  ;;  %v2446_v1 = vpop.permute.xlu1 %2445 }
 0x260   :  { %v2447_v29 = vsel %vm2346_vm2, %v2444_v38, %v2446_v1  ;;  %v2448_v50 = vsel %vm2346_vm2, %v2446_v1, %v2444_v38  ;;  %2710 = vmatmul.mubr.f32.gmra.mxu1 %v6367_v3  ;;  %3213 = vmatmul.mubr.f32.gmra.mxu0 %v6367_v3 }
 0x261   :  { %v2449_v32 = vmax.f32 %v6181_v37, %v2447_v29  ;;  %v2450_v45 = vmax.f32 %v6183_v27, %v2448_v50  ;;  %4399 = vmatpush3.msra.mxu1 %v2757_v39  ;;  %v2948_v39 = vld [vmem:[#allocation5 + $0x278] sm:$0xff]  ;;  %v2947_v29 = vld [vmem:[#allocation5 + $0x270] sm:$0xff] }
 0x262   :  { %4400 = vmatprep.subr.mxu1 %v2772_v26  ;;  %v2963_v26 = vld [vmem:[#allocation5 + $0x2f0] sm:$0xff] }
 0x263   :  { %v2451_v63 = vadd.f32 %v2449_v32, %v6299_v6  ;;  %v2452_v40 = vadd.f32 %v2450_v45, %v6301_v41  ;;  %4401 = vmatpush3.msra.mxu1 %v2756_v18  ;;  %v2961_v32 = vld [vmem:[#allocation5 + $0x2e0] sm:$0xff] }
 0x264   :  { %4402 = vmatprep.subr.mxu1 %v2771_v30 }
 0x265   :  { %v6383_v31 = vmax.f32 %v2451_v63, 0.0  ;;  %v6385_v13 = vmax.f32 %v2452_v40, 0.0  ;;  %4403 = vmatpush3.msra.mxu1 %v2755_v20  ;;  %v2464_v37 = vpop.permute.xlu0 %2463  ;;  %v2945_v20 = vld [vmem:[#allocation5 + $0x260] sm:$0xff]  ;;  %v2960_v63 = vld [vmem:[#allocation5 + $0x2d8] sm:$0xff] }
 0x266   :  { %4428 = vmatprep.subr.mxu1 %v2964_v56  ;;  %v2944_v56 = vld [vmem:[#allocation5 + $0x258] sm:$0xff] }
 0x267   :  { %2714 = vmatprep.mubr.f32.mxu1 %v6385_v13  ;;  %3217 = vmatprep.mubr.f32.mxu0 %v6385_v13  ;;  %v2466_v27 = vpop.permute.xlu1 %2465 }
 0x268   :  { %v2467_v23 = vsel %vm2346_vm2, %v2464_v37, %v2466_v27  ;;  %v2468_v62 = vsel %vm2346_vm2, %v2466_v27, %v2464_v37  ;;  %2715 = vmatmul.mubr.f32.gmra.mxu1 %v6383_v31  ;;  %3218 = vmatmul.mubr.f32.gmra.mxu0 %v6383_v31  ;;  %v2959_v27 = vld [vmem:[#allocation5 + $0x2d0] sm:$0xff] }
 0x269   :  { %v2469_v57 = vmax.f32 %v6199_v42, %v2467_v23  ;;  %v2470_v44 = vmax.f32 %v6201_v21, %v2468_v62  ;;  %v2958_v62 = vld [vmem:[#allocation5 + $0x2c8] sm:$0xff] }
 0x26b   :  { %v2471_v2 = vadd.f32 %v2469_v57, %v6299_v6  ;;  %v2472_v47 = vadd.f32 %v2470_v44, %v6301_v41 }
 0x26d   :  { %v6399_v61 = vmax.f32 %v2471_v2, 0.0  ;;  %v6401_v9 = vmax.f32 %v2472_v47, 0.0  ;;  %v2484_v0 = vpop.permute.xlu0 %2483  ;;  %v2942_v2 = vld [vmem:[#allocation5 + $0x248] sm:$0xff] }
 0x26f   :  { %2719 = vmatprep.mubr.f32.mxu1 %v6401_v9  ;;  %3222 = vmatprep.mubr.f32.mxu0 %v6401_v9  ;;  %v2486_v54 = vpop.permute.xlu1 %2485 }
 0x270   :  { %v2487_v51 = vsel %vm2346_vm2, %v2484_v0, %v2486_v54  ;;  %v2488_v42 = vsel %vm2346_vm2, %v2486_v54, %v2484_v0  ;;  %2720 = vmatmul.mubr.f32.gmra.mxu1 %v6399_v61  ;;  %3223 = vmatmul.mubr.f32.gmra.mxu0 %v6399_v61  ;;  %v2957_v54 = vld [vmem:[#allocation5 + $0x2c0] sm:$0xff] }
 0x271   :  { %v2489_v21 = vmax.f32 %v6219_v52, %v2487_v51  ;;  %v2490_v34 = vmax.f32 %v6223_v36, %v2488_v42 }
 0x273   :  { %v2491_v35 = vadd.f32 %v2489_v21, %v6299_v6  ;;  %v2492_v16 = vadd.f32 %v2490_v34, %v6301_v41  ;;  %v2941_v21 = vld [vmem:[#allocation5 + $0x240] sm:$0xff]  ;;  %v2956_v34 = vld [vmem:[#allocation5 + $0x2b8] sm:$0xff] }
 0x275   :  { %v6415_v25 = vmax.f32 %v2491_v35, 0.0  ;;  %v6417_v43 = vmax.f32 %v2492_v16, 0.0  ;;  %v2504_v17 = vpop.permute.xlu0 %2503  ;;  %v2940_v16 = vld [vmem:[#allocation5 + $0x238] sm:$0xff] }
 0x277   :  { %2724 = vmatprep.mubr.f32.mxu1 %v6417_v43  ;;  %3227 = vmatprep.mubr.f32.mxu0 %v6417_v43  ;;  %v2506_v59 = vpop.permute.xlu1 %2505 }
 0x278   :  { %v2507_v14 = vsel %vm2346_vm2, %v2504_v17, %v2506_v59  ;;  %v2508_v52 = vsel %vm2346_vm2, %v2506_v59, %v2504_v17  ;;  %2725 = vmatmul.mubr.f32.gmra.mxu1 %v6415_v25  ;;  %3228 = vmatmul.mubr.f32.gmra.mxu0 %v6415_v25  ;;  %v2939_v59 = vld [vmem:[#allocation5 + $0x230] sm:$0xff] }
 0x279   :  { %v2509_v36 = vmax.f32 %v6239_v28, %v2507_v14  ;;  %v2510_v22 = vmax.f32 %v6243_v10, %v2508_v52  ;;  %2851 = vmatprep.mubr.f32.mxu1 %v2374_v4  ;;  %v2962_v28 = vld [vmem:[#allocation5 + $0x2e8] sm:$0xff] }
 0x27a   :  { %v2946_v4 = vld [vmem:[#allocation5 + $0x268] sm:$0xff] }
 0x27b   :  { %v2511_v38 = vadd.f32 %v2509_v36, %v6299_v6  ;;  %v2512_v1 = vadd.f32 %v2510_v22, %v6301_v41  ;;  %v2954_v52 = vld [vmem:[#allocation5 + $0x2a8] sm:$0xff]  ;;  %v2953_v22 = vld [vmem:[#allocation5 + $0x2a0] sm:$0xff] }
 0x27c   :  { %2852 = vmatmul.mubr.f32.vlgmr.msra.gmra.mxu1 %v2373_v8  ;;  %v2938_v36 = vld [vmem:[#allocation5 + $0x228] sm:$0xff] }
 0x27d   :  { %v6435_v50 = vmax.f32 %v2511_v38, 0.0  ;;  %v6437_v18 = vmax.f32 %v2512_v1, 0.0  ;;  %2856 = vmatprep.mubr.f32.mxu1 %v6337_v58  ;;  %4429 = vmatpush3.msra.mxu1 %v2948_v39  ;;  %v2524_v10 = vpop.permute.xlu0 %2523  ;;  %v2937_v39 = vld [vmem:[#allocation5 + $0x220] sm:$0xff]  ;;  %v2952_v38 = vld [vmem:[#allocation5 + $0x298] sm:$0xff] }
 0x27e   :  { %4430 = vmatprep.subr.mxu1 %v2963_v26  ;;  %v2936_v1 = vld [vmem:[#allocation5 + $0x218] sm:$0xff]  ;;  %v2951_v26 = vld [vmem:[#allocation5 + $0x290] sm:$0xff] }
 0x27f   :  { %4431 = vmatpush3.msra.mxu1 %v2947_v29  ;;  %3232 = vmatprep.mubr.f32.mxu0 %v6437_v18  ;;  %v2526_v60 = vpop.permute.xlu1 %2525  ;;  %v2935_v29 = vld [vmem:[#allocation5 + $0x210] sm:$0xff] }
 0x280   :  { %v2527_v49 = vsel %vm2346_vm2, %v2524_v10, %v2526_v60  ;;  %v2528_v8 = vsel %vm2346_vm2, %v2526_v60, %v2524_v10  ;;  %2857 = vmatmul.mubr.f32.gmra.mxu1 %v6339_v7  ;;  %4432 = vmatprep.subr.mxu1 %v2962_v28  ;;  %v2950_v28 = vld [vmem:[#allocation5 + $0x288] sm:$0xff]  ;;  %v2949_v60 = vld [vmem:[#allocation5 + $0x280] sm:$0xff] }
 0x281   :  { %v2529_v45 = vmax.f32 %v6257_v48, %v2527_v49  ;;  %v2530_v30 = vmax.f32 %v6261_v19, %v2528_v8  ;;  %3233 = vmatmul.mubr.f32.gmra.mxu0 %v6435_v50  ;;  %2861 = vmatprep.mubr.f32.mxu1 %v6353_v55  ;;  %v2943_v48 = vld [vmem:[#allocation5 + $0x250] sm:$0xff]  ;;  %v2934_v10 = vld [vmem:[#allocation5 + $0x208] sm:$0xff]  ;;  %v3320_v49 = vld [vmem:[#allocation5 + $0x4f8] sm:$0xff] }
 0x282   :  { %4433 = vmatpush3.msra.mxu1 %v2946_v4  ;;  %v2933_v4 = vld [vmem:[#allocation5 + $0x200] sm:$0xff]  ;;  %v3304_v8 = vld [vmem:[#allocation5 + $0x478] sm:$0xff] }
 0x283   :  { %v2531_v40 = vadd.f32 %v2529_v45, %v6299_v6  ;;  %4434 = vmatprep.subr.mxu1 %v2961_v32  ;;  %v2532_v37 = vadd.f32 %v2530_v30, %v6301_v41  ;;  %v3319_v32 = vld [vmem:[#allocation5 + $0x4f0] sm:$0xff]  ;;  %v3318_v30 = vld [vmem:[#allocation5 + $0x4e8] sm:$0xff] }
 0x284   :  { %4435 = vmatpush3.msra.mxu1 %v2945_v20  ;;  %v3303_v45 = vld [vmem:[#allocation5 + $0x470] sm:$0xff]  ;;  %v3302_v20 = vld [vmem:[#allocation5 + $0x468] sm:$0xff] }
 0x285   :  { %v6452_v23 = vmax.f32 %v2531_v40, 0.0  ;;  %2862 = vmatmul.mubr.f32.gmra.mxu1 %v6351_v46  ;;  %4436 = vmatprep.subr.mxu1 %v2960_v63  ;;  %v6455_v19 = vmax.f32 %v2532_v37, 0.0  ;;  %v2544_v57 = vpop.permute.xlu0 %2543  ;;  %v3317_v63 = vld [vmem:[#allocation5 + $0x4e0] sm:$0xff]  ;;  %v3316_v40 = vld [vmem:[#allocation5 + $0x4d8] sm:$0xff]  ;;  %v3314_v37 = vld [vmem:[#allocation5 + $0x4c8] sm:$0xff] }
 0x286   :  { %2866 = vmatprep.mubr.f32.mxu1 %v6369_v33  ;;  %4437 = vmatpush3.msra.mxu1 %v2944_v56  ;;  %v3315_v56 = vld [vmem:[#allocation5 + $0x4d0] sm:$0xff] }
 0x287   :  { %4438 = vmatprep.subr.mxu1 %v2959_v27  ;;  %3237 = vmatprep.mubr.f32.mxu0 %v6455_v19  ;;  %v2546_v44 = vpop.permute.xlu1 %2545  ;;  %v3313_v27 = vld [vmem:[#allocation5 + $0x4c0] sm:$0xff] }
 0x288   :  { %4439 = vmatpush3.msra.mxu1 %v2943_v48  ;;  %v2547_v47 = vsel %vm2346_vm2, %v2544_v57, %v2546_v44  ;;  %v2548_v0 = vsel %vm2346_vm2, %v2546_v44, %v2544_v57  ;;  %3238 = vmatmul.mubr.f32.gmra.mxu0 %v6452_v23  ;;  %v3297_v48 = vld [vmem:[#allocation5 + $0x440] sm:$0xff]  ;;  %v3296_v57 = vld [vmem:[#allocation5 + $0x438] sm:$0xff]  ;;  %v3311_v44 = vld [vmem:[#allocation5 + $0x4b0] sm:$0xff] }
 0x289   :  { %v2549_v51 = vmax.f32 %v6273_v5, %v2547_v47  ;;  %v2550_v42 = vmax.f32 %v6277_v12, %v2548_v0  ;;  %2867 = vmatmul.mubr.f32.gmra.mxu1 %v6367_v3  ;;  %4440 = vmatprep.subr.mxu1 %v2958_v62  ;;  %v2955_v5 = vld [vmem:[#allocation5 + $0x2b0] sm:$0xff]  ;;  %v3312_v62 = vld [vmem:[#allocation5 + $0x4b8] sm:$0xff]  ;;  %v3310_v47 = vld [vmem:[#allocation5 + $0x4a8] sm:$0xff] }
 0x28a   :  { %2871 = vmatprep.mubr.f32.mxu1 %v6385_v13  ;;  %4441 = vmatpush3.msra.mxu1 %v2942_v2  ;;  %v3295_v2 = vld [vmem:[#allocation5 + $0x430] sm:$0xff]  ;;  %v3294_v0 = vld [vmem:[#allocation5 + $0x428] sm:$0xff] }
 0x28b   :  { %v6469_v35 = vadd.f32 %v2549_v51, %v6299_v6  ;;  %4442 = vmatprep.subr.mxu1 %v2957_v54  ;;  %v6472_v17 = vadd.f32 %v2550_v42, %v6301_v41  ;;  %v3309_v54 = vld [vmem:[#allocation5 + $0x4a0] sm:$0xff]  ;;  %v3308_v42 = vld [vmem:[#allocation5 + $0x498] sm:$0xff] }
 0x28c   :  { %4443 = vmatpush3.msra.mxu1 %v2941_v21  ;;  %v3293_v51 = vld [vmem:[#allocation5 + $0x420] sm:$0xff]  ;;  %v3292_v21 = vld [vmem:[#allocation5 + $0x418] sm:$0xff] }
 0x28d   :  { %v2553_v12 = vmax.f32 %v6469_v35, 0.0  ;;  %2872 = vmatmul.mubr.f32.gmra.mxu1 %v6383_v31  ;;  %4444 = vmatprep.subr.mxu1 %v2956_v34  ;;  %v2554_v14 = vmax.f32 %v6472_v17, 0.0  ;;  %v3307_v34 = vld [vmem:[#allocation5 + $0x490] sm:$0xff] }
 0x28e   :  { %2876 = vmatprep.mubr.f32.mxu1 %v6401_v9  ;;  %4445 = vmatpush3.msra.mxu1 %v2940_v16  ;;  %v3291_v16 = vld [vmem:[#allocation5 + $0x410] sm:$0xff] }
 0x28f   :  { %4446 = vmatprep.subr.mxu1 %v2955_v5  ;;  %3242 = vmatprep.mubr.f32.mxu0 %v2554_v14  ;;  %v3306_v5 = vld [vmem:[#allocation5 + $0x488] sm:$0xff] }
 0x290   :  { %4447 = vmatpush3.msra.mxu1 %v2939_v59  ;;  %3243 = vmatmul.mubr.f32.gmra.mxu0 %v2553_v12  ;;  %v3290_v59 = vld [vmem:[#allocation5 + $0x408] sm:$0xff] }
 0x291   :  { %2877 = vmatmul.mubr.f32.gmra.mxu1 %v6399_v61  ;;  %4448 = vmatprep.subr.mxu1 %v2954_v52  ;;  %v3305_v52 = vld [vmem:[#allocation5 + $0x480] sm:$0xff] }
 0x292   :  { %2881 = vmatprep.mubr.f32.mxu1 %v6417_v43  ;;  %4449 = vmatpush3.msra.mxu1 %v2938_v36  ;;  %v3289_v36 = vld [vmem:[#allocation5 + $0x400] sm:$0xff] }
 0x293   :  { %4450 = vmatprep.subr.mxu1 %v2953_v22  ;;  %v2566_v22 = vpop.permute.xlu1 %2565  ;;  %4730 = vmatprep.mubr.msk.f32.mxu0 %vm5016_vm3, %v6833_v15 }
 0x294   :  { %4451 = vmatpush3.msra.mxu1 %v2937_v39  ;;  %v2564_v39 = vpop.permute.xlu0 %2563 }
 0x295   :  { %2882 = vmatmul.mubr.f32.gmra.mxu1 %v6415_v25  ;;  %4452 = vmatprep.subr.mxu1 %v2952_v38 }
 0x296   :  { %2886 = vmatprep.mubr.f32.mxu1 %v6437_v18  ;;  %4453 = vmatpush3.msra.mxu1 %v2936_v1 }
 0x297   :  { %4454 = vmatprep.subr.mxu1 %v2951_v26  ;;  %v3487_v26 = vld [vmem:[#allocation7 + $0x78] sm:$0xff] }
 0x298   :  { %4455 = vmatpush3.msra.mxu1 %v2935_v29  ;;  %v3486_v29 = vld [vmem:[#allocation7 + $0x70] sm:$0xff]  ;;  %4699 = vmatpush3.msra.mxu0 %v3487_v26 }
 0x299   :  { %2887 = vmatmul.mubr.f32.gmra.mxu1 %v6435_v50  ;;  %4456 = vmatprep.subr.mxu1 %v2950_v28 }
 0x29a   :  { %4457 = vmatpush3.msra.mxu1 %v2934_v10  ;;  %3029 = vmatprep.mubr.f32.mxu1 %v6337_v58  ;;  %v3301_v58 = vld [vmem:[#allocation5 + $0x460] sm:$0xff]  ;;  %v3583_v10 = vld [vmem:[#allocation7 + $0xf8] sm:$0xff] }
 0x29b   :  { %4458 = vmatprep.subr.mxu1 %v2949_v60  ;;  %4700 = vmatprep.subr.mxu0 %v6833_v15  ;;  %v3485_v60 = vld [vmem:[#allocation7 + $0x68] sm:$0xff] }
 0x29c   :  { %4459 = vmatpush3.msra.mxu1 %v2933_v4  ;;  %v3582_v4 = vld [vmem:[#allocation7 + $0xf0] sm:$0xff]  ;;  %4701 = vmatpush3.msra.mxu0 %v3486_v29 }
 0x29d   :  { %3030 = vmatmul.mubr.f32.vlgmr.msra.gmra.mxu1 %v6339_v7  ;;  %4540 = vmatprep.subr.mxu1 %v3320_v49  ;;  %v3300_v7 = vld [vmem:[#allocation5 + $0x458] sm:$0xff]  ;;  %v3581_v49 = vld [vmem:[#allocation7 + $0xe8] sm:$0xff] }
 0x29e   :  { %3034 = vmatprep.mubr.f32.mxu1 %v6353_v55  ;;  %4541 = vmatpush3.msra.mxu1 %v3304_v8  ;;  %v3299_v55 = vld [vmem:[#allocation5 + $0x450] sm:$0xff]  ;;  %v3484_v8 = vld [vmem:[#allocation7 + $0x60] sm:$0xff] }
 0x29f   :  { %4542 = vmatprep.subr.mxu1 %v3319_v32  ;;  %4702 = vmatprep.subr.mxu0 %v6833_v15  ;;  %v3580_v32 = vld [vmem:[#allocation7 + $0xe0] sm:$0xff] }
 0x2a0   :  { %4543 = vmatpush3.msra.mxu1 %v3303_v45  ;;  %4703 = vmatpush3.msra.mxu0 %v3485_v60 }
 0x2a1   :  { %3035 = vmatmul.mubr.f32.gmra.mxu1 %v6351_v46  ;;  %4544 = vmatprep.subr.mxu1 %v3318_v30  ;;  %v3298_v46 = vld [vmem:[#allocation5 + $0x448] sm:$0xff]  ;;  %v3483_v30 = vld [vmem:[#allocation7 + $0x58] sm:$0xff] }
 0x2a2   :  { %3039 = vmatprep.mubr.f32.mxu1 %v6369_v33  ;;  %4545 = vmatpush3.msra.mxu1 %v3302_v20  ;;  %v3579_v20 = vld [vmem:[#allocation7 + $0xd8] sm:$0xff] }
 0x2a3   :  { %4546 = vmatprep.subr.mxu1 %v3317_v63  ;;  %4704 = vmatprep.subr.mxu0 %v6833_v15 }
 0x2a4   :  { %4547 = vmatpush3.msra.mxu1 %v3301_v58  ;;  %4705 = vmatpush3.msra.mxu0 %v3484_v8  ;;  %v3482_v58 = vld [vmem:[#allocation7 + $0x50] sm:$0xff] }
 0x2a5   :  { %3040 = vmatmul.mubr.f32.gmra.mxu1 %v6367_v3  ;;  %4548 = vmatprep.subr.mxu1 %v3316_v40 }
 0x2a6   :  { %3044 = vmatprep.mubr.f32.mxu1 %v6385_v13  ;;  %4549 = vmatpush3.msra.mxu1 %v3300_v7  ;;  %v3578_v7 = vld [vmem:[#allocation7 + $0xd0] sm:$0xff] }
 0x2a7   :  { %4550 = vmatprep.subr.mxu1 %v3315_v56  ;;  %4706 = vmatprep.subr.mxu0 %v6833_v15  ;;  %v3481_v56 = vld [vmem:[#allocation7 + $0x48] sm:$0xff] }
 0x2a8   :  { %4551 = vmatpush3.msra.mxu1 %v3299_v55  ;;  %4707 = vmatpush3.msra.mxu0 %v3483_v30  ;;  %v3577_v55 = vld [vmem:[#allocation7 + $0xc8] sm:$0xff] }
 0x2a9   :  { %3045 = vmatmul.mubr.f32.gmra.mxu1 %v6383_v31  ;;  %4552 = vmatprep.subr.mxu1 %v3314_v37  ;;  %v3480_v37 = vld [vmem:[#allocation7 + $0x40] sm:$0xff] }
 0x2aa   :  { %3049 = vmatprep.mubr.f32.mxu1 %v6401_v9  ;;  %4553 = vmatpush3.msra.mxu1 %v3298_v46  ;;  %v3576_v46 = vld [vmem:[#allocation7 + $0xc0] sm:$0xff] }
 0x2ab   :  { %4554 = vmatprep.subr.mxu1 %v3313_v27  ;;  %4708 = vmatprep.subr.mxu0 %v6833_v15 }
 0x2ac   :  { %4555 = vmatpush3.msra.mxu1 %v3297_v48  ;;  %4709 = vmatpush3.msra.mxu0 %v3482_v58  ;;  %v3479_v48 = vld [vmem:[#allocation7 + $0x38] sm:$0xff] }
 0x2ad   :  { %3050 = vmatmul.mubr.f32.gmra.mxu1 %v6399_v61  ;;  %4556 = vmatprep.subr.mxu1 %v3312_v62  ;;  %v3575_v62 = vld [vmem:[#allocation7 + $0xb8] sm:$0xff] }
 0x2ae   :  { %3054 = vmatprep.mubr.f32.mxu1 %v6417_v43  ;;  %4557 = vmatpush3.msra.mxu1 %v3296_v57 }
 0x2af   :  { %4558 = vmatprep.subr.mxu1 %v3311_v44  ;;  %4710 = vmatprep.subr.mxu0 %v6833_v15  ;;  %v3478_v44 = vld [vmem:[#allocation7 + $0x30] sm:$0xff] }
 0x2b0   :  { %4559 = vmatpush3.msra.mxu1 %v3295_v2  ;;  %4711 = vmatpush3.msra.mxu0 %v3481_v56 }
 0x2b1   :  { %3055 = vmatmul.mubr.f32.gmra.mxu1 %v6415_v25  ;;  %4560 = vmatprep.subr.mxu1 %v3310_v47  ;;  %v3477_v47 = vld [vmem:[#allocation7 + $0x28] sm:$0xff] }
 0x2b2   :  { %3059 = vmatprep.mubr.f32.mxu1 %v6437_v18  ;;  %4561 = vmatpush3.msra.mxu1 %v3294_v0  ;;  %v3476_v0 = vld [vmem:[#allocation7 + $0x20] sm:$0xff] }
 0x2b3   :  { %4562 = vmatprep.subr.mxu1 %v3309_v54  ;;  %4712 = vmatprep.subr.mxu0 %v6833_v15 }
 0x2b4   :  { %4563 = vmatpush3.msra.mxu1 %v3293_v51  ;;  %4713 = vmatpush3.msra.mxu0 %v3480_v37  ;;  %v3475_v51 = vld [vmem:[#allocation7 + $0x18] sm:$0xff] }
 0x2b5   :  { %3060 = vmatmul.mubr.f32.gmra.mxu1 %v6435_v50  ;;  %4564 = vmatprep.subr.mxu1 %v3308_v42 }
 0x2b6   :  { %3064 = vmatprep.mubr.f32.mxu1 %v6455_v19  ;;  %4565 = vmatpush3.msra.mxu1 %v3292_v21 }
 0x2b7   :  { %4566 = vmatprep.subr.mxu1 %v3307_v34  ;;  %4714 = vmatprep.subr.mxu0 %v6833_v15 }
 0x2b8   :  { %4567 = vmatpush3.msra.mxu1 %v3291_v16  ;;  %4715 = vmatpush3.msra.mxu0 %v3479_v48 }
 0x2b9   :  { %3065 = vmatmul.mubr.f32.gmra.mxu1 %v6452_v23  ;;  %4568 = vmatprep.subr.mxu1 %v3306_v5 }
 0x2ba   :  { %4569 = vmatpush3.msra.mxu1 %v3290_v59  ;;  %3385 = vmatprep.mubr.f32.mxu1 %v6369_v33  ;;  %v2568_v33 = vsel %vm2346_vm2, %v2566_v22, %v2564_v39 }
 0x2bb   :  { %4570 = vmatprep.subr.mxu1 %v3305_v52  ;;  %4716 = vmatprep.subr.mxu0 %v6833_v15 }
 0x2bc   :  { %4571 = vmatpush3.msra.mxu1 %v3289_v36  ;;  %4717 = vmatpush3.msra.mxu0 %v3478_v44  ;;  %v3574_v44 = vld [vmem:[#allocation7 + $0xb0] sm:$0xff] }
 0x2bd   :  { %3386 = vmatmul.mubr.f32.vlgmr.msra.gmra.mxu1 %v6367_v3  ;;  %4733 = vmatprep.subr.mxu1 %v6833_v15  ;;  %v2567_v3 = vsel %vm2346_vm2, %v2564_v39, %v2566_v22 }
 0x2be   :  { %3390 = vmatprep.mubr.f32.mxu1 %v6385_v13  ;;  %v2569_v13 = vmax.f32 %v6285_v11, %v2567_v3  ;;  %4734 = vmatpush3.msra.mxu1 %v3583_v10 }
 0x2bf   :  { %4735 = vmatprep.subr.mxu1 %v6833_v15  ;;  %4718 = vmatprep.subr.mxu0 %v6833_v15 }
 0x2c0   :  { %4736 = vmatpush3.msra.mxu1 %v3582_v4  ;;  %4719 = vmatpush3.msra.mxu0 %v3477_v47 }
 0x2c1   :  { %3391 = vmatmul.mubr.f32.gmra.mxu1 %v6383_v31  ;;  %v2570_v31 = vmax.f32 %v6287_v24, %v2568_v33  ;;  %4737 = vmatprep.subr.mxu1 %v6833_v15 }
 0x2c2   :  { %3395 = vmatprep.mubr.f32.mxu1 %v6401_v9  ;;  %v2571_v9 = vadd.f32 %v2569_v13, %v6299_v6  ;;  %4738 = vmatpush3.msra.mxu1 %v3581_v49 }
 0x2c3   :  { %4739 = vmatprep.subr.mxu1 %v6833_v15  ;;  %4720 = vmatprep.subr.mxu0 %v6833_v15 }
 0x2c4   :  { %v2573_v24 = vmax.f32 %v2571_v9, 0.0  ;;  %4740 = vmatpush3.msra.mxu1 %v3580_v32  ;;  %4721 = vmatpush3.msra.mxu0 %v3476_v0  ;;  %v3473_v0 = vld [vmem:[#allocation7 + $0x8] sm:$0xff] }
 0x2c5   :  { %3396 = vmatmul.mubr.f32.gmra.mxu1 %v6399_v61  ;;  %v2572_v61 = vadd.f32 %v2570_v31, %v6301_v41  ;;  %4741 = vmatprep.subr.mxu1 %v6833_v15 }
 0x2c6   :  { %3400 = vmatprep.mubr.f32.mxu1 %v6417_v43  ;;  %4742 = vmatpush3.msra.mxu1 %v3579_v20 }
 0x2c7   :  { %4743 = vmatprep.subr.mxu1 %v6833_v15  ;;  %4722 = vmatprep.subr.mxu0 %v6833_v15 }
 0x2c8   :  { %4744 = vmatpush3.msra.mxu1 %v3578_v7  ;;  %4723 = vmatpush3.msra.mxu0 %v3475_v51 }
 0x2c9   :  { %3401 = vmatmul.mubr.f32.gmra.mxu1 %v6415_v25  ;;  %v2574_v25 = vmax.f32 %v2572_v61, 0.0  ;;  %4745 = vmatprep.subr.mxu1 %v6833_v15 }
 0x2ca   :  { %3405 = vmatprep.mubr.f32.mxu1 %v6437_v18  ;;  %4746 = vmatpush3.msra.mxu1 %v3577_v55 }
 0x2cb   :  { %4747 = vmatprep.subr.mxu1 %v6833_v15  ;;  %4724 = vmatprep.subr.mxu0 %v6833_v15 }
 0x2cc   :  { %4748 = vmatpush3.msra.mxu1 %v3576_v46 }
 0x2cd   :  { %3406 = vmatmul.mubr.f32.gmra.mxu1 %v6435_v50  ;;  %4749 = vmatprep.subr.mxu1 %v6833_v15 }
 0x2ce   :  { %3410 = vmatprep.mubr.f32.mxu1 %v6455_v19  ;;  %4750 = vmatpush3.msra.mxu1 %v3575_v62 }
 0x2cf   :  { %4751 = vmatprep.subr.mxu1 %v6833_v15 }
 0x2d0   :  { %4752 = vmatpush3.msra.mxu1 %v3574_v44 }
 0x2d1   :  { %3411 = vmatmul.mubr.f32.gmra.mxu1 %v6452_v23  ;;  %4753 = vmatprep.subr.mxu1 %v6833_v15 }
 0x2d2   :  { %3415 = vmatprep.mubr.f32.mxu1 %v2554_v14 }
 0x2d5   :  { %3416 = vmatmul.mubr.f32.gmra.mxu1 %v2553_v12 }
 0x2d6   :  { %3420 = vmatprep.mubr.f32.mxu1 %v2574_v25 }
 0x2d9   :  { %3421 = vmatmul.mubr.f32.gmra.mxu1 %v2573_v24 }
 0x2da   :  { %4765 = vmatprep.mubr.msk.f32.mxu1 %vm5016_vm3, %v6833_v15 }
 0x302   :  { %v4348_v43 = vpop.f32.mrf.mxu1 }
 0x304   :  { %v4349_v50 = vpop.f32.mrf.mxu1 }
 0x305   :  { %v6528_v18 = vadd.f32 %v4349_v50, %v4348_v43 }
 0x30a   :  { %v4351_v11 = vpop.f32.mrf.mxu1 }
 0x30c   :  { %v4352_v41 = vpop.f32.mrf.mxu1 }
 0x30d   :  { %v6530_v19 = vadd.f32 %v4352_v41, %v4351_v11 }
 0x310   :  { %v4354_v23 = vpop.f32.mrf.mxu1 }
 0x312   :  { %v4355_v17 = vpop.f32.mrf.mxu1 }
 0x313   :  { %v6532_v14 = vadd.f32 %v4355_v17, %v4354_v23 }
 0x318   :  { %v4357_v6 = vpop.f32.mrf.mxu1  ;;  %v4516_v10 = vpop.f32.mrf.mxu0 }
 0x31a   :  { %v4358_v38 = vpop.f32.mrf.mxu1  ;;  %v4517_v4 = vpop.f32.mrf.mxu0 }
 0x31b   :  { %v6534_v1 = vadd.f32 %v4358_v38, %v4357_v6 }
 0x320   :  { %v4360_v35 = vpop.f32.mrf.mxu1  ;;  %v4519_v8 = vpop.f32.mrf.mxu0 }
 0x322   :  { %v4361_v12 = vpop.f32.mrf.mxu1  ;;  %v4520_v30 = vpop.f32.mrf.mxu0 }
 0x323   :  { %v6536_v28 = vadd.f32 %v4361_v12, %v4360_v35 }
 0x328   :  { %v4363_v45 = vpop.f32.mrf.mxu1 }
 0x32a   :  { %v4364_v63 = vpop.f32.mrf.mxu1 }
 0x32b   :  { %v6545_v40 = vadd.f32 %v4364_v63, %v4363_v45  ;;  %v6593_v63 = vpop.f32.mrf.mxu0 }
 0x32d   :  { %v6599_v56 = vpop.f32.mrf.mxu0 }
 0x330   :  { %v4366_v27 = vpop.f32.mrf.mxu1  ;;  %v6603_v46 = vpop.f32.mrf.mxu0 }
 0x332   :  { %v4367_v57 = vpop.f32.mrf.mxu1  ;;  %v4526_v51 = vpop.f32.mrf.mxu0 }
 0x333   :  { %v4368_v2 = vadd.f32 %v4367_v57, %v4366_v27  ;;  %v3474_v57 = vld [vmem:[#allocation7 + $0x10] sm:$0xff] }
 0x334   :  { %4725 = vmatpush3.msra.mxu0 %v3474_v57 }
 0x335   :  { %4726 = vmatprep.subr.mxu0 %v6833_v15 }
 0x336   :  { %4727 = vmatpush3.msra.mxu0 %v3473_v0 }
 0x337   :  { %4728 = vmatprep.subr.mxu0 %v6833_v15 }
 0x338   :  { %v4369_v54 = vpop.f32.mrf.mxu1 }
 0x33a   :  { %v4370_v42 = vpop.f32.mrf.mxu1 }
 0x33b   :  { %v6561_v21 = vadd.f32 %v4370_v42, %v4369_v54  ;;  %v3573_v54 = vld [vmem:[#allocation7 + $0xa8] sm:$0xff] }
 0x33c   :  { %v4404_v34 = vpop.f32.mrf.mxu1  ;;  %4754 = vmatpush3.msra.mxu1 %v3573_v54 }
 0x33d   :  { %4755 = vmatprep.subr.mxu1 %v6833_v15 }
 0x33e   :  { %v4405_v16 = vpop.f32.mrf.mxu1 }
 0x33f   :  { %v4406_v5 = vadd.f32 %v4405_v16, %v4404_v34 }
 0x340   :  { %v4407_v59 = vpop.f32.mrf.mxu1 }
 0x341   :  { %v2900_v52 = vadd.f32 %v4406_v5, %v6528_v18  ;;  %v3472_v5 = vld [vmem:[#allocation7] sm:$0xff] }
 0x342   :  { %v4408_v36 = vpop.f32.mrf.mxu1  ;;  %4729 = vmatpush3.msra.mxu0 %v3472_v5 }
 0x343   :  { %v4409_v37 = vadd.f32 %v4408_v36, %v4407_v59  ;;  %v3572_v59 = vld [vmem:[#allocation7 + $0xa0] sm:$0xff]  ;;  %v4518_v36 = vadd.f32 %v4517_v4, %v4516_v10  ;;  %4768 = vmatprep.subr.mxu0 %v6833_v15 }
 0x344   :  { %4756 = vmatpush3.msra.mxu1 %v3572_v59 }
 0x345   :  { %v4410_v22 = vpop.f32.mrf.mxu1  ;;  %v2901_v47 = vadd.f32 %v4409_v37, %v6530_v19  ;;  %v6612_v19 = vpop.f32.mrf.mxu0  ;;  %4757 = vmatprep.subr.mxu1 %v6833_v15 }
 0x347   :  { %v4411_v39 = vpop.f32.mrf.mxu1 }
 0x348   :  { %v4412_v33 = vadd.f32 %v4411_v39, %v4410_v22  ;;  %v4521_v39 = vadd.f32 %v4520_v30, %v4519_v8  ;;  %v4524_v30 = vadd.f32 %v6599_v56, %v6593_v63 }
 0x349   :  { %v6565_v3 = vpop.f32.mrf.mxu1 }
 0x34a   :  { %v6568_v31 = vadd.f32 %v4412_v33, %v6532_v14 }
 0x34b   :  { %v6570_v13 = vpop.f32.mrf.mxu1 }
 0x34d   :  { %v4416_v61 = vpop.f32.mrf.mxu1 }
 0x34f   :  { %v4417_v9 = vpop.f32.mrf.mxu1 }
 0x350   :  { %v4418_v25 = vadd.f32 %v4417_v9, %v4416_v61  ;;  %v3571_v61 = vld [vmem:[#allocation7 + $0x98] sm:$0xff] }
 0x351   :  { %v6572_v24 = vpop.f32.mrf.mxu1  ;;  %4758 = vmatpush3.msra.mxu1 %v3571_v61 }
 0x352   :  { %v6575_v43 = vadd.f32 %v4418_v25, %v6536_v28  ;;  %4759 = vmatprep.subr.mxu1 %v6833_v15 }
 0x353   :  { %v6577_v50 = vpop.f32.mrf.mxu1 }
 0x355   :  { %v4422_v18 = vpop.f32.mrf.mxu1 }
 0x357   :  { %v4423_v11 = vpop.f32.mrf.mxu1 }
 0x358   :  { %v4424_v41 = vadd.f32 %v4423_v11, %v4422_v18 }
 0x359   :  { %v6579_v23 = vpop.f32.mrf.mxu1 }
 0x35a   :  { %v6581_v17 = vadd.f32 %v4424_v41, %v4368_v2 }
 0x35b   :  { %v6583_v14 = vpop.f32.mrf.mxu1 }
 0x35d   :  { %v4460_v6 = vpop.f32.mrf.mxu1 }
 0x35f   :  { %v4461_v38 = vpop.f32.mrf.mxu1 }
 0x360   :  { %v4462_v27 = vadd.f32 %v4461_v38, %v4460_v6  ;;  %v3570_v38 = vld [vmem:[#allocation7 + $0x90] sm:$0xff] }
 0x361   :  { %v4463_v35 = vpop.f32.mrf.mxu1  ;;  %4760 = vmatpush3.msra.mxu1 %v3570_v38 }
 0x362   :  { %v3078_v42 = vadd.f32 %v4462_v27, %v2900_v52  ;;  %v4415_v52 = vadd.f32 %v6570_v13, %v6565_v3  ;;  %v4529_v3 = vpop.f32.mrf.mxu0  ;;  %4761 = vmatprep.subr.mxu1 %v6833_v15  ;;  %v4527_v27 = vadd.f32 %v4526_v51, %v6603_v46 }
 0x363   :  { %v4464_v12 = vpop.f32.mrf.mxu1 }
 0x364   :  { %v4465_v62 = vadd.f32 %v4464_v12, %v4463_v35  ;;  %v3256_v25 = vadd.f32 %v4518_v36, %v3078_v42  ;;  %v2903_v35 = vadd.f32 %v4415_v52, %v6534_v1  ;;  %v3568_v1 = vld [vmem:[#allocation7 + $0x80] sm:$0xff] }
 0x365   :  { %v4466_v26 = vpop.f32.mrf.mxu1 }
 0x366   :  { %v3079_v16 = vadd.f32 %v4465_v62, %v2901_v47  ;;  %v4421_v62 = vadd.f32 %v6577_v50, %v6572_v24 }
 0x367   :  { %v4467_v29 = vpop.f32.mrf.mxu1 }
 0x368   :  { %v4468_v9 = vadd.f32 %v4467_v29, %v4466_v26  ;;  %v3257_v41 = vadd.f32 %v4521_v39, %v3079_v16  ;;  %v4531_v29 = vpop.f32.mrf.mxu0  ;;  %v2905_v0 = vadd.f32 %v4421_v62, %v6545_v40 }
 0x369   :  { %v4469_v28 = vpop.f32.mrf.mxu1 }
 0x36b   :  { %v4470_v60 = vpop.f32.mrf.mxu1 }
 0x36c   :  { %v4471_v11 = vadd.f32 %v4470_v60, %v4469_v28  ;;  %v3569_v28 = vld [vmem:[#allocation7 + $0x88] sm:$0xff]  ;;  %v3080_v60 = vadd.f32 %v4468_v9, %v6568_v31  ;;  %v4532_v31 = vpop.f32.mrf.mxu0 }
 0x36d   :  { %v6585_v49 = vpop.f32.mrf.mxu1  ;;  %4762 = vmatpush3.msra.mxu1 %v3569_v28  ;;  %v4533_v36 = vadd.f32 %v4532_v31, %v4531_v29  ;;  %v3675_v31 = vld [vmem:[#allocation7 + $0x158] sm:$0xff] }
 0x36e   :  { %v3081_v4 = vadd.f32 %v4471_v11, %v2903_v35  ;;  %4763 = vmatprep.subr.mxu1 %v6833_v15  ;;  %v3258_v46 = vadd.f32 %v4524_v30, %v3080_v60  ;;  %v4534_v24 = vpop.f32.mrf.mxu0  ;;  %v3678_v30 = vld [vmem:[#allocation7 + $0x170] sm:$0xff] }
 0x36f   :  { %v6587_v32 = vpop.f32.mrf.mxu1  ;;  %4764 = vmatpush3.msra.mxu1 %v3568_v1 }
 0x370   :  { %v4474_v44 = vadd.f32 %v6587_v32, %v6585_v49  ;;  %4803 = vmatprep.subr.mxu1 %v6833_v15  ;;  %v4530_v32 = vadd.f32 %v4529_v3, %v6612_v19  ;;  %v4535_v5 = vpop.f32.mrf.mxu0 }
 0x371   :  { %v6589_v45 = vpop.f32.mrf.mxu1 }
 0x372   :  { %v3082_v42 = vadd.f32 %v4474_v44, %v6575_v43  ;;  %v3775_v44 = vld [vmem:[#allocation7 + $0x1f8] sm:$0xff] }
 0x373   :  { %v6591_v20 = vpop.f32.mrf.mxu1 }
 0x374   :  { %v4477_v56 = vadd.f32 %v6591_v20, %v6589_v45  ;;  %v4427_v45 = vadd.f32 %v6583_v14, %v6579_v23  ;;  %v3260_v40 = vadd.f32 %v4530_v32, %v3082_v42  ;;  %v3669_v42 = vld [vmem:[#allocation7 + $0x128] sm:$0xff]  ;;  %v3768_v32 = vld [vmem:[#allocation7 + $0x1c0] sm:$0xff] }
 0x375   :  { %v6595_v58 = vpop.f32.mrf.mxu1 }
 0x376   :  { %v3083_v16 = vadd.f32 %v4477_v56, %v2905_v0  ;;  %v2907_v9 = vadd.f32 %v4427_v45, %v6561_v21  ;;  %v3774_v56 = vld [vmem:[#allocation7 + $0x1f0] sm:$0xff]  ;;  %v3771_v0 = vld [vmem:[#allocation7 + $0x1d8] sm:$0xff] }
 0x377   :  { %v6597_v7 = vpop.f32.mrf.mxu1  ;;  %v3666_v45 = vld [vmem:[#allocation7 + $0x110] sm:$0xff] }
 0x378   :  { %v4480_v43 = vadd.f32 %v6597_v7, %v6595_v58 }
 0x379   :  { %v6601_v55 = vpop.f32.mrf.mxu1 }
 0x37a   :  { %v3084_v11 = vadd.f32 %v4480_v43, %v6581_v17  ;;  %v6664_v17 = vld [vmem:[%s6760_s4] ss:$0 sm:$0xff] }
 0x37b   :  { %v6605_v48 = vpop.f32.mrf.mxu1 }
 0x37c   :  { %v4483_v52 = vadd.f32 %v6605_v48, %v6601_v55 }
 0x37d   :  { %v4572_v2 = vpop.f32.mrf.mxu1 }
 0x37f   :  { %v4573_v34 = vpop.f32.mrf.mxu1 }
 0x380   :  { %v4574_v33 = vadd.f32 %v4573_v34, %v4572_v2  ;;  %v3259_v2 = vadd.f32 %v4527_v27, %v3081_v4  ;;  %v3679_v4 = vld [vmem:[#allocation7 + $0x178] sm:$0xff]  ;;  %v3677_v27 = vld [vmem:[#allocation7 + $0x168] sm:$0xff] }
 0x381   :  { %v4575_v22 = vpop.f32.mrf.mxu1 }
 0x382   :  { %v3434_v12 = vadd.f32 %v4574_v33, %v3256_v25  ;;  %v3261_v33 = vadd.f32 %v4533_v36, %v3083_v16  ;;  %v3767_v36 = vld [vmem:[#allocation7 + $0x1b8] sm:$0xff] }
 0x383   :  { %v4576_v18 = vpop.f32.mrf.mxu1 }
 0x384   :  { %v4577_v6 = vadd.f32 %v4576_v18, %v4575_v22  ;;  %v4537_v22 = vpop.f32.mrf.mxu0 }
 0x385   :  { %v4578_v13 = vpop.f32.mrf.mxu1 }
 0x386   :  { %v3435_v26 = vadd.f32 %v4577_v6, %v3257_v41  ;;  %v4538_v23 = vpop.f32.mrf.mxu0  ;;  %v3085_v41 = vadd.f32 %v4483_v52, %v2907_v9  ;;  %v3664_v52 = vld [vmem:[#allocation7 + $0x100] sm:$0xff]  ;;  %v3763_v9 = vld [vmem:[#allocation7 + $0x198] sm:$0xff] }
 0x387   :  { %v4579_v10 = vpop.f32.mrf.mxu1  ;;  %v4539_v58 = vadd.f32 %v4538_v23, %v4537_v22  ;;  %v3761_v23 = vld [vmem:[#allocation7 + $0x188] sm:$0xff] }
 0x388   :  { %v6626_v8 = vmax.f32 %v3434_v12, %v3435_v26  ;;  %v4580_v57 = vadd.f32 %v4579_v10, %v4578_v13  ;;  %v4536_v13 = vadd.f32 %v4535_v5, %v4534_v24  ;;  %v3772_v24 = vld [vmem:[#allocation7 + $0x1e0] sm:$0xff] }
 0x389   :  { %v4581_v37 = vpop.f32.mrf.mxu1  ;;  %v3263_v38 = vadd.f32 %v4539_v58, %v3085_v41  ;;  %v3863_v41 = vld [vmem:[#allocation9 + $0x78] sm:$0xff] }
 0x38a   :  { %3467 = vrot.lane.b32.xlu0 %v6626_v8, %s5017_s2  ;;  %v3436_v54 = vadd.f32 %v4580_v57, %v3258_v46  ;;  %v3262_v48 = vadd.f32 %v4536_v13, %v3084_v11  ;;  %v3673_v46 = vld [vmem:[#allocation7 + $0x148] sm:$0xff]  ;;  %v3860_v13 = vld [vmem:[#allocation9 + $0x60] sm:$0xff]  ;;  %v3859_v58 = vld [vmem:[#allocation9 + $0x58] sm:$0xff] }
 0x38b   :  { %v4582_v63 = vpop.f32.mrf.mxu1 }
 0x38c   :  { %v4583_v47 = vadd.f32 %v4582_v63, %v4581_v37  ;;  %v3674_v63 = vld [vmem:[#allocation7 + $0x150] sm:$0xff] }
 0x38d   :  { %v4584_v50 = vpop.f32.mrf.mxu1 }
 0x38e   :  { %v3437_v51 = vadd.f32 %v4583_v47, %v3259_v2  ;;  %v3773_v2 = vld [vmem:[#allocation7 + $0x1e8] sm:$0xff]  ;;  %v3672_v47 = vld [vmem:[#allocation7 + $0x140] sm:$0xff] }
 0x38f   :  { %v4585_v34 = vpop.f32.mrf.mxu1 }
 0x390   :  { %v3561_v49 = vmax.f32 %v3436_v54, %v3437_v51  ;;  %v4586_v20 = vadd.f32 %v4585_v34, %v4584_v50  ;;  %v3671_v50 = vld [vmem:[#allocation7 + $0x138] sm:$0xff]  ;;  %v3670_v54 = vld [vmem:[#allocation7 + $0x130] sm:$0xff]  ;;  %v3769_v34 = vld [vmem:[#allocation7 + $0x1c8] sm:$0xff] }
 0x391   :  { %v4587_v59 = vpop.f32.mrf.mxu1  ;;  %v3770_v51 = vld [vmem:[#allocation7 + $0x1d0] sm:$0xff] }
 0x392   :  { %3562 = vrot.lane.b32.xlu1 %v3561_v49, %s5017_s2  ;;  %v3438_v25 = vadd.f32 %v4586_v20, %v3260_v40  ;;  %v3766_v20 = vld [vmem:[#allocation7 + $0x1b0] sm:$0xff]  ;;  %v3665_v40 = vld [vmem:[#allocation7 + $0x108] sm:$0xff] }
 0x393   :  { %v4588_v39 = vpop.f32.mrf.mxu1 }
 0x394   :  { %v4589_v19 = vadd.f32 %v4588_v39, %v4587_v59  ;;  %v3667_v59 = vld [vmem:[#allocation7 + $0x118] sm:$0xff]  ;;  %v3765_v39 = vld [vmem:[#allocation7 + $0x1a8] sm:$0xff] }
 0x395   :  { %v4590_v61 = vpop.f32.mrf.mxu1 }
 0x396   :  { %v3439_v18 = vadd.f32 %v4589_v19, %v3261_v33  ;;  %v3764_v33 = vld [vmem:[#allocation7 + $0x1a0] sm:$0xff] }
 0x397   :  { %v4591_v14 = vpop.f32.mrf.mxu1 }
 0x398   :  { %v6653_v6 = vmax.f32 %v3438_v25, %v3439_v18  ;;  %v4592_v7 = vadd.f32 %v4591_v14, %v4590_v61  ;;  %v3762_v25 = vld [vmem:[#allocation7 + $0x190] sm:$0xff]  ;;  %v3760_v14 = vld [vmem:[#allocation7 + $0x180] sm:$0xff] }
 0x399   :  { %v4593_v3 = vpop.f32.mrf.mxu1 }
 0x39a   :  { %3658 = vrot.lane.b32.xlu0 %v6653_v6, %s5017_s2  ;;  %v3440_v35 = vadd.f32 %v4592_v7, %v3262_v48  ;;  %v3858_v7 = vld [vmem:[#allocation9 + $0x50] sm:$0xff]  ;;  %v3856_v48 = vld [vmem:[#allocation9 + $0x40] sm:$0xff] }
 0x39b   :  { %v4594_v55 = vpop.f32.mrf.mxu1 }
 0x39c   :  { %v4595_v21 = vadd.f32 %v4594_v55, %v4593_v3  ;;  %v3861_v3 = vld [vmem:[#allocation9 + $0x68] sm:$0xff] }
 0x39d   :  { %v3857_v55 = vld [vmem:[#allocation9 + $0x48] sm:$0xff] }
 0x39e   :  { %v3441_v12 = vadd.f32 %v4595_v21, %v3263_v38  ;;  %v3855_v38 = vld [vmem:[#allocation9 + $0x38] sm:$0xff]  ;;  %v3854_v21 = vld [vmem:[#allocation9 + $0x30] sm:$0xff] }
 0x3a0   :  { %v6657_v26 = vmax.f32 %v3440_v35, %v3441_v12  ;;  %v3853_v35 = vld [vmem:[#allocation9 + $0x28] sm:$0xff]  ;;  %v3852_v12 = vld [vmem:[#allocation9 + $0x20] sm:$0xff] }
 0x3a2   :  { %3754 = vrot.lane.b32.xlu1 %v6657_v26, %s5017_s2 }
 0x3fc   :  { %v3468_v29 = vpop.permute.xlu0 %3467 }
 0x3fd   :  { %v3469_v10 = vmax.f32 %v6626_v8, %v3468_v29  ;;  %v3676_v8 = vld [vmem:[#allocation7 + $0x160] sm:$0xff]  ;;  %v3849_v29 = vld [vmem:[#allocation9 + $0x8] sm:$0xff] }
 0x3ff   :  { %v3470_v28 = vadd.f32 %v6664_v17, %v3469_v10  ;;  %v3848_v10 = vld [vmem:[#allocation9] sm:$0xff] }
 0x401   :  { %v3471_v60 = vmax.f32 %v3470_v28, 0.0  ;;  %v3957_v28 = vld [vmem:[#allocation10 + $0x78] sm:$0xff] }
 0x403   :  { %4731 = vmatmul.mubr.f32.vlgmr.msra.gmra.mxu0 %v3471_v60  ;;  %v3956_v60 = vld [vmem:[#allocation10 + $0x70] sm:$0xff] }
 0x404   :  { %4769 = vmatpush3.msra.mxu0 %v3679_v4  ;;  %v3563_v37 = vpop.permute.xlu1 %3562  ;;  %4800 = vmatprep.mubr.msk.f32.mxu0 %vm5016_vm3, %v6833_v15  ;;  %v3955_v4 = vld [vmem:[#allocation10 + $0x68] sm:$0xff] }
 0x405   :  { %4770 = vmatprep.subr.mxu0 %v6833_v15  ;;  %v3564_v1 = vmax.f32 %v3561_v49, %v3563_v37  ;;  %v3668_v49 = vld [vmem:[#allocation7 + $0x120] sm:$0xff]  ;;  %v3953_v37 = vld [vmem:[#allocation10 + $0x58] sm:$0xff] }
 0x406   :  { %4771 = vmatpush3.msra.mxu0 %v3678_v30  ;;  %v3954_v30 = vld [vmem:[#allocation10 + $0x60] sm:$0xff] }
 0x407   :  { %v3565_v62 = vadd.f32 %v6664_v17, %v3564_v1  ;;  %4772 = vmatprep.subr.mxu0 %v6833_v15  ;;  %v3952_v1 = vld [vmem:[#allocation10 + $0x50] sm:$0xff] }
 0x408   :  { %4773 = vmatpush3.msra.mxu0 %v3677_v27  ;;  %v3951_v27 = vld [vmem:[#allocation10 + $0x48] sm:$0xff] }
 0x409   :  { %v3566_v57 = vmax.f32 %v3565_v62, 0.0  ;;  %4774 = vmatprep.subr.mxu0 %v6833_v15  ;;  %v3950_v62 = vld [vmem:[#allocation10 + $0x40] sm:$0xff] }
 0x40a   :  { %4775 = vmatpush3.msra.mxu0 %v3676_v8  ;;  %v3949_v8 = vld [vmem:[#allocation10 + $0x38] sm:$0xff] }
 0x40b   :  { %4776 = vmatprep.subr.mxu0 %v6833_v15  ;;  %4766 = vmatmul.mubr.f32.vlgmr.msra.gmra.mxu1 %v3566_v57  ;;  %v3948_v57 = vld [vmem:[#allocation10 + $0x30] sm:$0xff] }
 0x40c   :  { %4777 = vmatpush3.msra.mxu0 %v3675_v31  ;;  %4804 = vmatpush3.msra.mxu1 %v3775_v44  ;;  %v3659_v16 = vpop.permute.xlu0 %3658  ;;  %v3947_v31 = vld [vmem:[#allocation10 + $0x28] sm:$0xff]  ;;  %v3946_v44 = vld [vmem:[#allocation10 + $0x20] sm:$0xff] }
 0x40d   :  { %4778 = vmatprep.subr.mxu0 %v6833_v15  ;;  %4805 = vmatprep.subr.mxu1 %v6833_v15  ;;  %v3660_v5 = vmax.f32 %v6653_v6, %v3659_v16  ;;  %v3862_v6 = vld [vmem:[#allocation9 + $0x70] sm:$0xff] }
 0x40e   :  { %4779 = vmatpush3.msra.mxu0 %v3674_v63  ;;  %4806 = vmatpush3.msra.mxu1 %v3774_v56  ;;  %v3945_v63 = vld [vmem:[#allocation10 + $0x18] sm:$0xff] }
 0x40f   :  { %4780 = vmatprep.subr.mxu0 %v6833_v15  ;;  %4807 = vmatprep.subr.mxu1 %v6833_v15  ;;  %v3661_v22 = vadd.f32 %v6664_v17, %v3660_v5  ;;  %v3944_v5 = vld [vmem:[#allocation10 + $0x10] sm:$0xff] }
 0x410   :  { %4781 = vmatpush3.msra.mxu0 %v3673_v46  ;;  %4808 = vmatpush3.msra.mxu1 %v3773_v2 }
 0x411   :  { %4782 = vmatprep.subr.mxu0 %v6833_v15  ;;  %4809 = vmatprep.subr.mxu1 %v6833_v15  ;;  %v3662_v19 = vmax.f32 %v3661_v22, 0.0 }
 0x412   :  { %4783 = vmatpush3.msra.mxu0 %v3672_v47  ;;  %4810 = vmatpush3.msra.mxu1 %v3772_v24  ;;  %v4313_v24 = vld [vmem:[%s6762_s6] ss:$0 sm:$0xff] }
 0x413   :  { %4784 = vmatprep.subr.mxu0 %v6833_v15  ;;  %4811 = vmatprep.subr.mxu1 %v6833_v15 }
 0x414   :  { %4785 = vmatpush3.msra.mxu0 %v3671_v50  ;;  %4812 = vmatpush3.msra.mxu1 %v3771_v0  ;;  %v3755_v43 = vpop.permute.xlu1 %3754 }
 0x415   :  { %4786 = vmatprep.subr.mxu0 %v6833_v15  ;;  %4813 = vmatprep.subr.mxu1 %v6833_v15  ;;  %v3756_v61 = vmax.f32 %v6657_v26, %v3755_v43  ;;  %v3851_v26 = vld [vmem:[#allocation9 + $0x18] sm:$0xff]  ;;  %v4315_v43 = vld [vmem:[%s6766_s10] ss:$0 sm:$0xff] }
 0x416   :  { %4787 = vmatpush3.msra.mxu0 %v3670_v54  ;;  %4814 = vmatpush3.msra.mxu1 %v3770_v51 }
 0x417   :  { %4788 = vmatprep.subr.mxu0 %v6833_v15  ;;  %4815 = vmatprep.subr.mxu1 %v6833_v15  ;;  %v3757_v18 = vadd.f32 %v6664_v17, %v3756_v61  ;;  %v3850_v17 = vld [vmem:[#allocation9 + $0x10] sm:$0xff] }
 0x418   :  { %4789 = vmatpush3.msra.mxu0 %v3669_v42  ;;  %4816 = vmatpush3.msra.mxu1 %v3769_v34 }
 0x419   :  { %4790 = vmatprep.subr.mxu0 %v6833_v15  ;;  %4817 = vmatprep.subr.mxu1 %v6833_v15  ;;  %v3758_v11 = vmax.f32 %v3757_v18, 0.0 }
 0x41a   :  { %4791 = vmatpush3.msra.mxu0 %v3668_v49  ;;  %4818 = vmatpush3.msra.mxu1 %v3768_v32 }
 0x41b   :  { %4792 = vmatprep.subr.mxu0 %v6833_v15  ;;  %4819 = vmatprep.subr.mxu1 %v6833_v15 }
 0x41c   :  { %4793 = vmatpush3.msra.mxu0 %v3667_v59  ;;  %4820 = vmatpush3.msra.mxu1 %v3767_v36  ;;  %v3943_v59 = vld [vmem:[#allocation10 + $0x8] sm:$0xff]  ;;  %v3942_v36 = vld [vmem:[#allocation10] sm:$0xff] }
 0x41d   :  { %4794 = vmatprep.subr.mxu0 %v6833_v15  ;;  %4821 = vmatprep.subr.mxu1 %v6833_v15 }
 0x41e   :  { %4795 = vmatpush3.msra.mxu0 %v3666_v45  ;;  %4822 = vmatpush3.msra.mxu1 %v3766_v20  ;;  %v4314_v45 = vld [vmem:[%s6764_s8] ss:$0 sm:$0xff] }
 0x41f   :  { %4796 = vmatprep.subr.mxu0 %v6833_v15  ;;  %4823 = vmatprep.subr.mxu1 %v6833_v15 }
 0x420   :  { %4797 = vmatpush3.msra.mxu0 %v3665_v40  ;;  %4824 = vmatpush3.msra.mxu1 %v3765_v39 }
 0x421   :  { %4798 = vmatprep.subr.mxu0 %v6833_v15  ;;  %4825 = vmatprep.subr.mxu1 %v6833_v15 }
 0x422   :  { %4799 = vmatpush3.msra.mxu0 %v3664_v52  ;;  %4826 = vmatpush3.msra.mxu1 %v3764_v33 }
 0x423   :  { %4801 = vmatmul.mubr.f32.vlgmr.msra.gmra.mxu0 %v3662_v19  ;;  %4827 = vmatprep.subr.mxu1 %v6833_v15 }
 0x424   :  { %4828 = vmatpush3.msra.mxu1 %v3763_v9  ;;  %4835 = vmatprep.mubr.msk.f32.mxu1 %vm5016_vm3, %v6833_v15 }
 0x425   :  { %4829 = vmatprep.subr.mxu1 %v6833_v15  ;;  %4838 = vmatprep.subr.mxu0 %v6833_v15 }
 0x426   :  { %4830 = vmatpush3.msra.mxu1 %v3762_v25  ;;  %4870 = vmatprep.mubr.msk.f32.mxu0 %vm5016_vm3, %v6833_v15 }
 0x427   :  { %4831 = vmatprep.subr.mxu1 %v6833_v15  ;;  %4839 = vmatpush3.msra.mxu0 %v3863_v41 }
 0x428   :  { %4832 = vmatpush3.msra.mxu1 %v3761_v23  ;;  %4840 = vmatprep.subr.mxu0 %v6833_v15 }
 0x429   :  { %4833 = vmatprep.subr.mxu1 %v6833_v15  ;;  %4841 = vmatpush3.msra.mxu0 %v3862_v6 }
 0x42a   :  { %4834 = vmatpush3.msra.mxu1 %v3760_v14  ;;  %4842 = vmatprep.subr.mxu0 %v6833_v15 }
 0x42b   :  { %4836 = vmatmul.mubr.f32.vlgmr.msra.gmra.mxu1 %v3758_v11  ;;  %4873 = vmatprep.subr.mxu1 %v6833_v15 }
 0x42c   :  { %4905 = vmatprep.mubr.msk.f32.mxu1 %vm5016_vm3, %v6833_v15  ;;  %4843 = vmatpush3.msra.mxu0 %v3861_v3 }
 0x42d   :  { %4844 = vmatprep.subr.mxu0 %v6833_v15  ;;  %4874 = vmatpush3.msra.mxu1 %v3957_v28 }
 0x42e   :  { %4845 = vmatpush3.msra.mxu0 %v3860_v13  ;;  %4875 = vmatprep.subr.mxu1 %v6833_v15 }
 0x42f   :  { %4846 = vmatprep.subr.mxu0 %v6833_v15  ;;  %4876 = vmatpush3.msra.mxu1 %v3956_v60 }
 0x430   :  { %4847 = vmatpush3.msra.mxu0 %v3859_v58  ;;  %4877 = vmatprep.subr.mxu1 %v6833_v15 }
 0x431   :  { %4848 = vmatprep.subr.mxu0 %v6833_v15  ;;  %4878 = vmatpush3.msra.mxu1 %v3955_v4 }
 0x432   :  { %4849 = vmatpush3.msra.mxu0 %v3858_v7  ;;  %4879 = vmatprep.subr.mxu1 %v6833_v15 }
 0x433   :  { %4850 = vmatprep.subr.mxu0 %v6833_v15  ;;  %4880 = vmatpush3.msra.mxu1 %v3954_v30 }
 0x434   :  { %4851 = vmatpush3.msra.mxu0 %v3857_v55  ;;  %4881 = vmatprep.subr.mxu1 %v6833_v15 }
 0x435   :  { %4852 = vmatprep.subr.mxu0 %v6833_v15  ;;  %4882 = vmatpush3.msra.mxu1 %v3953_v37 }
 0x436   :  { %4853 = vmatpush3.msra.mxu0 %v3856_v48  ;;  %4883 = vmatprep.subr.mxu1 %v6833_v15 }
 0x437   :  { %4854 = vmatprep.subr.mxu0 %v6833_v15  ;;  %4884 = vmatpush3.msra.mxu1 %v3952_v1 }
 0x438   :  { %4855 = vmatpush3.msra.mxu0 %v3855_v38  ;;  %4885 = vmatprep.subr.mxu1 %v6833_v15 }
 0x439   :  { %4856 = vmatprep.subr.mxu0 %v6833_v15  ;;  %4886 = vmatpush3.msra.mxu1 %v3951_v27 }
 0x43a   :  { %4857 = vmatpush3.msra.mxu0 %v3854_v21  ;;  %4887 = vmatprep.subr.mxu1 %v6833_v15 }
 0x43b   :  { %4858 = vmatprep.subr.mxu0 %v6833_v15  ;;  %4888 = vmatpush3.msra.mxu1 %v3950_v62 }
 0x43c   :  { %4859 = vmatpush3.msra.mxu0 %v3853_v35  ;;  %4889 = vmatprep.subr.mxu1 %v6833_v15 }
 0x43d   :  { %4860 = vmatprep.subr.mxu0 %v6833_v15  ;;  %4890 = vmatpush3.msra.mxu1 %v3949_v8 }
 0x43e   :  { %4861 = vmatpush3.msra.mxu0 %v3852_v12  ;;  %4891 = vmatprep.subr.mxu1 %v6833_v15 }
 0x43f   :  { %4862 = vmatprep.subr.mxu0 %v6833_v15  ;;  %4892 = vmatpush3.msra.mxu1 %v3948_v57 }
 0x440   :  { %4863 = vmatpush3.msra.mxu0 %v3851_v26  ;;  %4893 = vmatprep.subr.mxu1 %v6833_v15 }
 0x441   :  { %4864 = vmatprep.subr.mxu0 %v6833_v15  ;;  %4894 = vmatpush3.msra.mxu1 %v3947_v31 }
 0x442   :  { %4865 = vmatpush3.msra.mxu0 %v3850_v17  ;;  %4895 = vmatprep.subr.mxu1 %v6833_v15 }
 0x443   :  { %4866 = vmatprep.subr.mxu0 %v6833_v15  ;;  %4896 = vmatpush3.msra.mxu1 %v3946_v44 }
 0x444   :  { %4867 = vmatpush3.msra.mxu0 %v3849_v29  ;;  %4897 = vmatprep.subr.mxu1 %v6833_v15 }
 0x445   :  { %4868 = vmatprep.subr.mxu0 %v6833_v15  ;;  %4898 = vmatpush3.msra.mxu1 %v3945_v63 }
 0x446   :  { %4869 = vmatpush3.msra.mxu0 %v3848_v10  ;;  %4899 = vmatprep.subr.mxu1 %v6833_v15 }
 0x447   :  { %4900 = vmatpush3.msra.mxu1 %v3944_v5 }
 0x448   :  { %4901 = vmatprep.subr.mxu1 %v6833_v15 }
 0x449   :  { %4902 = vmatpush3.msra.mxu1 %v3943_v59 }
 0x44a   :  { %4903 = vmatprep.subr.mxu1 %v6833_v15 }
 0x44b   :  { %4904 = vmatpush3.msra.mxu1 %v3942_v36 }
 0x4c3   :  { %v3554_v56 = vpop.f32.mrf.mxu0 }
 0x4c4   :  { %v3558_v54 = vadd.f32 %v4313_v24, %v3554_v56 }
 0x4c5   :  { %v4732_v46 = vpop.f32.mrf.mxu0 }
 0x4cb   :  { %v3650_v2 = vpop.f32.mrf.mxu1 }
 0x4cc   :  { %v3654_v51 = vadd.f32 %v3650_v2, %v3558_v54 }
 0x4cd   :  { %v4767_v47 = vpop.f32.mrf.mxu1 }
 0x4e3   :  { %v3746_v50 = vpop.f32.mrf.mxu0 }
 0x4e4   :  { %v3750_v42 = vadd.f32 %v3746_v50, %v3654_v51 }
 0x4e5   :  { %v4802_v0 = vpop.f32.mrf.mxu0 }
 0x4eb   :  { %v3842_v34 = vpop.f32.mrf.mxu1 }
 0x4ec   :  { %v3846_v16 = vadd.f32 %v3842_v34, %v3750_v42 }
 0x4ed   :  { %v4837_v49 = vpop.f32.mrf.mxu1 }
 0x4ee   :  { %v3847_v32 = vmax.f32 %v3846_v16, 0.0 }
 0x4f0   :  { %4871 = vmatmul.mubr.f32.vlgmr.msra.gmra.mxu0 %v3847_v32 }
 0x5b0   :  { %v3937_v20 = vpop.f32.mrf.mxu0 }
 0x5b1   :  { %v3938_v22 = vadd.f32 %v4314_v45, %v3937_v20 }
 0x5b2   :  { %v4872_v40 = vpop.f32.mrf.mxu0 }
 0x5b3   :  { %v3941_v39 = vmax.f32 %v3938_v22, 0.0 }
 0x5b5   :  { %4906 = vmatmul.mubr.f32.vlgmr.msra.gmra.mxu1 %v3941_v39 }
 0x675   :  { %v4031_v52 = vpop.f32.mrf.mxu1 }
 0x676   :  { %v4032_v33 = vadd.f32 %v4315_v43, %v4031_v52 }
 0x677   :  { %v4907_v15 = vpop.f32.mrf.mxu1 }
 0x678   :  { %v4036_v19 = vsel %vm4035_vm4, %v4032_v33, -1e+30 }
 0x679   :  { %4037 = vmax.xlane.f32.xlu0 %v4036_v19 }
 0x702   :  { %v4038_v61 = vpop.xlane.xlu0 %4037 }
 0x703   :  { %v4039_v9 = vsub.f32 %v4036_v19, %v4038_v61 }
 0x705   :  { %v4040_v25 = vmul.f32 1.442695, %v4039_v9 }
 0x707   :  { %4918 = vpow2.f32 %v4040_v25 }
 0x714   :  { %v4919_v18 = vpop.eup %4918 }
 0x715   :  { %4042 = vadd.xlane.f32.xlu1 %v4919_v18 }
 0x79e   :  { %v4043_v23 = vpop.xlane.xlu1 %4042 }
 0x79f   :  { %4920 = vrcp.f32 %v4043_v23 }
 0x7ac   :  { %v4921_v14 = vpop.eup %4920 }
 0x7ad   :  { %v4045_v11 = vmul.f32 %v4921_v14, %v4919_v18 }
 0x7af   :  { %4046 = vst [vmem:[%s6767_s11] sm:$0xff] %v4045_v11 }
 0x7b0   :  { %4051 = vsyncpa [#allocation6], 1 }
 0x7b1   :  { %4052 = vsyncpa [#allocation8], 1 }
 0x7b2   :  { %4053 = vsyncpa [#allocation11], 1 }

</bundles_post_ra>
